<compile_context>
chip_gen: v7x
topology: tpu7x:2x2x1
jax: 0.10.0
libtpu: 0.0.40
codegen_flags: <defaults>
</compile_context>

<pallas_src>
import functools
import math

import jax
import jax.numpy as jnp
from jax.experimental import pallas as pl
from jax.experimental.pallas import tpu as pltpu

CHANNELS = 64
N_BLOCKS = 9
EPS = 1e-5


def _rb9_kernel(x_ref, w_ref, b_ref, g_ref, bt_ref, alpha_ref, o_ref, *, H, W):
    """All 9 residual blocks fused; the activation never leaves VMEM.

    x_ref    : (R, C)  f32        flattened NHWC rows, R = N*H*W
    w_ref    : (9, 9, C, C) bf16  conv weights, [block, tap=(ky*3+kx), C_in, C_out]
    b_ref    : (9, 1, C) f32      conv biases
    g_ref    : (9, 1, C) f32      BN gammas
    bt_ref   : (9, 1, C) f32      BN betas
    alpha_ref: (9,)      f32      PReLU slopes (SMEM scalars)
    o_ref    : (R, C)  f32        output rows
    """
    R, C = x_ref.shape
    HW = H * W

    # ---- destination-indexed edge masks, built ONCE and pre-broadcast to (R, C) ----
    # so the 72 per-tap mask multiplies never re-emit a lane splat inside the loop.
    # r = ((n*H + h)*W + w); H, W are powers of two so mod is a bitwise AND.
    row = jax.lax.broadcasted_iota(jnp.int32, (R, 1), 0)
    w_id = jnp.bitwise_and(row, W - 1)            # w = r mod W
    hw_id = jnp.bitwise_and(row, HW - 1)          # r mod (H*W)  (encodes h)

    def _mask(cond):
        return jnp.broadcast_to(cond, (R, C)).astype(jnp.float32)

    m_wl = _mask(w_id > 0)               # dx = -1 is in-bounds
    m_wr = _mask(w_id < W - 1)           # dx = +1 is in-bounds
    m_hu = _mask(hw_id >= W)             # dy = -1 is in-bounds
    m_hd = _mask(hw_id < (H - 1) * W)    # dy = +1 is in-bounds

    inv_r = jnp.float32(1.0 / R)

    def block_body(blk, a):
        # per-block parameters (leading-axis dynamic index into VMEM/SMEM refs)
        w_blk = w_ref[blk]        # (9, C, C) bf16
        bias = b_ref[blk]         # (1, C)
        gamma = g_ref[blk]        # (1, C)
        beta = bt_ref[blk]        # (1, C)
        alpha = alpha_ref[blk]    # scalar

        def tap_dot(tap_f32, k):
            # bf16 x bf16 MXU matmul with f32 accumulation.
            return jnp.dot(tap_f32.astype(jnp.bfloat16), w_blk[k],
                           preferred_element_type=jnp.float32)

        # ---- in-kernel im2col, hierarchical: tap[r] = a[r + dy*W + dx], zeroed ----
        # ---- where (h+dy, w+dx) falls off the image (masks commute with +-W).  ----
        left = pltpu.roll(a, shift=1, axis=0) * m_wl        # a[r-1]  (dx = -1)
        right = pltpu.roll(a, shift=R - 1, axis=0) * m_wr   # a[r+1]  (dx = +1)
        mids = (left, a, right)                             # dx = -1, 0, +1

        # Conv2d(C, C, 3, stride=1, padding=1) as 9 accumulating (R,C)x(C,C) dots.
        acc = tap_dot(a, 4)                                  # (dy, dx) = (0, 0)
        for col, m in enumerate(mids):                       # dy = -1 row -> taps 0,1,2
            acc = acc + tap_dot(pltpu.roll(m, shift=W, axis=0) * m_hu, col)
        acc = acc + tap_dot(left, 3) + tap_dot(right, 5)     # dy = 0 row  -> taps 3,5
        for col, m in enumerate(mids):                       # dy = +1 row -> taps 6,7,8
            acc = acc + tap_dot(pltpu.roll(m, shift=R - W, axis=0) * m_hd, 6 + col)
        conv = acc + bias

        # ---- PReLU (single shared slope, PyTorch default) ----
        conv = jnp.where(conv >= 0.0, conv, alpha * conv)

        # ---- BatchNorm2d, training mode (biased batch stats over all R rows), ----
        # ---- folded into a single scale/shift sweep of the slab.              ----
        s1 = jnp.sum(conv, axis=0, keepdims=True)            # (1, C)
        s2 = jnp.sum(conv * conv, axis=0, keepdims=True)     # (1, C)
        mean = s1 * inv_r
        var = s2 * inv_r - mean * mean
        scale = gamma * jax.lax.rsqrt(var + EPS)
        shift = beta - mean * scale

        # residual add; activation stays in VMEM for the next block
        return a + conv * scale + shift

    a0 = x_ref[...].astype(jnp.float32)
    a_out = jax.lax.fori_loop(0, N_BLOCKS, block_body, a0)
    o_ref[...] = a_out.astype(o_ref.dtype)


def _vmem_budget_bytes():
    """~65% of this chip's per-core VMEM (64 MiB on v7x, 128 MiB on v5e/v6e)."""
    try:
        cap = getattr(pltpu.get_tpu_info(), "vmem_capacity_bytes", None)
    except Exception:
        cap = None
    if not cap:
        cap = 64 * 2**20   # conservative fallback (v7x per-TensorCore)
    return int(cap * 0.65)


def rb9_forward(x_nchw, params):
    """NCHW input -> NCHW output; all 9 residual blocks in one pallas_call."""
    w_all, b_all, g_all, bt_all, alpha_all = params
    N, C, H, W = x_nchw.shape
    assert C == CHANNELS, (C, CHANNELS)
    # TODO(synk): support non-power-of-two H/W by passing precomputed edge masks.
    assert (H & (H - 1)) == 0 and (W & (W - 1)) == 0, "H and W must be powers of two"
    R = N * H * W

    # (blk, ky, kx, Cin, Cout) -> (blk, tap, Cin, Cout), bf16 for the MXU.
    w_bf16 = w_all.reshape(N_BLOCKS, 9, CHANNELS, CHANNELS).astype(jnp.bfloat16)

    vmem_budget = _vmem_budget_bytes()
    # Peak-live estimate: x/out/residual slabs + 4 pre-broadcast masks + left/right
    # taps + acc/conv + one transient tap (f32 + bf16), all (R, C); plus bf16 weights.
    est_bytes = int(4 * CHANNELS * R * 11.5) + w_bf16.size * 2 + (1 << 20)
    if est_bytes > vmem_budget:
        # TODO(synk): row-tiled grid + two-pass BatchNorm (partial sum/sumsq) for
        # activations too large to keep VMEM-resident.
        raise NotImplementedError("activation slab too large for the VMEM-resident path")

    x = jnp.transpose(x_nchw, (0, 2, 3, 1)).astype(jnp.float32).reshape(R, C)

    out = pl.pallas_call(
        functools.partial(_rb9_kernel, H=H, W=W),
        out_shape=jax.ShapeDtypeStruct((R, C), jnp.float32),
        in_specs=[
            pl.BlockSpec(memory_space=pltpu.MemorySpace.VMEM),   # x (R, C)
            pl.BlockSpec(memory_space=pltpu.MemorySpace.VMEM),   # w (9, 9, C, C) bf16
            pl.BlockSpec(memory_space=pltpu.MemorySpace.VMEM),   # conv biases
            pl.BlockSpec(memory_space=pltpu.MemorySpace.VMEM),   # BN gammas
            pl.BlockSpec(memory_space=pltpu.MemorySpace.VMEM),   # BN betas
            pl.BlockSpec(memory_space=pltpu.MemorySpace.SMEM),   # PReLU slopes
        ],
        out_specs=pl.BlockSpec(memory_space=pltpu.MemorySpace.VMEM),
        compiler_params=pltpu.CompilerParams(vmem_limit_bytes=vmem_budget),
    )(x, w_bf16, b_all, g_all, bt_all, alpha_all)

    # TODO(synk): on v7x, shard N across the 2 TensorCores (core_map + cross-core
    # BN sum/sumsq exchange) to use the whole chip; this path is single-core.
    return jnp.transpose(out.reshape(N, H, W, C), (0, 3, 1, 2))


def init_params(key):
    """Deterministic synthetic params mirroring the PyTorch module shapes/defaults.

    Conv weights are stored HWIO per block: (blk, ky, kx, C_in, C_out). NOTE: real
    PyTorch Conv2d weights are (C_out, C_in, ky, kx); permute with
    w.transpose(2, 3, 1, 0) when porting trained weights.
    """
    fan_in = CHANNELS * 9
    bound = 1.0 / math.sqrt(fan_in)
    w_list, b_list = [], []
    for _ in range(N_BLOCKS):
        key, kw, kb = jax.random.split(key, 3)
        w_list.append(jax.random.uniform(kw, (3, 3, CHANNELS, CHANNELS), jnp.float32,
                                         minval=-bound, maxval=bound))
        b_list.append(jax.random.uniform(kb, (1, CHANNELS), jnp.float32,
                                         minval=-bound, maxval=bound))
    w_all = jnp.stack(w_list)                                   # (9, 3, 3, 64, 64)
    b_all = jnp.stack(b_list)                                   # (9, 1, 64)
    g_all = jnp.ones((N_BLOCKS, 1, CHANNELS), jnp.float32)      # BN weight default
    bt_all = jnp.zeros((N_BLOCKS, 1, CHANNELS), jnp.float32)    # BN bias default
    alpha_all = jnp.full((N_BLOCKS,), 0.25, jnp.float32)        # PReLU default
    return (w_all, b_all, g_all, bt_all, alpha_all)


def rb9_reference(x_nchw, params):
    """Pure-JAX f32 reference of the PyTorch module (training-mode BN)."""
    w_all, b_all, g_all, bt_all, alpha_all = params
    x = x_nchw.astype(jnp.float32)
    for blk in range(N_BLOCKS):
        y = jax.lax.conv_general_dilated(
            x, w_all[blk], window_strides=(1, 1), padding=((1, 1), (1, 1)),
            dimension_numbers=("NCHW", "HWIO", "NCHW"),
            precision=jax.lax.Precision.HIGHEST)
        y = y + b_all[blk].reshape(1, CHANNELS, 1, 1)
        y = jnp.where(y >= 0.0, y, alpha_all[blk] * y)
        mean = jnp.mean(y, axis=(0, 2, 3), keepdims=True)
        var = jnp.mean(jnp.square(y - mean), axis=(0, 2, 3), keepdims=True)
        y = (y - mean) * jax.lax.rsqrt(var + EPS)
        y = y * g_all[blk].reshape(1, CHANNELS, 1, 1) + bt_all[blk].reshape(1, CHANNELS, 1, 1)
        x = x + y
    return x


if __name__ == "__main__":
    key = jax.random.PRNGKey(0)
    x = jax.random.normal(key, (2, CHANNELS, 16, 16), dtype=jnp.float32)  # NCHW
    params = init_params(jax.random.PRNGKey(1))

    out = jax.block_until_ready(jax.jit(rb9_forward)(x, params))
    assert out.shape == x.shape, (out.shape, x.shape)
    assert bool(jnp.all(jnp.isfinite(out)))

    ref = jax.block_until_ready(jax.jit(rb9_reference)(x, params))
    err = float(jnp.max(jnp.abs(out - ref)))
    # bf16 MXU operands introduce ~0.3% relative error per block vs the f32 reference.
    tol = 5e-2 * max(1.0, float(jnp.max(jnp.abs(ref))))
    assert err < tol, f"max abs diff vs reference too large: {err} (tol {tol})"

    print("KERNEL_OK")
</pallas_src>

<mosaic_0001>
module attributes {stable_mosaic.version = 11 : i64} {
  func.func @_rb9_kernel(%arg0: memref<512x64xf32, #tpu.memory_space<vmem>>, %arg1: memref<9x9x64x64xbf16, #tpu.memory_space<vmem>>, %arg2: memref<9x1x64xf32, #tpu.memory_space<vmem>>, %arg3: memref<9x1x64xf32, #tpu.memory_space<vmem>>, %arg4: memref<9x1x64xf32, #tpu.memory_space<vmem>>, %arg5: memref<9xf32, #tpu.memory_space<smem>>, %arg6: memref<512x64xf32, #tpu.memory_space<vmem>>) attributes {dimension_semantics = [], scalar_prefetch = 0 : i64, scratch_operands = 0 : i64, tpu.core_type = #tpu.core_type<tc>} {
    %0 = tpu.iota {dimensions = array<i32: 0>} : vector<512x1xi32>
    %c15_i32 = arith.constant 15 : i32
    %1 = vector.broadcast %c15_i32 : i32 to vector<512x1xi32>
    %2 = arith.andi %0, %1 : vector<512x1xi32>
    %c255_i32 = arith.constant 255 : i32
    %3 = vector.broadcast %c255_i32 : i32 to vector<512x1xi32>
    %4 = arith.andi %0, %3 : vector<512x1xi32>
    %c0_i32 = arith.constant 0 : i32
    %5 = vector.broadcast %c0_i32 : i32 to vector<512x1xi32>
    %6 = arith.cmpi sgt, %2, %5 : vector<512x1xi32>
    %7 = vector.shape_cast %6 : vector<512x1xi1> to vector<512x1xi1>
    %8 = vector.broadcast %7 : vector<512x1xi1> to vector<512x64xi1>
    %9 = arith.extui %8 : vector<512x64xi1> to vector<512x64xi32>
    %10 = arith.sitofp %9 : vector<512x64xi32> to vector<512x64xf32>
    %c15_i32_0 = arith.constant 15 : i32
    %11 = vector.broadcast %c15_i32_0 : i32 to vector<512x1xi32>
    %12 = arith.cmpi slt, %2, %11 : vector<512x1xi32>
    %13 = vector.shape_cast %12 : vector<512x1xi1> to vector<512x1xi1>
    %14 = vector.broadcast %13 : vector<512x1xi1> to vector<512x64xi1>
    %15 = arith.extui %14 : vector<512x64xi1> to vector<512x64xi32>
    %16 = arith.sitofp %15 : vector<512x64xi32> to vector<512x64xf32>
    %c16_i32 = arith.constant 16 : i32
    %17 = vector.broadcast %c16_i32 : i32 to vector<512x1xi32>
    %18 = arith.cmpi sge, %4, %17 : vector<512x1xi32>
    %19 = vector.shape_cast %18 : vector<512x1xi1> to vector<512x1xi1>
    %20 = vector.broadcast %19 : vector<512x1xi1> to vector<512x64xi1>
    %21 = arith.extui %20 : vector<512x64xi1> to vector<512x64xi32>
    %22 = arith.sitofp %21 : vector<512x64xi32> to vector<512x64xf32>
    %c240_i32 = arith.constant 240 : i32
    %23 = vector.broadcast %c240_i32 : i32 to vector<512x1xi32>
    %24 = arith.cmpi slt, %4, %23 : vector<512x1xi32>
    %25 = vector.shape_cast %24 : vector<512x1xi1> to vector<512x1xi1>
    %26 = vector.broadcast %25 : vector<512x1xi1> to vector<512x64xi1>
    %27 = arith.extui %26 : vector<512x64xi1> to vector<512x64xi32>
    %28 = arith.sitofp %27 : vector<512x64xi32> to vector<512x64xf32>
    %c0 = arith.constant 0 : index
    %c0_1 = arith.constant 0 : index
    %29 = vector.load %arg0[%c0, %c0_1] : memref<512x64xf32, #tpu.memory_space<vmem>>, vector<512x64xf32>
    %cst = arith.constant 0.001953125 : f32
    %c0_i32_2 = arith.constant 0 : i32
    %c9_i32 = arith.constant 9 : i32
    %30 = arith.addi %c0_i32_2, %c9_i32 : i32
    %c1_i32 = arith.constant 1 : i32
    %31 = scf.for %arg7 = %c0_i32_2 to %30 step %c1_i32 iter_args(%arg8 = %29) -> (vector<512x64xf32>)  : i32 {
      %33 = arith.index_cast %arg7 : i32 to index
      %c0_6 = arith.constant 0 : index
      %c0_7 = arith.constant 0 : index
      %c0_8 = arith.constant 0 : index
      %34 = vector.load %arg1[%33, %c0_6, %c0_7, %c0_8] : memref<9x9x64x64xbf16, #tpu.memory_space<vmem>>, vector<1x9x64x64xbf16>
      %35 = vector.shape_cast %34 : vector<1x9x64x64xbf16> to vector<9x64x64xbf16>
      %36 = arith.index_cast %arg7 : i32 to index
      %c0_9 = arith.constant 0 : index
      %c0_10 = arith.constant 0 : index
      %37 = vector.load %arg2[%36, %c0_9, %c0_10] : memref<9x1x64xf32, #tpu.memory_space<vmem>>, vector<1x1x64xf32>
      %38 = vector.shape_cast %37 : vector<1x1x64xf32> to vector<1x64xf32>
      %39 = arith.index_cast %arg7 : i32 to index
      %c0_11 = arith.constant 0 : index
      %c0_12 = arith.constant 0 : index
      %40 = vector.load %arg3[%39, %c0_11, %c0_12] : memref<9x1x64xf32, #tpu.memory_space<vmem>>, vector<1x1x64xf32>
      %41 = vector.shape_cast %40 : vector<1x1x64xf32> to vector<1x64xf32>
      %42 = arith.index_cast %arg7 : i32 to index
      %c0_13 = arith.constant 0 : index
      %c0_14 = arith.constant 0 : index
      %43 = vector.load %arg4[%42, %c0_13, %c0_14] : memref<9x1x64xf32, #tpu.memory_space<vmem>>, vector<1x1x64xf32>
      %44 = vector.shape_cast %43 : vector<1x1x64xf32> to vector<1x64xf32>
      %45 = arith.index_cast %arg7 : i32 to index
      %46 = memref.load %arg5[%45] : memref<9xf32, #tpu.memory_space<smem>>
      %c1_i32_15 = arith.constant 1 : i32
      %47 = tpu.dynamic_rotate %arg8 by %c1_i32_15 dim 0 : vector<512x64xf32>, i32 -> vector<512x64xf32>
      %48 = arith.mulf %47, %10 : vector<512x64xf32>
      %c511_i32 = arith.constant 511 : i32
      %49 = tpu.dynamic_rotate %arg8 by %c511_i32 dim 0 : vector<512x64xf32>, i32 -> vector<512x64xf32>
      %50 = arith.mulf %49, %16 : vector<512x64xf32>
      %51 = arith.truncf %arg8 : vector<512x64xf32> to vector<512x64xbf16>
      %52 = vector.extract_strided_slice %35 {offsets = [4, 0, 0], sizes = [1, 64, 64], strides = [1, 1, 1]} : vector<9x64x64xbf16> to vector<1x64x64xbf16>
      %53 = vector.shape_cast %52 : vector<1x64x64xbf16> to vector<64x64xbf16>
      %cst_16 = arith.constant dense<0.000000e+00> : vector<512x64xf32>
      %54 = tpu.matmul %51, %53, %cst_16 {dimension_numbers = #tpu.dot_dimension_numbers<[1], [0], [0], [1], [0, 0, 1, 1], [], []>} : vector<512x64xbf16>, vector<64x64xbf16>, vector<512x64xf32> -> vector<512x64xf32>
      %c16_i32_17 = arith.constant 16 : i32
      %55 = tpu.dynamic_rotate %48 by %c16_i32_17 dim 0 : vector<512x64xf32>, i32 -> vector<512x64xf32>
      %56 = arith.mulf %55, %22 : vector<512x64xf32>
      %57 = arith.truncf %56 : vector<512x64xf32> to vector<512x64xbf16>
      %58 = vector.extract_strided_slice %35 {offsets = [0, 0, 0], sizes = [1, 64, 64], strides = [1, 1, 1]} : vector<9x64x64xbf16> to vector<1x64x64xbf16>
      %59 = vector.shape_cast %58 : vector<1x64x64xbf16> to vector<64x64xbf16>
      %cst_18 = arith.constant dense<0.000000e+00> : vector<512x64xf32>
      %60 = tpu.matmul %57, %59, %cst_18 {dimension_numbers = #tpu.dot_dimension_numbers<[1], [0], [0], [1], [0, 0, 1, 1], [], []>} : vector<512x64xbf16>, vector<64x64xbf16>, vector<512x64xf32> -> vector<512x64xf32>
      %61 = arith.addf %54, %60 : vector<512x64xf32>
      %c16_i32_19 = arith.constant 16 : i32
      %62 = tpu.dynamic_rotate %arg8 by %c16_i32_19 dim 0 : vector<512x64xf32>, i32 -> vector<512x64xf32>
      %63 = arith.mulf %62, %22 : vector<512x64xf32>
      %64 = arith.truncf %63 : vector<512x64xf32> to vector<512x64xbf16>
      %65 = vector.extract_strided_slice %35 {offsets = [1, 0, 0], sizes = [1, 64, 64], strides = [1, 1, 1]} : vector<9x64x64xbf16> to vector<1x64x64xbf16>
      %66 = vector.shape_cast %65 : vector<1x64x64xbf16> to vector<64x64xbf16>
      %cst_20 = arith.constant dense<0.000000e+00> : vector<512x64xf32>
      %67 = tpu.matmul %64, %66, %cst_20 {dimension_numbers = #tpu.dot_dimension_numbers<[1], [0], [0], [1], [0, 0, 1, 1], [], []>} : vector<512x64xbf16>, vector<64x64xbf16>, vector<512x64xf32> -> vector<512x64xf32>
      %68 = arith.addf %61, %67 : vector<512x64xf32>
      %c16_i32_21 = arith.constant 16 : i32
      %69 = tpu.dynamic_rotate %50 by %c16_i32_21 dim 0 : vector<512x64xf32>, i32 -> vector<512x64xf32>
      %70 = arith.mulf %69, %22 : vector<512x64xf32>
      %71 = arith.truncf %70 : vector<512x64xf32> to vector<512x64xbf16>
      %72 = vector.extract_strided_slice %35 {offsets = [2, 0, 0], sizes = [1, 64, 64], strides = [1, 1, 1]} : vector<9x64x64xbf16> to vector<1x64x64xbf16>
      %73 = vector.shape_cast %72 : vector<1x64x64xbf16> to vector<64x64xbf16>
      %cst_22 = arith.constant dense<0.000000e+00> : vector<512x64xf32>
      %74 = tpu.matmul %71, %73, %cst_22 {dimension_numbers = #tpu.dot_dimension_numbers<[1], [0], [0], [1], [0, 0, 1, 1], [], []>} : vector<512x64xbf16>, vector<64x64xbf16>, vector<512x64xf32> -> vector<512x64xf32>
      %75 = arith.addf %68, %74 : vector<512x64xf32>
      %76 = arith.truncf %48 : vector<512x64xf32> to vector<512x64xbf16>
      %77 = vector.extract_strided_slice %35 {offsets = [3, 0, 0], sizes = [1, 64, 64], strides = [1, 1, 1]} : vector<9x64x64xbf16> to vector<1x64x64xbf16>
      %78 = vector.shape_cast %77 : vector<1x64x64xbf16> to vector<64x64xbf16>
      %cst_23 = arith.constant dense<0.000000e+00> : vector<512x64xf32>
      %79 = tpu.matmul %76, %78, %cst_23 {dimension_numbers = #tpu.dot_dimension_numbers<[1], [0], [0], [1], [0, 0, 1, 1], [], []>} : vector<512x64xbf16>, vector<64x64xbf16>, vector<512x64xf32> -> vector<512x64xf32>
      %80 = arith.addf %75, %79 : vector<512x64xf32>
      %81 = arith.truncf %50 : vector<512x64xf32> to vector<512x64xbf16>
      %82 = vector.extract_strided_slice %35 {offsets = [5, 0, 0], sizes = [1, 64, 64], strides = [1, 1, 1]} : vector<9x64x64xbf16> to vector<1x64x64xbf16>
      %83 = vector.shape_cast %82 : vector<1x64x64xbf16> to vector<64x64xbf16>
      %cst_24 = arith.constant dense<0.000000e+00> : vector<512x64xf32>
      %84 = tpu.matmul %81, %83, %cst_24 {dimension_numbers = #tpu.dot_dimension_numbers<[1], [0], [0], [1], [0, 0, 1, 1], [], []>} : vector<512x64xbf16>, vector<64x64xbf16>, vector<512x64xf32> -> vector<512x64xf32>
      %85 = arith.addf %80, %84 : vector<512x64xf32>
      %c496_i32 = arith.constant 496 : i32
      %86 = tpu.dynamic_rotate %48 by %c496_i32 dim 0 : vector<512x64xf32>, i32 -> vector<512x64xf32>
      %87 = arith.mulf %86, %28 : vector<512x64xf32>
      %88 = arith.truncf %87 : vector<512x64xf32> to vector<512x64xbf16>
      %89 = vector.extract_strided_slice %35 {offsets = [6, 0, 0], sizes = [1, 64, 64], strides = [1, 1, 1]} : vector<9x64x64xbf16> to vector<1x64x64xbf16>
      %90 = vector.shape_cast %89 : vector<1x64x64xbf16> to vector<64x64xbf16>
      %cst_25 = arith.constant dense<0.000000e+00> : vector<512x64xf32>
      %91 = tpu.matmul %88, %90, %cst_25 {dimension_numbers = #tpu.dot_dimension_numbers<[1], [0], [0], [1], [0, 0, 1, 1], [], []>} : vector<512x64xbf16>, vector<64x64xbf16>, vector<512x64xf32> -> vector<512x64xf32>
      %92 = arith.addf %85, %91 : vector<512x64xf32>
      %c496_i32_26 = arith.constant 496 : i32
      %93 = tpu.dynamic_rotate %arg8 by %c496_i32_26 dim 0 : vector<512x64xf32>, i32 -> vector<512x64xf32>
      %94 = arith.mulf %93, %28 : vector<512x64xf32>
      %95 = arith.truncf %94 : vector<512x64xf32> to vector<512x64xbf16>
      %96 = vector.extract_strided_slice %35 {offsets = [7, 0, 0], sizes = [1, 64, 64], strides = [1, 1, 1]} : vector<9x64x64xbf16> to vector<1x64x64xbf16>
      %97 = vector.shape_cast %96 : vector<1x64x64xbf16> to vector<64x64xbf16>
      %cst_27 = arith.constant dense<0.000000e+00> : vector<512x64xf32>
      %98 = tpu.matmul %95, %97, %cst_27 {dimension_numbers = #tpu.dot_dimension_numbers<[1], [0], [0], [1], [0, 0, 1, 1], [], []>} : vector<512x64xbf16>, vector<64x64xbf16>, vector<512x64xf32> -> vector<512x64xf32>
      %99 = arith.addf %92, %98 : vector<512x64xf32>
      %c496_i32_28 = arith.constant 496 : i32
      %100 = tpu.dynamic_rotate %50 by %c496_i32_28 dim 0 : vector<512x64xf32>, i32 -> vector<512x64xf32>
      %101 = arith.mulf %100, %28 : vector<512x64xf32>
      %102 = arith.truncf %101 : vector<512x64xf32> to vector<512x64xbf16>
      %103 = vector.extract_strided_slice %35 {offsets = [8, 0, 0], sizes = [1, 64, 64], strides = [1, 1, 1]} : vector<9x64x64xbf16> to vector<1x64x64xbf16>
      %104 = vector.shape_cast %103 : vector<1x64x64xbf16> to vector<64x64xbf16>
      %cst_29 = arith.constant dense<0.000000e+00> : vector<512x64xf32>
      %105 = tpu.matmul %102, %104, %cst_29 {dimension_numbers = #tpu.dot_dimension_numbers<[1], [0], [0], [1], [0, 0, 1, 1], [], []>} : vector<512x64xbf16>, vector<64x64xbf16>, vector<512x64xf32> -> vector<512x64xf32>
      %106 = arith.addf %99, %105 : vector<512x64xf32>
      %107 = vector.broadcast %38 : vector<1x64xf32> to vector<512x64xf32>
      %108 = arith.addf %106, %107 : vector<512x64xf32>
      %cst_30 = arith.constant 0.000000e+00 : f32
      %109 = vector.broadcast %cst_30 : f32 to vector<512x64xf32>
      %110 = arith.cmpf oge, %108, %109 : vector<512x64xf32>
      %111 = vector.broadcast %46 : f32 to vector<512x64xf32>
      %112 = arith.mulf %111, %108 : vector<512x64xf32>
      %113 = arith.select %110, %108, %112 : vector<512x64xi1>, vector<512x64xf32>
      %cst_31 = arith.constant dense<0.000000e+00> : vector<64xf32>
      %114 = vector.multi_reduction <add>, %113, %cst_31 [0] : vector<512x64xf32> to vector<64xf32>
      %115 = vector.shape_cast %114 : vector<64xf32> to vector<1x64xf32>
      %116 = arith.mulf %113, %113 : vector<512x64xf32>
      %cst_32 = arith.constant dense<0.000000e+00> : vector<64xf32>
      %117 = vector.multi_reduction <add>, %116, %cst_32 [0] : vector<512x64xf32> to vector<64xf32>
      %118 = vector.shape_cast %117 : vector<64xf32> to vector<1x64xf32>
      %119 = vector.broadcast %cst : f32 to vector<1x64xf32>
      %120 = arith.mulf %115, %119 : vector<1x64xf32>
      %121 = vector.broadcast %cst : f32 to vector<1x64xf32>
      %122 = arith.mulf %118, %121 : vector<1x64xf32>
      %123 = arith.mulf %120, %120 : vector<1x64xf32>
      %124 = arith.subf %122, %123 : vector<1x64xf32>
      %cst_33 = arith.constant 9.99999974E-6 : f32
      %125 = vector.broadcast %cst_33 : f32 to vector<1x64xf32>
      %126 = arith.addf %124, %125 : vector<1x64xf32>
      %127 = math.rsqrt %126 : vector<1x64xf32>
      %128 = arith.mulf %41, %127 : vector<1x64xf32>
      %129 = arith.mulf %120, %128 : vector<1x64xf32>
      %130 = arith.subf %44, %129 : vector<1x64xf32>
      %131 = vector.broadcast %128 : vector<1x64xf32> to vector<512x64xf32>
      %132 = arith.mulf %113, %131 : vector<512x64xf32>
      %133 = arith.addf %arg8, %132 : vector<512x64xf32>
      %134 = vector.broadcast %130 : vector<1x64xf32> to vector<512x64xf32>
      %135 = arith.addf %133, %134 : vector<512x64xf32>
      scf.yield %135 : vector<512x64xf32>
    }
    %c9_i32_3 = arith.constant 9 : i32
    %c0_4 = arith.constant 0 : index
    %c0_5 = arith.constant 0 : index
    %32 = vector.load %arg6[%c0_4, %c0_5] : memref<512x64xf32, #tpu.memory_space<vmem>>, vector<512x64xf32>
    tpu.vector_store %arg6[%c0_4, %c0_5], %31 {strides = array<i32>} : memref<512x64xf32, #tpu.memory_space<vmem>>, vector<512x64xf32>,
    return
  }
}

</mosaic_0001>

<bundles_post_ra>
// kernel: rb9_forward.1
= control target key start
LH: loop header
LB: loop body
LE: loop exit
PB: predicated region body
PF: predicated region fallthrough
CT: control target
= control target key end

     0   :  { %11 = vsyncpa [#allocation4], 0  ;;  %s16082_s0 = inlined_call_operand.vmem [shape: f32[512,64], index: 0, kind: input, shape index: {}]   ;;  %s16083_s1 = inlined_call_operand.vmem [shape: bf16[9,9,64,64], index: 1, kind: input, shape index: {}]   ;;  %s16084_s2 = inlined_call_operand.vmem [shape: f32[9,1,64], index: 2, kind: input, shape index: {}]   ;;  %s16085_s3 = inlined_call_operand.vmem [shape: f32[9,1,64], index: 3, kind: input, shape index: {}]   ;;  %s16086_s4 = inlined_call_operand.vmem [shape: f32[9,1,64], index: 4, kind: input, shape index: {}]   ;;  %s16087_s5 = inlined_call_operand.vmem [shape: f32[9], index: 5, kind: input, shape index: {}]   ;;  %s16088_s6 = inlined_call_operand.hbm [shape: f32[512,64], index: 6, kind: output, shape index: {}]  }
   0x1   :  { %12 = vsyncpa [#allocation3], 0  ;;  %s29_s23 = sshll.u32 %s16087_s5, 4  ;;  %s30_s23 = int_to_ptr.vmem [resolvable:$true] %s29_s23 }
   0x2   :  { %s10456_s24 = scalar_lea.vmem %s30_s23, 16  ;;  %p10461_p1 = scmp.lt.s32.totalorder %s30_s23, %s30_s23 }
   0x3   :  { %p10457_p0 = scmp.ne.s32.totalorder %s30_s23, %s10456_s24  ;;  %p10462_p2 = scmp.lt.s32.totalorder %s10456_s24, %s10456_s24 }
   0x5   :  { %p10463_p3 = por %p10462_p2, %p10461_p1 }
   0x7   :  { %p10464_p4 = pnand %p10463_p3, %p10457_p0 }
   0x9   :  { %10467 = shalt.err (!%p10464_p4)
}
   0xa   :  { %s11014_s25 = smov [#allocation2]  }
   0xb   :  { %32 = dma.vmem_to_smem %s30_s23, 16, %s11014_s25, [#allocation4]  }
   0xc   :  { %10750 = dma.done.wait [#allocation4], 16  }
   0xd   :  { %10751 = vsyncadd [#allocation4], 4294967280 }
   0xe   :  { %36 = sfence }
   0xf   :  { %v38_v0 = vlaneseq  ;;  %v11060_v1 = vld [vmem:[%s16082_s0] sm:$0xff]   ;;  %v11065_v2 = vld [vmem:[%s16082_s0 + $0x8] sm:$0xff]   ;;  %v11070_v3 = vld [vmem:[%s16082_s0 + $0x10] sm:$0xff]  }
  0x10   :  { %16388 = vst [vmem:[#allocation8_spill] sm:$0xff] %v11060_v1  ;;  %16389 = vst [vmem:[#allocation9_spill] sm:$0xff] %v11065_v2  ;;  %v11075_v4 = vld [vmem:[%s16082_s0 + $0x18] sm:$0xff]   ;;  %v11080_v5 = vld [vmem:[%s16082_s0 + $0x20] sm:$0xff]  }
  0x11   :  { %16390 = vst [vmem:[#allocation10_spill] sm:$0xff] %v11070_v3  ;;  %16391 = vst [vmem:[#allocation11_spill] sm:$0xff] %v11075_v4  ;;  %v11085_v6 = vld [vmem:[%s16082_s0 + $0x28] sm:$0xff]   ;;  %v11087_v7 = vshrl.u32 %v38_v0, 7  ;;  %v11092_v8 = vld [vmem:[%s16082_s0 + $0x30] sm:$0xff]  }
  0x12   :  { %16392 = vst [vmem:[#allocation12_spill] sm:$0xff] %v11080_v5  ;;  %16393 = vst [vmem:[#allocation13_spill] sm:$0xff] %v11085_v6  ;;  %v11097_v9 = vld [vmem:[%s16082_s0 + $0x38] sm:$0xff]   ;;  %v11102_v10 = vld [vmem:[%s16082_s0 + $0x40] sm:$0xff]  }
  0x13   :  { %16394 = vst [vmem:[#allocation14_spill] sm:$0xff] %v11087_v7  ;;  %16395 = vst [vmem:[#allocation15_spill] sm:$0xff] %v11092_v8  ;;  %v11107_v11 = vld [vmem:[%s16082_s0 + $0x48] sm:$0xff]   ;;  %v11112_v12 = vld [vmem:[%s16082_s0 + $0x50] sm:$0xff]   ;;  %v11120_v14 = vadd.s32 8, %v11087_v7  ;;  %v11123_v15 = vadd.s32 16, %v11087_v7 }
  0x14   :  { %16396 = vst [vmem:[#allocation16_spill] sm:$0xff] %v11097_v9  ;;  %16397 = vst [vmem:[#allocation17_spill] sm:$0xff] %v11102_v10  ;;  %v11117_v13 = vld [vmem:[%s16082_s0 + $0x58] sm:$0xff]   ;;  %v11126_v16 = vadd.s32 24, %v11087_v7  ;;  %v11129_v17 = vadd.s32 32, %v11087_v7  ;;  %v11134_v18 = vld [vmem:[%s16082_s0 + $0x60] sm:$0xff]  }
  0x15   :  { %16398 = vst [vmem:[#allocation18_spill] sm:$0xff] %v11107_v11  ;;  %16399 = vst [vmem:[#allocation19_spill] sm:$0xff] %v11112_v12  ;;  %v11139_v19 = vld [vmem:[%s16082_s0 + $0x68] sm:$0xff]   ;;  %v11142_v20 = vadd.s32 40, %v11087_v7  ;;  %v11145_v21 = vadd.s32 48, %v11087_v7  ;;  %v11148_v22 = vadd.s32 56, %v11087_v7 }
  0x16   :  { %16400 = vst [vmem:[#allocation20_spill] sm:$0xff] %v11117_v13  ;;  %16401 = vst [vmem:[#allocation21_spill] sm:$0xff] %v11134_v18  ;;  %v11151_v23 = vadd.s32 64, %v11087_v7  ;;  %v11156_v24 = vld [vmem:[%s16082_s0 + $0x70] sm:$0xff]   ;;  %v11161_v25 = vld [vmem:[%s16082_s0 + $0x78] sm:$0xff]   ;;  %v11164_v26 = vadd.s32 72, %v11087_v7 }
  0x17   :  { %16402 = vst [vmem:[#allocation22_spill] sm:$0xff] %v11139_v19  ;;  %16403 = vst [vmem:[#allocation23_spill] sm:$0xff] %v11156_v24  ;;  %v11167_v27 = vadd.s32 80, %v11087_v7  ;;  %v11170_v28 = vadd.s32 88, %v11087_v7  ;;  %v11173_v29 = vadd.s32 96, %v11087_v7  ;;  %v11178_v30 = vld [vmem:[%s16082_s0 + $0x80] sm:$0xff]  }
  0x18   :  { %16404 = vst [vmem:[#allocation24_spill] sm:$0xff] %v11161_v25  ;;  %16405 = vst [vmem:[#allocation25_spill] sm:$0xff] %v11178_v30  ;;  %v11183_v31 = vld [vmem:[%s16082_s0 + $0x88] sm:$0xff]   ;;  %v11186_v32 = vadd.s32 104, %v11087_v7  ;;  %v11189_v33 = vadd.s32 112, %v11087_v7  ;;  %v11192_v34 = vadd.s32 120, %v11087_v7 }
  0x19   :  { %16406 = vst [vmem:[#allocation26_spill] sm:$0xff] %v11183_v31  ;;  %v11195_v35 = vadd.s32 128, %v11087_v7  ;;  %v11200_v36 = vld [vmem:[%s16082_s0 + $0x90] sm:$0xff]   ;;  %v11205_v37 = vld [vmem:[%s16082_s0 + $0x98] sm:$0xff]   ;;  %v11208_v38 = vadd.s32 136, %v11087_v7  ;;  %v11211_v39 = vadd.s32 144, %v11087_v7 }
  0x1a   :  { %16407 = vst [vmem:[#allocation27_spill] sm:$0xff] %v11200_v36  ;;  %16408 = vst [vmem:[#allocation28_spill] sm:$0xff] %v11205_v37  ;;  %v11214_v40 = vadd.s32 152, %v11087_v7  ;;  %v11217_v41 = vadd.s32 160, %v11087_v7  ;;  %v11222_v42 = vld [vmem:[%s16082_s0 + $0xa0] sm:$0xff]   ;;  %v11227_v43 = vld [vmem:[%s16082_s0 + $0xa8] sm:$0xff]  }
  0x1b   :  { %16409 = vst [vmem:[#allocation29_spill] sm:$0xff] %v11222_v42  ;;  %16410 = vst [vmem:[#allocation30_spill] sm:$0xff] %v11227_v43  ;;  %v11230_v44 = vadd.s32 168, %v11087_v7  ;;  %v11233_v45 = vadd.s32 176, %v11087_v7  ;;  %v11236_v46 = vadd.s32 184, %v11087_v7  ;;  %v11239_v47 = vadd.s32 192, %v11087_v7 }
  0x1c   :  { %v11244_v48 = vld [vmem:[%s16082_s0 + $0xb0] sm:$0xff]   ;;  %v11249_v49 = vld [vmem:[%s16082_s0 + $0xb8] sm:$0xff]   ;;  %v11252_v50 = vadd.s32 200, %v11087_v7  ;;  %v11255_v51 = vadd.s32 208, %v11087_v7  ;;  %v11258_v52 = vadd.s32 216, %v11087_v7  ;;  %v11261_v53 = vadd.s32 224, %v11087_v7 }
  0x1d   :  { %16411 = vst [vmem:[#allocation31_spill] sm:$0xff] %v11244_v48  ;;  %16412 = vst [vmem:[#allocation32_spill] sm:$0xff] %v11249_v49  ;;  %v11266_v54 = vld [vmem:[%s16082_s0 + $0xc0] sm:$0xff]   ;;  %v11271_v55 = vld [vmem:[%s16082_s0 + $0xc8] sm:$0xff]   ;;  %v11274_v56 = vadd.s32 232, %v11087_v7  ;;  %v11277_v57 = vadd.s32 240, %v11087_v7 }
  0x1e   :  { %16413 = vst [vmem:[#allocation33_spill] sm:$0xff] %v11266_v54  ;;  %16414 = vst [vmem:[#allocation34_spill] sm:$0xff] %v11271_v55  ;;  %v11280_v58 = vadd.s32 248, %v11087_v7  ;;  %v11283_v59 = vadd.s32 256, %v11087_v7  ;;  %v11288_v60 = vld [vmem:[%s16082_s0 + $0xd0] sm:$0xff]   ;;  %v11293_v61 = vld [vmem:[%s16082_s0 + $0xd8] sm:$0xff]  }
  0x1f   :  { %16415 = vst [vmem:[#allocation35_spill] sm:$0xff] %v11288_v60  ;;  %16416 = vst [vmem:[#allocation36_spill] sm:$0xff] %v11293_v61  ;;  %v11296_v62 = vadd.s32 264, %v11087_v7  ;;  %v11299_v63 = vadd.s32 272, %v11087_v7  ;;  %v11302_v0 = vadd.s32 280, %v11087_v7  ;;  %v11305_v1 = vadd.s32 288, %v11087_v7 }
  0x20   :  { %v11310_v2 = vld [vmem:[%s16082_s0 + $0xe0] sm:$0xff]   ;;  %v11315_v3 = vld [vmem:[%s16082_s0 + $0xe8] sm:$0xff]   ;;  %v11318_v4 = vadd.s32 296, %v11087_v7  ;;  %v11321_v5 = vadd.s32 304, %v11087_v7  ;;  %v11324_v6 = vadd.s32 312, %v11087_v7  ;;  %v11327_v8 = vadd.s32 320, %v11087_v7 }
  0x21   :  { %16417 = vst [vmem:[#allocation37_spill] sm:$0xff] %v11296_v62  ;;  %16418 = vst [vmem:[#allocation38_spill] sm:$0xff] %v11302_v0  ;;  %v11332_v9 = vld [vmem:[%s16082_s0 + $0xf0] sm:$0xff]   ;;  %v11337_v10 = vld [vmem:[%s16082_s0 + $0xf8] sm:$0xff]   ;;  %v11340_v11 = vadd.s32 328, %v11087_v7  ;;  %v11343_v12 = vadd.s32 336, %v11087_v7 }
  0x22   :  { %16419 = vst [vmem:[#allocation39_spill] sm:$0xff] %v11310_v2  ;;  %16420 = vst [vmem:[#allocation40_spill] sm:$0xff] %v11315_v3  ;;  %v11346_v13 = vadd.s32 344, %v11087_v7  ;;  %v11349_v18 = vadd.s32 352, %v11087_v7  ;;  %v11354_v19 = vld [vmem:[%s16082_s0 + $0x100] sm:$0xff]   ;;  %v11359_v24 = vld [vmem:[%s16082_s0 + $0x108] sm:$0xff]  }
  0x23   :  { %16421 = vst [vmem:[#allocation41_spill] sm:$0xff] %v11318_v4  ;;  %16422 = vst [vmem:[#allocation42_spill] sm:$0xff] %v11324_v6  ;;  %v11362_v25 = vadd.s32 360, %v11087_v7  ;;  %v11365_v30 = vadd.s32 368, %v11087_v7  ;;  %v11368_v31 = vadd.s32 376, %v11087_v7  ;;  %v11371_v36 = vadd.s32 384, %v11087_v7 }
  0x24   :  { %16423 = vst [vmem:[#allocation43_spill] sm:$0xff] %v11332_v9  ;;  %16424 = vst [vmem:[#allocation44_spill] sm:$0xff] %v11337_v10  ;;  %v11376_v37 = vld [vmem:[%s16082_s0 + $0x110] sm:$0xff]   ;;  %v11381_v42 = vld [vmem:[%s16082_s0 + $0x118] sm:$0xff]   ;;  %v11384_v43 = vadd.s32 392, %v11087_v7  ;;  %v11387_v48 = vadd.s32 400, %v11087_v7 }
  0x25   :  { %16425 = vst [vmem:[#allocation45_spill] sm:$0xff] %v11340_v11  ;;  %16426 = vst [vmem:[#allocation46_spill] sm:$0xff] %v11346_v13  ;;  %v11390_v49 = vadd.s32 408, %v11087_v7  ;;  %v11393_v54 = vadd.s32 416, %v11087_v7  ;;  %v11398_v55 = vld [vmem:[%s16082_s0 + $0x120] sm:$0xff]   ;;  %v11403_v60 = vld [vmem:[%s16082_s0 + $0x128] sm:$0xff]  }
  0x26   :  { %16427 = vst [vmem:[#allocation47_spill] sm:$0xff] %v11354_v19  ;;  %16428 = vst [vmem:[#allocation48_spill] sm:$0xff] %v11359_v24  ;;  %v11406_v61 = vadd.s32 424, %v11087_v7  ;;  %v11409_v2 = vadd.s32 432, %v11087_v7  ;;  %v11412_v3 = vadd.s32 440, %v11087_v7  ;;  %v11415_v9 = vadd.s32 448, %v11087_v7 }
  0x27   :  { %16429 = vst [vmem:[#allocation49_spill] sm:$0xff] %v11362_v25  ;;  %16430 = vst [vmem:[#allocation50_spill] sm:$0xff] %v11368_v31  ;;  %v11420_v10 = vld [vmem:[%s16082_s0 + $0x130] sm:$0xff]   ;;  %v11425_v19 = vld [vmem:[%s16082_s0 + $0x138] sm:$0xff]   ;;  %v11428_v24 = vadd.s32 456, %v11087_v7  ;;  %v149_v6 = vand.u32 15, %v11365_v30 }
  0x28   :  { %16431 = vst [vmem:[#allocation51_spill] sm:$0xff] %v11376_v37  ;;  %16432 = vst [vmem:[#allocation52_spill] sm:$0xff] %v11381_v42  ;;  %v11431_v37 = vadd.s32 464, %v11087_v7  ;;  %v11434_v42 = vadd.s32 472, %v11087_v7  ;;  %v159_v30 = vand.u32 15, %v11415_v9  ;;  %v16480_v9 = vand.u32 15, %v11123_v15 }
  0x29   :  { %16433 = vst [vmem:[#allocation53_spill] sm:$0xff] %v11384_v43  ;;  %16434 = vst [vmem:[#allocation54_spill] sm:$0xff] %v11390_v49 }
  0x2a   :  { %16435 = vst [vmem:[#allocation55_spill] sm:$0xff] %v11398_v55  ;;  %16436 = vst [vmem:[#allocation56_spill] sm:$0xff] %v11403_v60  ;;  %v11437_v55 = vadd.s32 480, %v11087_v7  ;;  %v11442_v60 = vld [vmem:[%s16082_s0 + $0x140] sm:$0xff]   ;;  %vm11640_vm1 = vcmp.gt.s32.totalorder %v16480_v9, 0  ;;  %v16492_v9 = vand.u32 15, %v11167_v27 }
  0x2b   :  { %16437 = vst [vmem:[#allocation57_spill] sm:$0xff] %v11420_v10  ;;  %16438 = vst [vmem:[#allocation58_spill] sm:$0xff] %v11425_v19  ;;  %v11447_v10 = vld [vmem:[%s16082_s0 + $0x148] sm:$0xff]   ;;  %v11450_v19 = vadd.s32 488, %v11087_v7 }
  0x2c   :  { %16439 = vst [vmem:[#allocation59_spill] sm:$0xff] %v11428_v24  ;;  %16440 = vst [vmem:[#allocation60_spill] sm:$0xff] %v11431_v37  ;;  %v11453_v37 = vadd.s32 496, %v11087_v7  ;;  %v11518_v24 = vld [vmem:[%s16082_s0 + $0x190] sm:$0xff]   ;;  %vm11664_vm5 = vcmp.gt.s32.totalorder %v16492_v9, 0  ;;  %v16504_v9 = vand.u32 15, %v11211_v39 }
  0x2d   :  { %16441 = vst [vmem:[#allocation61_spill] sm:$0xff] %v11434_v42  ;;  %16442 = vst [vmem:[#allocation62_spill] sm:$0xff] %v11437_v55  ;;  %v11456_v42 = vadd.s32 504, %v11087_v7  ;;  %v11476_v55 = vld [vmem:[%s16082_s0 + $0x160] sm:$0xff]   ;;  %v16514_v39 = vmov 0 }
  0x2e   :  { %16443 = vst [vmem:[#allocation63_spill] sm:$0xff] %v11442_v60  ;;  %16444 = vst [vmem:[#allocation64_spill] sm:$0xff] %v11447_v10  ;;  %v11462_v60 = vld [vmem:[%s16082_s0 + $0x150] sm:$0xff]   ;;  %v11467_v10 = vld [vmem:[%s16082_s0 + $0x158] sm:$0xff]   ;;  %vm11688_vm9 = vcmp.gt.s32.totalorder %v16504_v9, 0 }
  0x2f   :  { %16445 = vst [vmem:[#allocation65_spill] sm:$0xff] %v11450_v19  ;;  %16446 = vst [vmem:[#allocation66_spill] sm:$0xff] %v11453_v37  ;;  %v11504_v37 = vld [vmem:[%s16082_s0 + $0x180] sm:$0xff]  }
  0x30   :  { %16447 = vst [vmem:[#allocation67_spill] sm:$0xff] %v11456_v42  ;;  %16448 = vst [vmem:[#allocation68_spill] sm:$0xff] %v11462_v60  ;;  %v11481_v60 = vld [vmem:[%s16082_s0 + $0x168] sm:$0xff]   ;;  %v11490_v42 = vld [vmem:[%s16082_s0 + $0x170] sm:$0xff]  }
  0x31   :  { %16449 = vst [vmem:[#allocation69_spill] sm:$0xff] %v11467_v10  ;;  %16450 = vst [vmem:[#allocation70_spill] sm:$0xff] %v11476_v55  ;;  %v11495_v55 = vld [vmem:[%s16082_s0 + $0x178] sm:$0xff]   ;;  %v11532_v19 = vld [vmem:[%s16082_s0 + $0x1a0] sm:$0xff]  }
  0x32   :  { %16451 = vst [vmem:[#allocation71_spill] sm:$0xff] %v11481_v60  ;;  %16452 = vst [vmem:[#allocation72_spill] sm:$0xff] %v11490_v42  ;;  %v11509_v42 = vld [vmem:[%s16082_s0 + $0x188] sm:$0xff]   ;;  %v127_v60 = vand.u32 15, %v11239_v47  ;;  %v11546_v10 = vld [vmem:[%s16082_s0 + $0x1b0] sm:$0xff]  }
  0x33   :  { %16453 = vst [vmem:[#allocation73_spill] sm:$0xff] %v11495_v55  ;;  %16454 = vst [vmem:[#allocation74_spill] sm:$0xff] %v11504_v37  ;;  %v11523_v37 = vld [vmem:[%s16082_s0 + $0x198] sm:$0xff]   ;;  %v131_v55 = vand.u32 15, %v11261_v53  ;;  %v11560_v47 = vld [vmem:[%s16082_s0 + $0x1c0] sm:$0xff]  }
  0x34   :  { %16455 = vst [vmem:[#allocation75_spill] sm:$0xff] %v11509_v42  ;;  %16456 = vst [vmem:[#allocation76_spill] sm:$0xff] %v11518_v24  ;;  %v11537_v24 = vld [vmem:[%s16082_s0 + $0x1a8] sm:$0xff]   ;;  %v125_v42 = vand.u32 15, %v11233_v45  ;;  %v135_v45 = vand.u32 15, %v11283_v59  ;;  %v11574_v53 = vld [vmem:[%s16082_s0 + $0x1d0] sm:$0xff]  }
  0x35   :  { %16457 = vst [vmem:[#allocation77_spill] sm:$0xff] %v11523_v37  ;;  %16458 = vst [vmem:[#allocation78_spill] sm:$0xff] %v11532_v19  ;;  %v11551_v19 = vld [vmem:[%s16082_s0 + $0x1b8] sm:$0xff]   ;;  %v129_v37 = vand.u32 15, %v11255_v51  ;;  %v139_v51 = vand.u32 15, %v11305_v1  ;;  %v11588_v59 = vld [vmem:[%s16082_s0 + $0x1e0] sm:$0xff]  }
  0x36   :  { %16459 = vst [vmem:[#allocation79_spill] sm:$0xff] %v11537_v24  ;;  %16460 = vst [vmem:[#allocation80_spill] sm:$0xff] %v11546_v10  ;;  %v11565_v10 = vld [vmem:[%s16082_s0 + $0x1c8] sm:$0xff]   ;;  %v133_v24 = vand.u32 15, %v11277_v57  ;;  %v143_v57 = vand.u32 15, %v11327_v8  ;;  %v11602_v1 = vld [vmem:[%s16082_s0 + $0x1f0] sm:$0xff]  }
  0x37   :  { %16461 = vst [vmem:[#allocation81_spill] sm:$0xff] %v11551_v19  ;;  %16462 = vst [vmem:[#allocation82_spill] sm:$0xff] %v11560_v47  ;;  %v11579_v47 = vld [vmem:[%s16082_s0 + $0x1d8] sm:$0xff]   ;;  %v137_v19 = vand.u32 15, %v11299_v63  ;;  %v147_v63 = vand.u32 15, %v11349_v18  ;;  %v157_v18 = vand.u32 15, %v11409_v2 }
  0x38   :  { %16463 = vst [vmem:[#allocation83_spill] sm:$0xff] %v11565_v10  ;;  %16464 = vst [vmem:[#allocation84_spill] sm:$0xff] %v11574_v53  ;;  %v11593_v53 = vld [vmem:[%s16082_s0 + $0x1e8] sm:$0xff]   ;;  %v141_v10 = vand.u32 15, %v11321_v5  ;;  %v16470_v25 = vld [vmem:[#allocation59_spill] sm:$0xff]  ;;  %v16477_v2 = vand.u32 15, %v11087_v7 }
  0x39   :  { %16465 = vst [vmem:[#allocation85_spill] sm:$0xff] %v11579_v47  ;;  %16466 = vst [vmem:[#allocation86_spill] sm:$0xff] %v11588_v59  ;;  %v11607_v59 = vld [vmem:[%s16082_s0 + $0x1f8] sm:$0xff]   ;;  %v145_v47 = vand.u32 15, %v11343_v12  ;;  %v155_v12 = vand.u32 15, %v11393_v54  ;;  %v16471_v31 = vld [vmem:[#allocation60_spill] sm:$0xff] }
  0x3a   :  { %16467 = vst [vmem:[#allocation87_spill] sm:$0xff] %v11593_v53  ;;  %16468 = vst [vmem:[#allocation88_spill] sm:$0xff] %v11602_v1  ;;  %v151_v1 = vand.u32 15, %v11371_v36  ;;  %v161_v36 = vand.u32 15, %v16471_v31  ;;  %v16472_v13 = vld [vmem:[#allocation61_spill] sm:$0xff]  ;;  %v16473_v43 = vld [vmem:[#allocation62_spill] sm:$0xff] }
  0x3b   :  { %16469 = vst [vmem:[#allocation89_spill] sm:$0xff] %v11607_v59  ;;  %v153_v59 = vand.u32 15, %v11387_v48  ;;  %v163_v48 = vand.u32 15, %v16473_v43  ;;  %v16474_v11 = vld [vmem:[#allocation65_spill] sm:$0xff]  ;;  %v16475_v49 = vld [vmem:[#allocation66_spill] sm:$0xff]  ;;  %v16476_v62 = vld [vmem:[#allocation67_spill] sm:$0xff] }
  0x3c   :  { %v165_v54 = vand.u32 15, %v16475_v49  ;;  %vm11634_vm0 = vcmp.gt.s32.totalorder %v16477_v2, 0  ;;  %v16483_v43 = vand.u32 15, %v11129_v17  ;;  %v16486_v49 = vand.u32 15, %v11145_v21  ;;  %v16822_v7 = vld [vmem:[#allocation8_spill] sm:$0xff]  ;;  %s12486_s0 = smov 0  }
  0x3d   :  { %v16489_v2 = vand.u32 15, %v11151_v23  ;;  %vm11698_vm11 = vcmp.gt.s32.totalorder %v125_v42, 0  ;;  %vm11702_vm12 = vcmp.gt.s32.totalorder %v127_v60, 0  ;;  %vm11706_vm13 = vcmp.gt.s32.totalorder %v129_v37, 0 }
  0x3e   :  { %vm11646_vm2 = vcmp.gt.s32.totalorder %v16483_v43, 0  ;;  %vm11652_vm3 = vcmp.gt.s32.totalorder %v16486_v49, 0  ;;  %v16495_v43 = vand.u32 15, %v11173_v29  ;;  %v16498_v49 = vand.u32 15, %v11189_v33 }
  0x3f   :  { %vm11658_vm4 = vcmp.gt.s32.totalorder %v16489_v2, 0  ;;  %v16501_v2 = vand.u32 15, %v11195_v35  ;;  %v16508_v33 = vmov 0  ;;  %v16512_v35 = vmov 0 }
  0x40   :  { %vm11670_vm6 = vcmp.gt.s32.totalorder %v16495_v43, 0  ;;  %vm11676_vm7 = vcmp.gt.s32.totalorder %v16498_v49, 0  ;;  %v16507_v43 = vand.u32 15, %v11217_v41  ;;  %v16510_v49 = vmov 0 }
  0x41   :  { %vm11682_vm8 = vcmp.gt.s32.totalorder %v16501_v2, 0  ;;  %v16511_v49 = vsel %vm11698_vm11, 4294967295, %v16510_v49  ;;  %v16513_v35 = vsel %vm11702_vm12, 4294967295, %v16512_v35  ;;  %v16515_v39 = vsel %vm11706_vm13, 4294967295, %v16514_v39 }
  0x42   :  { %vm11694_vm10 = vcmp.gt.s32.totalorder %v16507_v43, 0  ;;  %vm11710_vm14 = vcmp.gt.s32.totalorder %v131_v55, 0  ;;  %v16516_v2 = vmov 0  ;;  %vm11714_vm15 = vcmp.gt.s32.totalorder %v133_v24, 0 }
  0x43   :  { %v16509_v33 = vsel %vm11694_vm10, 4294967295, %v16508_v33  ;;  %v16517_v2 = vsel %vm11710_vm14, 4294967295, %v16516_v2  ;;  %v16518_v41 = vmov 0  ;;  %vm11718_vm10 = vcmp.gt.s32.totalorder %v135_v45, 0 }
  0x44   :  { %v16519_v41 = vsel %vm11714_vm15, 4294967295, %v16518_v41  ;;  %v16520_v42 = vmov 0  ;;  %vm11722_vm11 = vcmp.gt.s32.totalorder %v137_v19, 0  ;;  %v16522_v60 = vmov 0 }
  0x45   :  { %v16521_v42 = vsel %vm11718_vm10, 4294967295, %v16520_v42  ;;  %v16523_v60 = vsel %vm11722_vm11, 4294967295, %v16522_v60  ;;  %vm11726_vm12 = vcmp.gt.s32.totalorder %v139_v51, 0  ;;  %v16524_v37 = vmov 0 }
  0x46   :  { %v16525_v37 = vsel %vm11726_vm12, 4294967295, %v16524_v37  ;;  %vm11730_vm13 = vcmp.gt.s32.totalorder %v141_v10, 0  ;;  %v16526_v55 = vmov 0  ;;  %vm11734_vm14 = vcmp.gt.s32.totalorder %v143_v57, 0 }
  0x47   :  { %v16527_v55 = vsel %vm11730_vm13, 4294967295, %v16526_v55  ;;  %v16528_v24 = vmov 0  ;;  %vm11738_vm15 = vcmp.gt.s32.totalorder %v145_v47, 0  ;;  %v16530_v45 = vmov 0 }
  0x48   :  { %v16529_v24 = vsel %vm11734_vm14, 4294967295, %v16528_v24  ;;  %v16531_v45 = vsel %vm11738_vm15, 4294967295, %v16530_v45  ;;  %vm11742_vm10 = vcmp.gt.s32.totalorder %v147_v63, 0  ;;  %v16532_v19 = vmov 0 }
  0x49   :  { %v16533_v19 = vsel %vm11742_vm10, 4294967295, %v16532_v19  ;;  %vm11746_vm11 = vcmp.gt.s32.totalorder %v149_v6, 0  ;;  %v16534_v51 = vmov 0  ;;  %vm11750_vm12 = vcmp.gt.s32.totalorder %v151_v1, 0 }
  0x4a   :  { %v16535_v51 = vsel %vm11746_vm11, 4294967295, %v16534_v51  ;;  %v16536_v10 = vmov 0  ;;  %vm11754_vm13 = vcmp.gt.s32.totalorder %v153_v59, 0  ;;  %v16538_v57 = vmov 0 }
  0x4b   :  { %v16537_v10 = vsel %vm11750_vm12, 4294967295, %v16536_v10  ;;  %v16539_v57 = vsel %vm11754_vm13, 4294967295, %v16538_v57  ;;  %vm11758_vm14 = vcmp.gt.s32.totalorder %v155_v12, 0  ;;  %vm11762_vm15 = vcmp.gt.s32.totalorder %v157_v18, 0 }
  0x4c   :  { %vm11766_vm10 = vcmp.gt.s32.totalorder %v159_v30, 0  ;;  %vm11770_vm11 = vcmp.gt.s32.totalorder %v161_v36, 0  ;;  %vm11774_vm12 = vcmp.gt.s32.totalorder %v163_v48, 0  ;;  %vm11778_vm13 = vcmp.gt.s32.totalorder %v165_v54, 0 }
  0x4d   :  { %v16103_v18 = vmov 0.0   ;;  %v16600_v47 = vand.u32 15, %v11120_v14  ;;  %v16603_v6 = vand.u32 15, %v11126_v16  ;;  %v16606_v59 = vand.u32 15, %v11142_v20 }
  0x4e   :  { %v11785_v30 = vsel %vm11634_vm0, 1.0, %v16103_v18  ;;  %v11790_v36 = vsel %vm11640_vm1, 1.0, %v16103_v18  ;;  %v11795_v48 = vsel %vm11646_vm2, 1.0, %v16103_v18  ;;  %v11800_v54 = vsel %vm11652_vm3, 1.0, %v16103_v18 }
  0x4f   :  { %16552 = vst [vmem:[#allocation59_spill] sm:$0xff] %v11785_v30  ;;  %16553 = vst [vmem:[#allocation60_spill] sm:$0xff] %v11790_v36  ;;  %v11805_v8 = vsel %vm11658_vm4, 1.0, %v16103_v18  ;;  %v11810_v31 = vsel %vm11664_vm5, 1.0, %v16103_v18  ;;  %v11815_v53 = vsel %vm11670_vm6, 1.0, %v16103_v18  ;;  %v11820_v5 = vsel %vm11676_vm7, 1.0, %v16103_v18 }
  0x50   :  { %16554 = vst [vmem:[#allocation61_spill] sm:$0xff] %v11795_v48  ;;  %16555 = vst [vmem:[#allocation62_spill] sm:$0xff] %v11800_v54  ;;  %v11825_v15 = vsel %vm11682_vm8, 1.0, %v16103_v18  ;;  %v11830_v17 = vsel %vm11688_vm9, 1.0, %v16103_v18  ;;  %vm16562_vm0 = vnez %v16509_v33  ;;  %vm16564_vm1 = vnez %v16511_v49  ;;  %v16814_v54 = vld [vmem:[#allocation13_spill] sm:$0xff]  ;;  %v16815_v48 = vld [vmem:[#allocation12_spill] sm:$0xff] }
  0x51   :  { %16556 = vst [vmem:[#allocation65_spill] sm:$0xff] %v11805_v8  ;;  %16557 = vst [vmem:[#allocation66_spill] sm:$0xff] %v11810_v31  ;;  %v11835_v21 = vsel %vm16562_vm0, 1.0, %v16103_v18  ;;  %v11840_v23 = vsel %vm16564_vm1, 1.0, %v16103_v18  ;;  %vm16566_vm2 = vnez %v16513_v35  ;;  %vm16568_vm3 = vnez %v16515_v39  ;;  %v16811_v31 = vld [vmem:[#allocation16_spill] sm:$0xff]  ;;  %v16812_v8 = vld [vmem:[#allocation15_spill] sm:$0xff] }
  0x52   :  { %16558 = vst [vmem:[#allocation67_spill] sm:$0xff] %v11815_v53  ;;  %16559 = vst [vmem:[#allocation90_spill] sm:$0xff] %v11820_v5  ;;  %v11845_v27 = vsel %vm16566_vm2, 1.0, %v16103_v18  ;;  %v11850_v9 = vsel %vm16568_vm3, 1.0, %v16103_v18  ;;  %vm16570_vm4 = vnez %v16517_v2  ;;  %vm16572_vm5 = vnez %v16519_v41  ;;  %v16809_v5 = vld [vmem:[#allocation18_spill] sm:$0xff]  ;;  %v16810_v53 = vld [vmem:[#allocation17_spill] sm:$0xff] }
  0x53   :  { %16560 = vst [vmem:[#allocation91_spill] sm:$0xff] %v11825_v15  ;;  %16561 = vst [vmem:[#allocation92_spill] sm:$0xff] %v11830_v17  ;;  %v11855_v29 = vsel %vm16570_vm4, 1.0, %v16103_v18  ;;  %v11860_v43 = vsel %vm16572_vm5, 1.0, %v16103_v18  ;;  %vm16574_vm6 = vnez %v16521_v42  ;;  %vm16576_vm7 = vnez %v16523_v60  ;;  %v16807_v17 = vld [vmem:[#allocation20_spill] sm:$0xff]  ;;  %v16808_v15 = vld [vmem:[#allocation19_spill] sm:$0xff] }
  0x54   :  { %16563 = vst [vmem:[#allocation93_spill] sm:$0xff] %v11835_v21  ;;  %16565 = vst [vmem:[#allocation94_spill] sm:$0xff] %v11840_v23  ;;  %v11865_v33 = vsel %vm16574_vm6, 1.0, %v16103_v18  ;;  %v11870_v49 = vsel %vm16576_vm7, 1.0, %v16103_v18  ;;  %vm16578_vm8 = vnez %v16525_v37  ;;  %vm16580_vm9 = vnez %v16527_v55  ;;  %v16805_v23 = vld [vmem:[#allocation22_spill] sm:$0xff]  ;;  %v16806_v21 = vld [vmem:[#allocation21_spill] sm:$0xff] }
  0x55   :  { %16567 = vst [vmem:[#allocation95_spill] sm:$0xff] %v11845_v27  ;;  %16569 = vst [vmem:[#allocation96_spill] sm:$0xff] %v11850_v9  ;;  %v11875_v35 = vsel %vm16578_vm8, 1.0, %v16103_v18  ;;  %v11880_v39 = vsel %vm16580_vm9, 1.0, %v16103_v18  ;;  %vm16582_vm0 = vnez %v16529_v24  ;;  %vm16584_vm1 = vnez %v16531_v45  ;;  %v16803_v9 = vld [vmem:[#allocation24_spill] sm:$0xff]  ;;  %v16804_v27 = vld [vmem:[#allocation23_spill] sm:$0xff] }
  0x56   :  { %16571 = vst [vmem:[#allocation97_spill] sm:$0xff] %v11855_v29  ;;  %16573 = vst [vmem:[#allocation98_spill] sm:$0xff] %v11860_v43  ;;  %v11885_v2 = vsel %vm16582_vm0, 1.0, %v16103_v18  ;;  %v11890_v41 = vsel %vm16584_vm1, 1.0, %v16103_v18  ;;  %vm16586_vm2 = vnez %v16533_v19  ;;  %vm16588_vm3 = vnez %v16535_v51  ;;  %v16801_v43 = vld [vmem:[#allocation26_spill] sm:$0xff]  ;;  %v16802_v29 = vld [vmem:[#allocation25_spill] sm:$0xff] }
  0x57   :  { %16575 = vst [vmem:[#allocation99_spill] sm:$0xff] %v11865_v33  ;;  %16577 = vst [vmem:[#allocation100_spill] sm:$0xff] %v11870_v49  ;;  %v11895_v42 = vsel %vm16586_vm2, 1.0, %v16103_v18  ;;  %v11900_v60 = vsel %vm16588_vm3, 1.0, %v16103_v18  ;;  %vm16590_vm4 = vnez %v16537_v10  ;;  %vm16592_vm5 = vnez %v16539_v57  ;;  %v16797_v49 = vld [vmem:[#allocation30_spill] sm:$0xff]  ;;  %v16798_v33 = vld [vmem:[#allocation29_spill] sm:$0xff] }
  0x58   :  { %16579 = vst [vmem:[#allocation101_spill] sm:$0xff] %v11875_v35  ;;  %16581 = vst [vmem:[#allocation102_spill] sm:$0xff] %v11880_v39  ;;  %v11905_v37 = vsel %vm16590_vm4, 1.0, %v16103_v18  ;;  %v11910_v55 = vsel %vm16592_vm5, 1.0, %v16103_v18  ;;  %v11915_v24 = vsel %vm11758_vm14, 1.0, %v16103_v18  ;;  %v11920_v45 = vsel %vm11762_vm15, 1.0, %v16103_v18 }
  0x59   :  { %16583 = vst [vmem:[#allocation103_spill] sm:$0xff] %v11885_v2  ;;  %16585 = vst [vmem:[#allocation104_spill] sm:$0xff] %v11890_v41  ;;  %v11925_v19 = vsel %vm11766_vm10, 1.0, %v16103_v18  ;;  %v11930_v51 = vsel %vm11770_vm11, 1.0, %v16103_v18  ;;  %v11935_v10 = vsel %vm11774_vm12, 1.0, %v16103_v18  ;;  %v11940_v57 = vsel %vm11778_vm13, 1.0, %v16103_v18 }
  0x5a   :  { %16587 = vst [vmem:[#allocation105_spill] sm:$0xff] %v11895_v42  ;;  %16589 = vst [vmem:[#allocation106_spill] sm:$0xff] %v11900_v60  ;;  %vm11944_vm14 = vcmp.lt.s32.totalorder %v16600_v47, 15  ;;  %vm11950_vm10 = vcmp.lt.s32.totalorder %v16603_v6, 15  ;;  %vm11956_vm11 = vcmp.lt.s32.totalorder %v16606_v59, 15  ;;  %v16609_v12 = vand.u32 15, %v11148_v22 }
  0x5b   :  { %16591 = vst [vmem:[#allocation107_spill] sm:$0xff] %v11905_v37  ;;  %16593 = vst [vmem:[#allocation108_spill] sm:$0xff] %v11910_v55  ;;  %v16612_v47 = vand.u32 15, %v11164_v26  ;;  %v16615_v6 = vand.u32 15, %v11170_v28  ;;  %v16618_v59 = vand.u32 15, %v11186_v32  ;;  %v16787_v42 = vld [vmem:[#allocation44_spill] sm:$0xff] }
  0x5c   :  { %16594 = vst [vmem:[#allocation109_spill] sm:$0xff] %v11915_v24  ;;  %16595 = vst [vmem:[#allocation110_spill] sm:$0xff] %v11920_v45  ;;  %vm11962_vm12 = vcmp.lt.s32.totalorder %v16609_v12, 15  ;;  %v16621_v12 = vand.u32 15, %v11192_v34  ;;  %v16789_v41 = vld [vmem:[#allocation40_spill] sm:$0xff]  ;;  %v16793_v39 = vld [vmem:[#allocation34_spill] sm:$0xff] }
  0x5d   :  { %16596 = vst [vmem:[#allocation111_spill] sm:$0xff] %v11925_v19  ;;  %16597 = vst [vmem:[#allocation112_spill] sm:$0xff] %v11930_v51  ;;  %vm11968_vm13 = vcmp.lt.s32.totalorder %v16612_v47, 15  ;;  %vm11974_vm15 = vcmp.lt.s32.totalorder %v16615_v6, 15  ;;  %vm11980_vm6 = vcmp.lt.s32.totalorder %v16618_v59, 15  ;;  %v16624_v47 = vand.u32 15, %v11208_v38 }
  0x5e   :  { %16598 = vst [vmem:[#allocation113_spill] sm:$0xff] %v11935_v10  ;;  %16599 = vst [vmem:[#allocation114_spill] sm:$0xff] %v11940_v57  ;;  %vm11986_vm7 = vcmp.lt.s32.totalorder %v16621_v12, 15  ;;  %v16627_v6 = vand.u32 15, %v11214_v40  ;;  %v16630_v59 = vand.u32 15, %v11230_v44  ;;  %v16633_v12 = vand.u32 15, %v11236_v46 }
  0x5f   :  { %vm11992_vm8 = vcmp.lt.s32.totalorder %v16624_v47, 15  ;;  %v16636_v47 = vand.u32 15, %v11252_v50  ;;  %v16637_v40 = vmov 0  ;;  %v16640_v44 = vmov 0  ;;  %v16791_v2 = vld [vmem:[#allocation36_spill] sm:$0xff]  ;;  %v16817_v36 = vld [vmem:[#allocation11_spill] sm:$0xff] }
  0x60   :  { %vm11998_vm9 = vcmp.lt.s32.totalorder %v16627_v6, 15  ;;  %vm12004_vm0 = vcmp.lt.s32.totalorder %v16630_v59, 15  ;;  %vm12010_vm1 = vcmp.lt.s32.totalorder %v16633_v12, 15  ;;  %v16639_v6 = vand.u32 15, %v11258_v52  ;;  %v16795_v35 = vld [vmem:[#allocation32_spill] sm:$0xff]  ;;  %v16819_v30 = vld [vmem:[#allocation10_spill] sm:$0xff] }
  0x61   :  { %vm12016_vm2 = vcmp.lt.s32.totalorder %v16636_v47, 15  ;;  %v16642_v59 = vand.u32 15, %v11274_v56  ;;  %v16643_v46 = vmov 0  ;;  %v16645_v12 = vand.u32 15, %v11280_v58  ;;  %v16648_v47 = vld [vmem:[#allocation37_spill] sm:$0xff] }
  0x62   :  { %v16638_v40 = vsel %vm12016_vm2, 4294967295, %v16637_v40  ;;  %vm12022_vm3 = vcmp.lt.s32.totalorder %v16639_v6, 15  ;;  %v16646_v50 = vmov 0  ;;  %v16649_v18 = vand.u32 15, %v16648_v47  ;;  %v16652_v6 = vld [vmem:[#allocation38_spill] sm:$0xff]  ;;  %v16821_v57 = vld [vmem:[#allocation9_spill] sm:$0xff] }
  0x63   :  { %v16641_v44 = vsel %vm12022_vm3, 4294967295, %v16640_v44  ;;  %vm12028_vm4 = vcmp.lt.s32.totalorder %v16642_v59, 15  ;;  %vm12034_vm5 = vcmp.lt.s32.totalorder %v16645_v12, 15  ;;  %v16650_v52 = vmov 0  ;;  %v16656_v59 = vld [vmem:[#allocation41_spill] sm:$0xff]  ;;  %v16660_v12 = vld [vmem:[#allocation42_spill] sm:$0xff] }
  0x64   :  { %v16644_v46 = vsel %vm12028_vm4, 4294967295, %v16643_v46  ;;  %v16647_v50 = vsel %vm12034_vm5, 4294967295, %v16646_v50  ;;  %vm12040_vm2 = vcmp.lt.s32.totalorder %v16649_v18, 15  ;;  %v16653_v4 = vand.u32 15, %v16652_v6  ;;  %v16664_v18 = vld [vmem:[#allocation45_spill] sm:$0xff] }
  0x65   :  { %v16651_v52 = vsel %vm12040_vm2, 4294967295, %v16650_v52  ;;  %v16654_v56 = vmov 0  ;;  %v16657_v10 = vand.u32 15, %v16656_v59  ;;  %v16658_v58 = vmov 0 }
  0x66   :  { %vm12046_vm3 = vcmp.lt.s32.totalorder %v16653_v4, 15  ;;  %v16661_v51 = vand.u32 15, %v16660_v12  ;;  %v16662_v47 = vmov 0  ;;  %v16665_v19 = vand.u32 15, %v16664_v18  ;;  %v16668_v4 = vld [vmem:[#allocation46_spill] sm:$0xff] }
  0x67   :  { %v16655_v56 = vsel %vm12046_vm3, 4294967295, %v16654_v56  ;;  %vm12052_vm4 = vcmp.lt.s32.totalorder %v16657_v10, 15  ;;  %v16666_v6 = vmov 0  ;;  %v16669_v45 = vand.u32 15, %v16668_v4  ;;  %v16672_v10 = vld [vmem:[#allocation49_spill] sm:$0xff] }
  0x68   :  { %v16659_v58 = vsel %vm12052_vm4, 4294967295, %v16658_v58  ;;  %vm12058_vm5 = vcmp.lt.s32.totalorder %v16661_v51, 15  ;;  %vm12064_vm2 = vcmp.lt.s32.totalorder %v16665_v19, 15  ;;  %v16670_v59 = vmov 0  ;;  %v16676_v51 = vld [vmem:[#allocation50_spill] sm:$0xff]  ;;  %v16680_v19 = vld [vmem:[#allocation53_spill] sm:$0xff] }
  0x69   :  { %v16663_v47 = vsel %vm12058_vm5, 4294967295, %v16662_v47  ;;  %v16667_v6 = vsel %vm12064_vm2, 4294967295, %v16666_v6  ;;  %vm12070_vm3 = vcmp.lt.s32.totalorder %v16669_v45, 15  ;;  %v16673_v24 = vand.u32 15, %v16672_v10  ;;  %v16684_v45 = vld [vmem:[#allocation54_spill] sm:$0xff] }
  0x6a   :  { %v16671_v59 = vsel %vm12070_vm3, 4294967295, %v16670_v59  ;;  %v16674_v12 = vmov 0  ;;  %v16677_v55 = vand.u32 15, %v16676_v51  ;;  %v16678_v18 = vmov 0 }
  0x6b   :  { %vm12076_vm4 = vcmp.lt.s32.totalorder %v16673_v24, 15  ;;  %v16681_v37 = vand.u32 15, %v16680_v19  ;;  %v16682_v4 = vmov 0  ;;  %v16685_v60 = vand.u32 15, %v16684_v45  ;;  %v16756_v45 = vld [vmem:[#allocation88_spill] sm:$0xff] }
  0x6c   :  { %v16675_v12 = vsel %vm12076_vm4, 4294967295, %v16674_v12  ;;  %vm12082_vm5 = vcmp.lt.s32.totalorder %v16677_v55, 15  ;;  %v16686_v10 = vmov 0  ;;  %v16688_v24 = vand.u32 15, %v11406_v61  ;;  %v16758_v61 = vld [vmem:[#allocation86_spill] sm:$0xff]  ;;  %16816 = vst [vmem:[#allocation88_spill] sm:$0xff] %v16815_v48 }
  0x6d   :  { %v16679_v18 = vsel %vm12082_vm5, 4294967295, %v16678_v18  ;;  %vm12088_vm2 = vcmp.lt.s32.totalorder %v16681_v37, 15  ;;  %vm12094_vm3 = vcmp.lt.s32.totalorder %v16685_v60, 15  ;;  %v16689_v51 = vmov 0  ;;  %16820 = vst [vmem:[#allocation86_spill] sm:$0xff] %v16819_v30 }
  0x6e   :  { %v16683_v4 = vsel %vm12088_vm2, 4294967295, %v16682_v4  ;;  %v16687_v10 = vsel %vm12094_vm3, 4294967295, %v16686_v10  ;;  %vm12100_vm4 = vcmp.lt.s32.totalorder %v16688_v24, 15  ;;  %v16691_v55 = vand.u32 15, %v11412_v3  ;;  %v16759_v3 = vld [vmem:[#allocation85_spill] sm:$0xff] }
  0x6f   :  { %v16690_v51 = vsel %vm12100_vm4, 4294967295, %v16689_v51  ;;  %v16692_v19 = vmov 0  ;;  %v16694_v37 = vand.u32 15, %v16470_v25  ;;  %v16697_v60 = vand.u32 15, %v16472_v13  ;;  %v16761_v25 = vld [vmem:[#allocation83_spill] sm:$0xff]  ;;  %16823 = vst [vmem:[#allocation85_spill] sm:$0xff] %v16822_v7 }
  0x70   :  { %vm12106_vm5 = vcmp.lt.s32.totalorder %v16691_v55, 15  ;;  %v16700_v24 = vand.u32 15, %v16474_v11  ;;  %v16703_v55 = vand.u32 15, %v16476_v62 }
  0x71   :  { %v16693_v19 = vsel %vm12106_vm5, 4294967295, %v16692_v19  ;;  %vm12112_vm2 = vcmp.lt.s32.totalorder %v16694_v37, 15  ;;  %vm12118_vm3 = vcmp.lt.s32.totalorder %v16697_v60, 15  ;;  %v16706_v37 = vmov 0.0  }
  0x72   :  { %vm12124_vm4 = vcmp.lt.s32.totalorder %v16700_v24, 15  ;;  %vm12130_vm5 = vcmp.lt.s32.totalorder %v16703_v55, 15  ;;  %v12137_v13 = vsel %vm11944_vm14, 1.0, %v16706_v37  ;;  %v12142_v60 = vsel %vm11950_vm10, 1.0, %v16706_v37  ;;  %v16755_v24 = vld [vmem:[#allocation89_spill] sm:$0xff]  ;;  %v16757_v55 = vld [vmem:[#allocation87_spill] sm:$0xff] }
  0x73   :  { %16707 = vst [vmem:[#allocation37_spill] sm:$0xff] %v12137_v13  ;;  %16708 = vst [vmem:[#allocation38_spill] sm:$0xff] %v12142_v60  ;;  %v12147_v11 = vsel %vm11956_vm11, 1.0, %v16706_v37  ;;  %v12152_v62 = vsel %vm11962_vm12, 1.0, %v16706_v37  ;;  %v12157_v63 = vsel %vm11968_vm13, 1.0, %v16706_v37  ;;  %v12162_v1 = vsel %vm11974_vm15, 1.0, %v16706_v37 }
  0x74   :  { %16709 = vst [vmem:[#allocation41_spill] sm:$0xff] %v12147_v11  ;;  %16710 = vst [vmem:[#allocation42_spill] sm:$0xff] %v12152_v62  ;;  %v12167_v0 = vsel %vm11980_vm6, 1.0, %v16706_v37  ;;  %v12172_v14 = vsel %vm11986_vm7, 1.0, %v16706_v37  ;;  %v12177_v16 = vsel %vm11992_vm8, 1.0, %v16706_v37  ;;  %v12182_v20 = vsel %vm11998_vm9, 1.0, %v16706_v37 }
  0x75   :  { %16711 = vst [vmem:[#allocation45_spill] sm:$0xff] %v12157_v63  ;;  %16712 = vst [vmem:[#allocation46_spill] sm:$0xff] %v12162_v1  ;;  %v12187_v22 = vsel %vm12004_vm0, 1.0, %v16706_v37  ;;  %v12192_v26 = vsel %vm12010_vm1, 1.0, %v16706_v37  ;;  %vm16719_vm14 = vnez %v16638_v40  ;;  %vm16721_vm10 = vnez %v16641_v44  ;;  %v16790_v1 = vld [vmem:[#allocation39_spill] sm:$0xff]  ;;  %v16794_v62 = vld [vmem:[#allocation33_spill] sm:$0xff] }
  0x76   :  { %16713 = vst [vmem:[#allocation49_spill] sm:$0xff] %v12167_v0  ;;  %16714 = vst [vmem:[#allocation50_spill] sm:$0xff] %v12172_v14  ;;  %v12197_v28 = vsel %vm16719_vm14, 1.0, %v16706_v37  ;;  %v12202_v32 = vsel %vm16721_vm10, 1.0, %v16706_v37  ;;  %vm16723_vm11 = vnez %v16644_v46  ;;  %vm16725_vm12 = vnez %v16647_v50  ;;  %v16786_v14 = vld [vmem:[#allocation47_spill] sm:$0xff]  ;;  %v16799_v60 = vld [vmem:[#allocation28_spill] sm:$0xff] }
  0x77   :  { %16715 = vst [vmem:[#allocation53_spill] sm:$0xff] %v12177_v16  ;;  %16716 = vst [vmem:[#allocation54_spill] sm:$0xff] %v12182_v20  ;;  %v12207_v34 = vsel %vm16723_vm11, 1.0, %v16706_v37  ;;  %v12212_v38 = vsel %vm16725_vm12, 1.0, %v16706_v37  ;;  %vm16727_vm13 = vnez %v16651_v52  ;;  %vm16729_vm15 = vnez %v16655_v56  ;;  %v16784_v20 = vld [vmem:[#allocation51_spill] sm:$0xff]  ;;  %v16785_v16 = vld [vmem:[#allocation48_spill] sm:$0xff] }
  0x78   :  { %16717 = vst [vmem:[#allocation115_spill] sm:$0xff] %v12187_v22  ;;  %16718 = vst [vmem:[#allocation116_spill] sm:$0xff] %v12192_v26  ;;  %v12217_v40 = vsel %vm16727_vm13, 1.0, %v16706_v37  ;;  %v12222_v44 = vsel %vm16729_vm15, 1.0, %v16706_v37  ;;  %vm16731_vm6 = vnez %v16659_v58  ;;  %vm16733_vm7 = vnez %v16663_v47  ;;  %v16782_v26 = vld [vmem:[#allocation55_spill] sm:$0xff]  ;;  %v16783_v22 = vld [vmem:[#allocation52_spill] sm:$0xff] }
  0x79   :  { %16720 = vst [vmem:[#allocation117_spill] sm:$0xff] %v12197_v28  ;;  %16722 = vst [vmem:[#allocation118_spill] sm:$0xff] %v12202_v32  ;;  %v12227_v46 = vsel %vm16731_vm6, 1.0, %v16706_v37  ;;  %v12232_v50 = vsel %vm16733_vm7, 1.0, %v16706_v37  ;;  %vm16735_vm8 = vnez %v16667_v6  ;;  %vm16737_vm9 = vnez %v16671_v59  ;;  %v16780_v32 = vld [vmem:[#allocation57_spill] sm:$0xff]  ;;  %v16781_v28 = vld [vmem:[#allocation56_spill] sm:$0xff] }
  0x7a   :  { %16724 = vst [vmem:[#allocation119_spill] sm:$0xff] %v12207_v34  ;;  %16726 = vst [vmem:[#allocation120_spill] sm:$0xff] %v12212_v38  ;;  %v12237_v52 = vsel %vm16735_vm8, 1.0, %v16706_v37  ;;  %v12242_v56 = vsel %vm16737_vm9, 1.0, %v16706_v37  ;;  %vm16739_vm0 = vnez %v16675_v12  ;;  %vm16741_vm1 = vnez %v16679_v18  ;;  %v16778_v38 = vld [vmem:[#allocation63_spill] sm:$0xff]  ;;  %v16779_v34 = vld [vmem:[#allocation58_spill] sm:$0xff] }
  0x7b   :  { %16728 = vst [vmem:[#allocation121_spill] sm:$0xff] %v12217_v40  ;;  %16730 = vst [vmem:[#allocation122_spill] sm:$0xff] %v12222_v44  ;;  %v12247_v58 = vsel %vm16739_vm0, 1.0, %v16706_v37  ;;  %v12252_v47 = vsel %vm16741_vm1, 1.0, %v16706_v37  ;;  %vm16743_vm14 = vnez %v16683_v4  ;;  %vm16745_vm10 = vnez %v16687_v10  ;;  %v16776_v44 = vld [vmem:[#allocation68_spill] sm:$0xff]  ;;  %v16788_v0 = vld [vmem:[#allocation43_spill] sm:$0xff] }
  0x7c   :  { %16732 = vst [vmem:[#allocation123_spill] sm:$0xff] %v12227_v46  ;;  %16734 = vst [vmem:[#allocation124_spill] sm:$0xff] %v12232_v50  ;;  %v12257_v6 = vsel %vm16743_vm14, 1.0, %v16706_v37  ;;  %v12262_v59 = vsel %vm16745_vm10, 1.0, %v16706_v37  ;;  %vm16747_vm11 = vnez %v16690_v51  ;;  %vm16749_vm12 = vnez %v16693_v19  ;;  %v16774_v50 = vld [vmem:[#allocation70_spill] sm:$0xff]  ;;  %v16775_v46 = vld [vmem:[#allocation69_spill] sm:$0xff] }
  0x7d   :  { %16736 = vst [vmem:[#allocation125_spill] sm:$0xff] %v12237_v52  ;;  %16738 = vst [vmem:[#allocation126_spill] sm:$0xff] %v12242_v56  ;;  %v12267_v12 = vsel %vm16747_vm11, 1.0, %v16706_v37  ;;  %v12272_v18 = vsel %vm16749_vm12, 1.0, %v16706_v37  ;;  %v12277_v4 = vsel %vm12112_vm2, 1.0, %v16706_v37  ;;  %v12282_v10 = vsel %vm12118_vm3, 1.0, %v16706_v37 }
  0x7e   :  { %16740 = vst [vmem:[#allocation127_spill] sm:$0xff] %v12247_v58  ;;  %16742 = vst [vmem:[#allocation128_spill] sm:$0xff] %v12252_v47  ;;  %v12287_v51 = vsel %vm12124_vm4, 1.0, %v16706_v37  ;;  %v12292_v19 = vsel %vm12130_vm5, 1.0, %v16706_v37  ;;  %v16762_v37 = vld [vmem:[#allocation82_spill] sm:$0xff]  ;;  %v16771_v58 = vld [vmem:[#allocation73_spill] sm:$0xff] }
  0x7f   :  { %16744 = vst [vmem:[#allocation129_spill] sm:$0xff] %v12257_v6  ;;  %16746 = vst [vmem:[#allocation130_spill] sm:$0xff] %v12262_v59  ;;  %v16768_v59 = vld [vmem:[#allocation76_spill] sm:$0xff]  ;;  %v16769_v6 = vld [vmem:[#allocation75_spill] sm:$0xff] }
  0x80   :  { %16748 = vst [vmem:[#allocation131_spill] sm:$0xff] %v12267_v12  ;;  %16750 = vst [vmem:[#allocation132_spill] sm:$0xff] %v12272_v18  ;;  %v16766_v18 = vld [vmem:[#allocation78_spill] sm:$0xff]  ;;  %v16767_v12 = vld [vmem:[#allocation77_spill] sm:$0xff] }
  0x81   :  { %16751 = vst [vmem:[#allocation133_spill] sm:$0xff] %v12277_v4  ;;  %16752 = vst [vmem:[#allocation134_spill] sm:$0xff] %v12282_v10  ;;  %v16764_v10 = vld [vmem:[#allocation80_spill] sm:$0xff]  ;;  %v16765_v4 = vld [vmem:[#allocation79_spill] sm:$0xff] }
  0x82   :  { %16753 = vst [vmem:[#allocation135_spill] sm:$0xff] %v12287_v51  ;;  %16754 = vst [vmem:[#allocation136_spill] sm:$0xff] %v12292_v19  ;;  %v16760_v51 = vld [vmem:[#allocation84_spill] sm:$0xff]  ;;  %v16763_v19 = vld [vmem:[#allocation81_spill] sm:$0xff] }
  0x83   :  { %v16770_v47 = vld [vmem:[#allocation74_spill] sm:$0xff]  ;;  %v16772_v56 = vld [vmem:[#allocation72_spill] sm:$0xff]  ;;  %v16773_v52 = vld [vmem:[#allocation71_spill] sm:$0xff]  ;;  %16813 = vst [vmem:[#allocation89_spill] sm:$0xff] %v16812_v8 }
  0x84   :  { %v16777_v40 = vld [vmem:[#allocation64_spill] sm:$0xff]  ;;  %v16792_v63 = vld [vmem:[#allocation35_spill] sm:$0xff]  ;;  %16818 = vst [vmem:[#allocation87_spill] sm:$0xff] %v16817_v36 }
  0x85   :  { %v16796_v11 = vld [vmem:[#allocation31_spill] sm:$0xff] }
  0x86   :  { %v16800_v13 = vld [vmem:[#allocation27_spill] sm:$0xff] }
  0x87 LB: > { %16829 = vst [vmem:[#allocation137_spill] sm:$0xff] %v10756_v24  ;;  %16830 = vst [vmem:[#allocation138_spill] sm:$0xff] %v10760_v45  ;;  %v16889_v48 = vld [vmem:[#allocation88_spill] sm:$0xff]  ;;  %v16893_v30 = vld [vmem:[#allocation86_spill] sm:$0xff]  ;;  %s8395_s28 = smul.u32 288, %s11012_s0  ;;  %vm2265_vm3 = vcmask 523264   ;;  %s14143_s11 = scalar_lea.vmem %s16084_s2, %s11012_s0  ;;  %s11012_s0 = sphi %s12486_s0, %s17483_s0   ;;  %v11004_v57 = vphi %v16821_v57, %v17480_v57   ;;  %v10988_v54 = vphi %v16814_v54, %v17473_v54   ;;  %v10980_v31 = vphi %v16811_v31, %v15511_v31   ;;  %v10976_v53 = vphi %v16810_v53, %v17470_v53   ;;  %v10972_v5 = vphi %v16809_v5, %v17469_v5   ;;  %v10968_v15 = vphi %v16808_v15, %v17468_v15   ;;  %v10964_v17 = vphi %v16807_v17, %v17467_v17   ;;  %v10960_v21 = vphi %v16806_v21, %v15531_v21   ;;  %v10956_v23 = vphi %v16805_v23, %v15535_v23   ;;  %v10952_v27 = vphi %v16804_v27, %v17466_v27   ;;  %v10948_v9 = vphi %v16803_v9, %v15543_v9   ;;  %v10944_v29 = vphi %v16802_v29, %v17465_v29   ;;  %v10940_v43 = vphi %v16801_v43, %v17464_v43   ;;  %v10936_v13 = vphi %v16800_v13, %v17463_v13   ;;  %v10932_v60 = vphi %v16799_v60, %v15559_v60   ;;  %v10928_v33 = vphi %v16798_v33, %v17462_v33   ;;  %v10924_v49 = vphi %v16797_v49, %v17461_v49   ;;  %v10920_v11 = vphi %v16796_v11, %v17460_v11   ;;  %v10916_v35 = vphi %v16795_v35, %v17459_v35   ;;  %v10912_v62 = vphi %v16794_v62, %v17458_v62   ;;  %v10908_v39 = vphi %v16793_v39, %v15583_v39   ;;  %v10904_v63 = vphi %v16792_v63, %v15587_v63   ;;  %v10900_v2 = vphi %v16791_v2, %v17457_v2   ;;  %v10896_v1 = vphi %v16790_v1, %v17456_v1   ;;  %v10892_v41 = vphi %v16789_v41, %v17455_v41   ;;  %v10888_v0 = vphi %v16788_v0, %v17454_v0   ;;  %v10884_v42 = vphi %v16787_v42, %v15607_v42   ;;  %v10880_v14 = vphi %v16786_v14, %v15611_v14   ;;  %v10876_v16 = vphi %v16785_v16, %v17453_v16   ;;  %v10872_v20 = vphi %v16784_v20, %v15619_v20   ;;  %v10868_v22 = vphi %v16783_v22, %v17452_v22   ;;  %v10864_v26 = vphi %v16782_v26, %v17451_v26   ;;  %v10860_v28 = vphi %v16781_v28, %v15631_v28   ;;  %v10856_v32 = vphi %v16780_v32, %v17450_v32   ;;  %v10852_v34 = vphi %v16779_v34, %v17449_v34   ;;  %v10848_v38 = vphi %v16778_v38, %v15643_v38   ;;  %v10844_v40 = vphi %v16777_v40, %v15647_v40   ;;  %v10840_v44 = vphi %v16776_v44, %v15651_v44   ;;  %v10836_v46 = vphi %v16775_v46, %v17448_v46   ;;  %v10832_v50 = vphi %v16774_v50, %v15659_v50   ;;  %v10828_v52 = vphi %v16773_v52, %v17447_v52   ;;  %v10824_v56 = vphi %v16772_v56, %v15667_v56   ;;  %v10820_v58 = vphi %v16771_v58, %v15671_v58   ;;  %v10816_v47 = vphi %v16770_v47, %v15675_v47   ;;  %v10812_v6 = vphi %v16769_v6, %v15679_v6   ;;  %v10808_v59 = vphi %v16768_v59, %v15683_v59   ;;  %v10804_v12 = vphi %v16767_v12, %v15687_v12   ;;  %v10800_v18 = vphi %v16766_v18, %v15691_v18   ;;  %v10796_v4 = vphi %v16765_v4, %v17446_v4   ;;  %v10792_v10 = vphi %v16764_v10, %v15699_v10   ;;  %v10788_v19 = vphi %v16763_v19, %v15703_v19   ;;  %v10784_v37 = vphi %v16762_v37, %v15707_v37   ;;  %v10780_v25 = vphi %v16761_v25, %v15711_v25   ;;  %v10776_v51 = vphi %v16760_v51, %v15715_v51   ;;  %v10772_v3 = vphi %v16759_v3, %v17445_v3   ;;  %v10768_v61 = vphi %v16758_v61, %v17443_v61   ;;  %v10764_v55 = vphi %v16757_v55, %v17442_v55   ;;  %v10760_v45 = vphi %v16756_v45, %v17441_v45   ;;  %v10756_v24 = vphi %v16755_v24, %v17440_v24  }
  0x88   : > { %16831 = vst [vmem:[#allocation139_spill] sm:$0xff] %v10764_v55  ;;  %16832 = vst [vmem:[#allocation140_spill] sm:$0xff] %v10768_v61  ;;  %v16896_v7 = vld [vmem:[#allocation85_spill] sm:$0xff]  ;;  %v16898_v61 = vld [vmem:[#allocation14_spill] sm:$0xff]  ;;  %s1726_s8 = sld [smem:[#allocation2 + %s11012_s0]]  ;;  %s1722_s14 = scalar_lea.vmem %s16085_s3, %s11012_s0 }
  0x89   : > { %16833 = vst [vmem:[#allocation141_spill] sm:$0xff] %v10772_v3  ;;  %16834 = vst [vmem:[#allocation142_spill] sm:$0xff] %v10776_v51  ;;  %vm1791_vm2 = vcmp.lt.s32.totalorder %v16898_v61, 1  ;;  %v16127_v3 = vrot.slane %v10764_v55, 7  ;;  %v1790_v51 = vrot.slane %v10756_v24, 7  ;;  %s12691_s7 = scalar_lea.vmem %s16083_s1, %s8395_s28  ;;  %v1728_v24 = vrot.slane %v11004_v57, 7  ;;  %s1724_s17 = scalar_lea.vmem %s16086_s4, %s11012_s0 }
  0x8a   : > { %16835 = vst [vmem:[#allocation143_spill] sm:$0xff] %v10780_v25  ;;  %16836 = vst [vmem:[#allocation144_spill] sm:$0xff] %v10784_v37  ;;  %v16886_v8 = vld [vmem:[#allocation89_spill] sm:$0xff]  ;;  %v1789_v25 = vrot.slane %v10760_v45, 7  ;;  %v10413_v37 = vld [vmem:[%s12691_s7] sm:$0xff]   ;;  %s1580_s18 = sadd.s32 1, %s11012_s0  }
  0x8b   : > { %16837 = vst [vmem:[#allocation145_spill] sm:$0xff] %v10788_v19  ;;  %16838 = vst [vmem:[#allocation146_spill] sm:$0xff] %v10792_v10  ;;  %v16891_v36 = vld [vmem:[#allocation87_spill] sm:$0xff]  ;;  %v16900_v19 = vld [vmem:[#allocation114_spill] sm:$0xff]  ;;  %8720 = vmatprep.subr.bf16.mxu1 %v10413_v37  ;;  %p15740_p5 = scmp.ge.s32.totalorder %s1580_s18, 9   ;;  %s17483_s0 = smov %s1580_s18 }
  0x8c   : > { %16839 = vst [vmem:[#allocation147_spill] sm:$0xff] %v10796_v4  ;;  %16840 = vst [vmem:[#allocation148_spill] sm:$0xff] %v10800_v18  ;;  %v1793_v45 = vsel %vm1791_vm2, %v16127_v3, %v1789_v25  ;;  %v10414_v18 = vld [vmem:[%s12691_s7 + $0x60] sm:$0xff]   ;;  %8721 = vmatpush3.bf16.msra.mxu1 %v10413_v37  ;;  %v10416_v55 = vld [vmem:[%s12691_s7 + $0x68] sm:$0xff]   ;;  %s11016_s1 = smov (%p15740_p5), [#allocation5]  }
  0x8d   : > { %16841 = vst [vmem:[#allocation149_spill] sm:$0xff] %v10804_v12  ;;  %16842 = vst [vmem:[#allocation150_spill] sm:$0xff] %v10808_v59  ;;  %v1918_v4 = vmul.f32 %v16900_v19, %v1793_v45  ;;  %v1727_v12 = vrot.slane %v16896_v7, 7  ;;  %9008 = vmatprep.subr.bf16.mxu0 %v10414_v18  ;;  %v1729_v45 = vrot.slane %v16893_v30, 7  ;;  %v10417_v3 = vld [vmem:[%s12691_s7 + $0x10] sm:$0xff]   ;;  %s7791_s2 = sshll.u32 (%p15740_p5), %s11016_s1, 4  ;;  %s7792_s2 = int_to_ptr.vmem [resolvable:$true] %s7791_s2 }
  0x8e   : > { %16843 = vst [vmem:[#allocation151_spill] sm:$0xff] %v10812_v6  ;;  %16844 = vst [vmem:[#allocation152_spill] sm:$0xff] %v10816_v47  ;;  %v10415_v6 = vld [vmem:[%s12691_s7 + $0x8] sm:$0xff]   ;;  %9009 = vmatpush3.bf16.msra.mxu0 %v10414_v18  ;;  %v10418_v37 = vld [vmem:[%s12691_s7 + $0x70] sm:$0xff]   ;;  %s10468_s3 = scalar_lea.vmem (%p15740_p5), %s7792_s2, 8192  ;;  %p10473_p7 = scmp.lt.s32.totalorder (%p15740_p5), %s7792_s2, %s7792_s2 }
  0x8f   : > { %16845 = vst [vmem:[#allocation153_spill] sm:$0xff] %v10820_v58  ;;  %16846 = vst [vmem:[#allocation154_spill] sm:$0xff] %v10824_v56  ;;  %v2145_v59 = vmul.f32 0.0, %v1918_v4  ;;  %v1855_v19 = vsel %vm1791_vm2, %v1790_v51, %v1727_v12  ;;  %8722 = vmatprep.subr.bf16.mxu1 %v10415_v6  ;;  %9010 = vmatprep.subr.bf16.mxu0 %v10416_v55  ;;  %v10419_v18 = vld [vmem:[%s12691_s7 + $0x18] sm:$0xff]   ;;  %p10469_p6 = scmp.ne.s32.totalorder (%p15740_p5), %s7792_s2, %s10468_s3  ;;  %p10474_p8 = scmp.lt.s32.totalorder (%p15740_p5), %s10468_s3, %s10468_s3 }
  0x90   : > { %16847 = vst [vmem:[#allocation155_spill] sm:$0xff] %v10828_v52  ;;  %16848 = vst [vmem:[#allocation156_spill] sm:$0xff] %v10832_v50  ;;  %v16902_v52 = vld [vmem:[#allocation59_spill] sm:$0xff]  ;;  %8723 = vmatpush3.bf16.msra.mxu1 %v10415_v6 }
  0x91   : > { %16849 = vst [vmem:[#allocation157_spill] sm:$0xff] %v10836_v46  ;;  %16850 = vst [vmem:[#allocation158_spill] sm:$0xff] %v10840_v44  ;;  %v1856_v56 = vmul.f32 %v16902_v52, %v1855_v19  ;;  %8724 = vmatprep.subr.bf16.mxu1 %v10417_v3  ;;  %v1735_v46 = vrot.slane %v10976_v53, 7  ;;  %p10475_p9 = por (%p15740_p5), %p10474_p8, %p10473_p7 }
  0x92   : > { %16851 = vst [vmem:[#allocation159_spill] sm:$0xff] %v10844_v40  ;;  %16852 = vst [vmem:[#allocation160_spill] sm:$0xff] %v10848_v38  ;;  %9011 = vmatpush3.bf16.msra.mxu0 %v10416_v55 }
  0x93   : > { %16853 = vst [vmem:[#allocation161_spill] sm:$0xff] %v10852_v34  ;;  %16854 = vst [vmem:[#allocation162_spill] sm:$0xff] %v10856_v32  ;;  %9012 = vmatprep.subr.bf16.mxu0 %v10418_v37  ;;  %p10476_p10 = pnand (%p15740_p5), %p10475_p9, %p10469_p6 }
  0x94   : > { %16855 = vst [vmem:[#allocation163_spill] sm:$0xff] %v10860_v28  ;;  %16856 = vst [vmem:[#allocation164_spill] sm:$0xff] %v10864_v26  ;;  %8725 = vmatpush3.bf16.msra.mxu1 %v10417_v3 }
  0x95   : > { %16857 = vst [vmem:[#allocation165_spill] sm:$0xff] %v10868_v22  ;;  %16858 = vst [vmem:[#allocation166_spill] sm:$0xff] %v10872_v20  ;;  %8726 = vmatprep.subr.bf16.mxu1 %v10419_v18 }
  0x96   : > { %16859 = vst [vmem:[#allocation167_spill] sm:$0xff] %v10876_v16  ;;  %16860 = vst [vmem:[#allocation168_spill] sm:$0xff] %v10880_v14  ;;  %9013 = vmatpush3.bf16.msra.mxu0 %v10418_v37 }
  0x97   : > { %16861 = vst [vmem:[#allocation169_spill] sm:$0xff] %v10884_v42  ;;  %16862 = vst [vmem:[#allocation170_spill] sm:$0xff] %v10888_v0 }
  0x98   : > { %16863 = vst [vmem:[#allocation171_spill] sm:$0xff] %v10892_v41  ;;  %16864 = vst [vmem:[#allocation172_spill] sm:$0xff] %v10896_v1  ;;  %8727 = vmatpush3.bf16.msra.mxu1 %v10419_v18  ;;  %v10424_v18 = vld [vmem:[%s12691_s7 + $0x88] sm:$0xff]  }
  0x99   : > { %16865 = vst [vmem:[#allocation173_spill] sm:$0xff] %v10900_v2  ;;  %16866 = vst [vmem:[#allocation174_spill] sm:$0xff] %v10904_v63 }
  0x9a   : > { %16867 = vst [vmem:[#allocation175_spill] sm:$0xff] %v10908_v39  ;;  %16868 = vst [vmem:[#allocation176_spill] sm:$0xff] %v10912_v62 }
  0x9b   : > { %16869 = vst [vmem:[#allocation177_spill] sm:$0xff] %v10916_v35  ;;  %16870 = vst [vmem:[#allocation178_spill] sm:$0xff] %v10920_v11 }
  0x9c   : > { %16871 = vst [vmem:[#allocation179_spill] sm:$0xff] %v10924_v49  ;;  %16872 = vst [vmem:[#allocation180_spill] sm:$0xff] %v10928_v33 }
  0x9d   : > { %16873 = vst [vmem:[#allocation181_spill] sm:$0xff] %v10932_v60  ;;  %16874 = vst [vmem:[#allocation182_spill] sm:$0xff] %v10936_v13 }
  0x9e   : > { %16875 = vst [vmem:[#allocation183_spill] sm:$0xff] %v10940_v43  ;;  %16876 = vst [vmem:[#allocation184_spill] sm:$0xff] %v10944_v29 }
  0x9f   : > { %16877 = vst [vmem:[#allocation185_spill] sm:$0xff] %v10948_v9  ;;  %16878 = vst [vmem:[#allocation186_spill] sm:$0xff] %v10952_v27 }
  0xa0   : > { %16879 = vst [vmem:[#allocation187_spill] sm:$0xff] %v10956_v23  ;;  %16880 = vst [vmem:[#allocation188_spill] sm:$0xff] %v10960_v21 }
  0xa1   : > { %16881 = vst [vmem:[#allocation189_spill] sm:$0xff] %v10964_v17  ;;  %16882 = vst [vmem:[#allocation190_spill] sm:$0xff] %v10968_v15 }
  0xa2   : > { %16883 = vst [vmem:[#allocation191_spill] sm:$0xff] %v10972_v5  ;;  %16884 = vst [vmem:[#allocation192_spill] sm:$0xff] %v10976_v53 }
  0xa3   : > { %16885 = vst [vmem:[#allocation193_spill] sm:$0xff] %v10980_v31  ;;  %16887 = vst [vmem:[#allocation89_spill] sm:$0xff] %v16886_v8  ;;  %v16899_v8 = vmov %v16898_v61  ;;  %v1792_v61 = vsel %vm1791_vm2, %v1789_v25, %v1790_v51  ;;  %v1854_v25 = vsel %vm1791_vm2, %v1727_v12, %v1728_v24  ;;  %v1730_v12 = vrot.slane %v16891_v36, 7  ;;  %v16905_v51 = vld [vmem:[#allocation60_spill] sm:$0xff] }
  0xa4   : > { %16888 = vst [vmem:[#allocation194_spill] sm:$0xff] %v10988_v54  ;;  %16890 = vst [vmem:[#allocation88_spill] sm:$0xff] %v16889_v48  ;;  %v2146_v10 = vmul.f32 0.0, %v1792_v61  ;;  %v12705_v47 = vpack.c.bf16 %v1792_v61, %v1918_v4  ;;  %v12715_v4 = vmul.f32 0.0, %v1854_v25  ;;  %v2210_v61 = vpack.c.bf16 %v1854_v25, %v1856_v56  ;;  %v10421_v25 = vld [vmem:[%s12691_s7 + $0x80] sm:$0xff]  }
  0xa5   : > { %16892 = vst [vmem:[#allocation87_spill] sm:$0xff] %v16891_v36  ;;  %16894 = vst [vmem:[#allocation86_spill] sm:$0xff] %v16893_v30  ;;  %8792 = vmatprep.subr.bf16.mxu1 %v10421_v25  ;;  %vm1984_vm4 = vcmp.lt.s32.totalorder %v16899_v8, 7 }
  0xa6   : > { %16895 = vst [vmem:[#allocation195_spill] sm:$0xff] %v11004_v57  ;;  %16897 = vst [vmem:[#allocation85_spill] sm:$0xff] %v16896_v7  ;;  %v2209_v58 = vpack.c.bf16 %v2146_v10, %v2145_v59  ;;  %v1853_v59 = vsel %vm1791_vm2, %v1728_v24, %v1729_v45  ;;  %v1731_v10 = vrot.slane %v16889_v48, 7  ;;  %9016 = vmatprep.mubr.msk.bf16.mxu0 %vm2265_vm3, %v2210_v61 }
  0xa7   : > { %16901 = vst [vmem:[#allocation196_spill] sm:$0xff] %v12705_v47  ;;  %16903 = vst [vmem:[#allocation197_spill] sm:$0xff] %v12715_v4  ;;  %v12719_v47 = vmul.f32 0.0, %v1856_v56  ;;  %v1732_v56 = vrot.slane %v10988_v54, 7  ;;  %v1858_v55 = vmul.f32 %v16905_v51, %v1853_v59  ;;  %v1852_v24 = vsel %vm1791_vm2, %v1729_v45, %v1730_v12  ;;  %v16907_v4 = vld [vmem:[#allocation61_spill] sm:$0xff] }
  0xa8   : > { %8728 = vmatprep.mubr.msk.bf16.mxu1 %vm2265_vm3, %v2209_v58  ;;  %v10420_v58 = vld [vmem:[%s12691_s7 + $0x78] sm:$0xff]   ;;  %v1851_v6 = vsel %vm1791_vm2, %v1730_v12, %v1731_v10  ;;  %v1734_v59 = vrot.slane %v10980_v31, 7  ;;  %v16911_v51 = vld [vmem:[#allocation65_spill] sm:$0xff] }
  0xa9   : > { %16904 = vst [vmem:[#allocation198_spill] sm:$0xff] %v12719_v47  ;;  %9014 = vmatprep.subr.bf16.mxu0 %v10420_v58  ;;  %v10422_v47 = vld [vmem:[%s12691_s7 + $0xa0] sm:$0xff]   ;;  %v1860_v50 = vmul.f32 %v16907_v4, %v1851_v6  ;;  %v1850_v3 = vsel %vm1791_vm2, %v1731_v10, %v1732_v56  ;;  %v12743_v37 = vpack.c.bf16 %v1852_v24, %v1858_v55  ;;  %v1736_v4 = vrot.slane %v10972_v5, 7  ;;  %v10423_v10 = vld [vmem:[%s12691_s7 + $0xa8] sm:$0xff]  }
  0xaa   : > { %v16906_v19 = vld [vmem:[#allocation89_spill] sm:$0xff]  ;;  %9015 = vmatpush3.bf16.msra.mxu0 %v10420_v58  ;;  %v1847_v6 = vsel %vm1791_vm2, %v1734_v59, %v1735_v46  ;;  %8729 = vmatmul.mubr.msk.bf16.vlgmr.msra.gmra.mrb[0].mxu1 %vm2265_vm3, %v2210_v61  ;;  %v1737_v24 = vrot.slane %v10968_v15, 7  ;;  %v10427_v61 = vld [vmem:[%s12691_s7 + $0x90] sm:$0xff]  }
  0xab   : > { %v1733_v52 = vrot.slane %v16906_v19, 7  ;;  %16908 = vst [vmem:[#allocation199_spill] sm:$0xff] %v12743_v37  ;;  %9080 = vmatprep.subr.bf16.mxu0 %v10422_v47  ;;  %v12748_v12 = vpack.c.bf16 %v1850_v3, %v1860_v50  ;;  %8793 = vmatpush3.bf16.msra.mxu1 %v10421_v25  ;;  %v1864_v55 = vmul.f32 %v16911_v51, %v1847_v6  ;;  %v10425_v3 = vld [vmem:[%s12691_s7 + $0xb0] sm:$0xff]   ;;  %v10426_v6 = vld [vmem:[%s12691_s7 + $0xb8] sm:$0xff]  }
  0xac   : > { %8732 = vmatprep.mubr.msk.bf16.mxu1 %vm2265_vm3, %v12743_v37  ;;  %v1846_v25 = vsel %vm1791_vm2, %v1735_v46, %v1736_v4  ;;  %8794 = vmatprep.subr.bf16.mxu1 %v10424_v18  ;;  %v1845_v51 = vsel %vm1791_vm2, %v1736_v4, %v1737_v24  ;;  %v16914_v4 = vld [vmem:[#allocation66_spill] sm:$0xff] }
  0xad   : > { %v1849_v45 = vsel %vm1791_vm2, %v1732_v56, %v1733_v52  ;;  %16909 = vst [vmem:[#allocation200_spill] sm:$0xff] %v12748_v12  ;;  %9017 = vmatmul.mubr.msk.bf16.vlgmr.msra.gmra.mrb[0].mxu0 %vm2265_vm3, %v12743_v37  ;;  %v1848_v58 = vsel %vm1791_vm2, %v1733_v52, %v1734_v59  ;;  %v16910_v56 = vld [vmem:[#allocation62_spill] sm:$0xff]  ;;  %v1739_v52 = vrot.slane %v10960_v21, 7  ;;  %v1743_v37 = vrot.slane %v10944_v29, 7 }
  0xae   : > { %v1862_v50 = vmul.f32 %v16910_v56, %v1849_v45  ;;  %9081 = vmatpush3.bf16.msra.mxu0 %v10422_v47  ;;  %9020 = vmatprep.mubr.msk.bf16.mxu0 %vm2265_vm3, %v12748_v12  ;;  %v1738_v47 = vrot.slane %v10964_v17, 7  ;;  %v1740_v45 = vrot.slane %v10956_v23, 7  ;;  %v12777_v56 = vpack.c.bf16 %v1846_v25, %v1864_v55  ;;  %v16915_v55 = vld [vmem:[#allocation67_spill] sm:$0xff] }
  0xaf   : > { %9082 = vmatprep.subr.bf16.mxu0 %v10423_v10  ;;  %8795 = vmatpush3.bf16.msra.mxu1 %v10424_v18  ;;  %v10429_v18 = vld [vmem:[%s12691_s7 + $0x98] sm:$0xff]  }
  0xb0   : > { %v12773_v59 = vpack.c.bf16 %v1848_v58, %v1862_v50  ;;  %16913 = vst [vmem:[#allocation202_spill] sm:$0xff] %v12777_v56  ;;  %8796 = vmatprep.subr.bf16.mxu1 %v10427_v61  ;;  %v1843_v46 = vsel %vm1791_vm2, %v1738_v47, %v1739_v52  ;;  %v1741_v58 = vrot.slane %v10952_v27, 7  ;;  %v1844_v50 = vsel %vm1791_vm2, %v1737_v24, %v1738_v47  ;;  %v12801_v27 = vld [vmem:[%s12691_s7 + $0xc0] sm:$0xff]  }
  0xb1   : > { %v1868_v25 = vmul.f32 %v16915_v55, %v1843_v46 }
  0xb2   : > { %16912 = vst [vmem:[#allocation201_spill] sm:$0xff] %v12773_v59  ;;  %9083 = vmatpush3.bf16.msra.mxu0 %v10423_v10  ;;  %8733 = vmatmul.mubr.msk.bf16.gmra.mrb[4].mxu1 %vm2265_vm3, %v12748_v12  ;;  %v1866_v10 = vmul.f32 %v16914_v4, %v1845_v51  ;;  %v1842_v12 = vsel %vm1791_vm2, %v1739_v52, %v1740_v45  ;;  %v12804_v51 = vld [vmem:[%s12691_s7 + $0x20] sm:$0xff]   ;;  %v1744_v52 = vrot.slane %v10940_v43, 7 }
  0xb3   : > { %9084 = vmatprep.subr.bf16.mxu0 %v10425_v3  ;;  %8736 = vmatprep.mubr.msk.bf16.mxu1 %vm2265_vm3, %v12773_v59  ;;  %16916 = vst [vmem:[#allocation203_spill] sm:$0xff] %v12804_v51  ;;  %v12809_v24 = vpack.c.bf16 %v1842_v12, %v1868_v25  ;;  %v16919_v12 = vld [vmem:[#allocation90_spill] sm:$0xff]  ;;  %v1746_v25 = vrot.slane %v10932_v60, 7 }
  0xb4   : > { %8797 = vmatpush3.bf16.msra.mxu1 %v10427_v61  ;;  %v12806_v4 = vpack.c.bf16 %v1844_v50, %v1866_v10  ;;  %v1838_v10 = vsel %vm1791_vm2, %v1743_v37, %v1744_v52  ;;  %v1747_v50 = vrot.slane %v10928_v33, 7 }
  0xb5   : > { %9021 = vmatmul.mubr.msk.bf16.gmra.mrb[4].mxu0 %vm2265_vm3, %v12773_v59  ;;  %8798 = vmatprep.subr.bf16.mxu1 %v10429_v18  ;;  %v1742_v59 = vrot.slane %v10948_v9, 7  ;;  %16918 = vst [vmem:[#allocation205_spill] sm:$0xff] %v12809_v24 }
  0xb6   : > { %9024 = vmatprep.mubr.msk.bf16.mxu0 %vm2265_vm3, %v12777_v56  ;;  %9085 = vmatpush3.bf16.msra.mxu0 %v10425_v3  ;;  %16917 = vst [vmem:[#allocation204_spill] sm:$0xff] %v12806_v4  ;;  %v1841_v3 = vsel %vm1791_vm2, %v1740_v45, %v1741_v58 }
  0xb7   : > { %9086 = vmatprep.subr.bf16.mxu0 %v10426_v6  ;;  %v1839_v47 = vsel %vm1791_vm2, %v1742_v59, %v1743_v37  ;;  %v1870_v61 = vmul.f32 %v16919_v12, %v1841_v3  ;;  %v1840_v45 = vsel %vm1791_vm2, %v1741_v58, %v1742_v59  ;;  %v1748_v59 = vrot.slane %v10924_v49, 7  ;;  %v16923_v37 = vld [vmem:[#allocation92_spill] sm:$0xff] }
  0xb8   : > { %8799 = vmatpush3.bf16.msra.mxu1 %v10429_v18  ;;  %v1745_v18 = vrot.slane %v10936_v13, 7  ;;  %v1835_v58 = vsel %vm1791_vm2, %v1746_v25, %v1747_v50 }
  0xb9   : > { %8864 = vmatprep.subr.bf16.mxu1 %v12804_v51  ;;  %v12834_v55 = vpack.c.bf16 %v1840_v45, %v1870_v61  ;;  %v16924_v61 = vld [vmem:[#allocation93_spill] sm:$0xff] }
  0xba   : > { %9087 = vmatpush3.bf16.msra.mxu0 %v10426_v6  ;;  %8737 = vmatmul.mubr.msk.bf16.gmra.mrb[8].mxu1 %vm2265_vm3, %v12777_v56  ;;  %v16920_v6 = vld [vmem:[#allocation91_spill] sm:$0xff]  ;;  %v1837_v12 = vsel %vm1791_vm2, %v1744_v52, %v1745_v18  ;;  %v1836_v52 = vsel %vm1791_vm2, %v1745_v18, %v1746_v25  ;;  %v1876_v45 = vmul.f32 %v16924_v61, %v1835_v58  ;;  %v1752_v18 = vrot.slane %v10908_v39, 7  ;;  %v16927_v58 = vld [vmem:[#allocation94_spill] sm:$0xff] }
  0xbb   : > { %9152 = vmatprep.subr.bf16.mxu0 %v12801_v27  ;;  %8740 = vmatprep.mubr.msk.bf16.mxu1 %vm2265_vm3, %v12806_v4  ;;  %v1872_v46 = vmul.f32 %v16920_v6, %v1839_v47  ;;  %16921 = vst [vmem:[#allocation206_spill] sm:$0xff] %v12834_v55  ;;  %v1874_v47 = vmul.f32 %v16923_v37, %v1837_v12  ;;  %v1749_v6 = vrot.slane %v10920_v11, 7  ;;  %v1753_v61 = vrot.slane %v10904_v63, 7 }
  0xbd   : > { %9025 = vmatmul.mubr.msk.bf16.gmra.mrb[8].mxu0 %vm2265_vm3, %v12806_v4  ;;  %v12837_v3 = vpack.c.bf16 %v1838_v10, %v1872_v46  ;;  %v1834_v46 = vsel %vm1791_vm2, %v1747_v50, %v1748_v59  ;;  %v1751_v10 = vrot.slane %v10912_v62, 7  ;;  %v1833_v37 = vsel %vm1791_vm2, %v1748_v59, %v1749_v6  ;;  %v16928_v59 = vld [vmem:[#allocation95_spill] sm:$0xff] }
  0xbe   : > { %9028 = vmatprep.mubr.msk.bf16.mxu0 %vm2265_vm3, %v12809_v24  ;;  %v12863_v12 = vpack.c.bf16 %v1834_v46, %v1876_v45  ;;  %v1755_v46 = vrot.slane %v10896_v1, 7 }
  0xbf   : > { %16922 = vst [vmem:[#allocation207_spill] sm:$0xff] %v12837_v3  ;;  %v1830_v45 = vsel %vm1791_vm2, %v1751_v10, %v1752_v18 }
  0xc0   : > { %16926 = vst [vmem:[#allocation209_spill] sm:$0xff] %v12863_v12 }
  0xc2   : > { %8741 = vmatmul.mubr.msk.bf16.gmra.mrb[12].mxu1 %vm2265_vm3, %v12809_v24  ;;  %v12860_v24 = vpack.c.bf16 %v1836_v52, %v1874_v47  ;;  %v1878_v47 = vmul.f32 %v16927_v58, %v1833_v37  ;;  %v1922_v58 = vrot.slane %v16893_v30, 1 }
  0xc3   : > { %8744 = vmatprep.mubr.msk.bf16.mxu1 %vm2265_vm3, %v12834_v55 }
  0xc4   : > { %16925 = vst [vmem:[#allocation208_spill] sm:$0xff] %v12860_v24 }
  0xc5   : > { %9029 = vmatmul.mubr.msk.bf16.gmra.mrb[12].mxu0 %vm2265_vm3, %v12834_v55  ;;  %v1750_v55 = vrot.slane %v10916_v35, 7 }
  0xc6   : > { %9032 = vmatprep.mubr.msk.bf16.mxu0 %vm2265_vm3, %v12837_v3 }
  0xc7   : > { %v1831_v25 = vsel %vm1791_vm2, %v1750_v55, %v1751_v10  ;;  %v1832_v50 = vsel %vm1791_vm2, %v1749_v6, %v1750_v55  ;;  %v1829_v55 = vsel %vm1791_vm2, %v1752_v18, %v1753_v61  ;;  %v1756_v6 = vrot.slane %v10892_v41, 7 }
  0xc8   : > { %v1880_v52 = vmul.f32 %v16928_v59, %v1831_v25  ;;  %v1757_v10 = vrot.slane %v10888_v0, 7  ;;  %v16931_v25 = vld [vmem:[#allocation96_spill] sm:$0xff]  ;;  %v1921_v18 = vrot.slane %v11004_v57, 1  ;;  %v16932_v59 = vld [vmem:[#allocation97_spill] sm:$0xff] }
  0xca   : > { %8745 = vmatmul.mubr.msk.bf16.gmra.mrb[16].mxu1 %vm2265_vm3, %v12837_v3  ;;  %v12886_v3 = vpack.c.bf16 %v1832_v50, %v1878_v47  ;;  %v12889_v4 = vpack.c.bf16 %v1830_v45, %v1880_v52  ;;  %v1882_v50 = vmul.f32 %v16931_v25, %v1829_v55  ;;  %v1826_v45 = vsel %vm1791_vm2, %v1755_v46, %v1756_v6 }
  0xcb   : > { %8748 = vmatprep.mubr.msk.bf16.mxu1 %vm2265_vm3, %v12860_v24  ;;  %v1758_v55 = vrot.slane %v10884_v42, 7  ;;  %v1825_v25 = vsel %vm1791_vm2, %v1756_v6, %v1757_v10  ;;  %v2046_v56 = vsel %vm1984_vm4, %v1921_v18, %v1922_v58 }
  0xcc   : > { %16929 = vst [vmem:[#allocation210_spill] sm:$0xff] %v12886_v3  ;;  %16930 = vst [vmem:[#allocation211_spill] sm:$0xff] %v12889_v4 }
  0xcd   : > { %9033 = vmatmul.mubr.msk.bf16.gmra.mrb[16].mxu0 %vm2265_vm3, %v12860_v24  ;;  %v1754_v24 = vrot.slane %v10900_v2, 7  ;;  %v1824_v6 = vsel %vm1791_vm2, %v1757_v10, %v1758_v55  ;;  %v1925_v10 = vrot.slane %v10988_v54, 1 }
  0xce   : > { %9036 = vmatprep.mubr.msk.bf16.mxu0 %vm2265_vm3, %v12863_v12 }
  0xcf   : > { %v1827_v37 = vsel %vm1791_vm2, %v1754_v24, %v1755_v46  ;;  %v1828_v47 = vsel %vm1791_vm2, %v1753_v61, %v1754_v24  ;;  %v1923_v24 = vrot.slane %v16891_v36, 1 }
  0xd0   : > { %v1884_v52 = vmul.f32 %v16932_v59, %v1827_v37  ;;  %v1924_v37 = vrot.slane %v16889_v48, 1  ;;  %v16935_v59 = vld [vmem:[#allocation98_spill] sm:$0xff] }
  0xd1   : > { %v1886_v46 = vmul.f32 %v16935_v59, %v1825_v25  ;;  %v1761_v25 = vrot.slane %v10872_v20, 7  ;;  %v2045_v48 = vsel %vm1984_vm4, %v1922_v58, %v1923_v24 }
  0xd2   : > { %8749 = vmatmul.mubr.msk.bf16.gmra.mrb[20].mxu1 %vm2265_vm3, %v12863_v12  ;;  %v12918_v12 = vpack.c.bf16 %v1828_v47, %v1882_v50  ;;  %v12923_v61 = vpack.c.bf16 %v1826_v45, %v1884_v52  ;;  %v16937_v50 = vld [vmem:[#allocation37_spill] sm:$0xff]  ;;  %v1759_v52 = vrot.slane %v10880_v14, 7  ;;  %v2043_v58 = vsel %vm1984_vm4, %v1924_v37, %v1925_v10 }
  0xd3   : > { %8752 = vmatprep.mubr.msk.bf16.mxu1 %vm2265_vm3, %v12886_v3  ;;  %v12938_v47 = vmul.f32 %v16937_v50, %v2046_v56  ;;  %v2177_v45 = vmul.f32 0.0, %v1886_v46  ;;  %v1926_v56 = vrot.slane %v16906_v19, 1  ;;  %v12950_v59 = vpack.c.bf16 %v1824_v6, %v1886_v46  ;;  %v16941_v46 = vld [vmem:[#allocation38_spill] sm:$0xff] }
  0xd4   : > { %16933 = vst [vmem:[#allocation212_spill] sm:$0xff] %v12918_v12  ;;  %16934 = vst [vmem:[#allocation213_spill] sm:$0xff] %v12923_v61  ;;  %v1760_v50 = vrot.slane %v10876_v16, 7  ;;  %v1762_v19 = vrot.slane %v10868_v22, 7 }
  0xd5   : > { %9037 = vmatmul.mubr.msk.bf16.gmra.mrb[20].mxu0 %vm2265_vm3, %v12886_v3  ;;  %v16150_v3 = vrot.slane %v16896_v7, 1  ;;  %16938 = vst [vmem:[#allocation215_spill] sm:$0xff] %v12938_v47  ;;  %16939 = vst [vmem:[#allocation216_spill] sm:$0xff] %v12950_v59  ;;  %v2042_v30 = vsel %vm1984_vm4, %v1925_v10, %v1926_v56 }
  0xd6   : > { %9040 = vmatprep.mubr.msk.bf16.mxu0 %vm2265_vm3, %v12889_v4  ;;  %v1821_v36 = vsel %vm1791_vm2, %v1760_v50, %v1761_v25 }
  0xd7   : > { %v12931_v51 = vsel %vm1984_vm4, %v16150_v3, %v1921_v18  ;;  %v2178_v18 = vmul.f32 0.0, %v1824_v6  ;;  %v2044_v3 = vsel %vm1984_vm4, %v1923_v24, %v1924_v37  ;;  %v1763_v24 = vrot.slane %v10864_v26, 7 }
  0xd8   : > { %16936 = vst [vmem:[#allocation214_spill] sm:$0xff] %v12931_v51  ;;  %v2052_v6 = vmul.f32 %v16941_v46, %v2044_v3  ;;  %v1927_v3 = vrot.slane %v10980_v31, 1  ;;  %v1929_v46 = vrot.slane %v10972_v5, 1  ;;  %v10430_v31 = vld [vmem:[%s12691_s7 + $0xc8] sm:$0xff]  }
  0xd9   : > { %v2225_v54 = vpack.c.bf16 %v2178_v18, %v2177_v45  ;;  %v1928_v45 = vrot.slane %v10976_v53, 1  ;;  %v1765_v18 = vrot.slane %v10856_v32, 7 }
  0xda   : > { %8753 = vmatmul.mubr.msk.bf16.gmra.mrb[24].mxu1 %vm2265_vm3, %v12889_v4  ;;  %v1823_v4 = vsel %vm1791_vm2, %v1758_v55, %v1759_v52 }
  0xdb   : > { %8756 = vmatprep.mubr.msk.bf16.mxu1 %vm2265_vm3, %v12918_v12 }
  0xdd   : > { %9041 = vmatmul.mubr.msk.bf16.gmra.mrb[24].mxu0 %vm2265_vm3, %v12918_v12  ;;  %v12957_v12 = vpack.c.bf16 %v12938_v47, %v12931_v51  ;;  %v12971_v47 = vsel %vm1791_vm2, %v1759_v52, %v1760_v50  ;;  %v16943_v51 = vld [vmem:[#allocation99_spill] sm:$0xff]  ;;  %v16946_v52 = vld [vmem:[#allocation41_spill] sm:$0xff]  ;;  %v1764_v50 = vrot.slane %v10860_v28, 7 }
  0xde   : > { %9044 = vmatprep.mubr.msk.bf16.mxu0 %vm2265_vm3, %v12923_v61  ;;  %16942 = vst [vmem:[#allocation218_spill] sm:$0xff] %v12971_v47  ;;  %v12974_v55 = vmul.f32 %v16943_v51, %v1823_v4  ;;  %v1820_v51 = vsel %vm1791_vm2, %v1761_v25, %v1762_v19  ;;  %v16945_v4 = vld [vmem:[#allocation100_spill] sm:$0xff]  ;;  %v2054_v10 = vmul.f32 %v16946_v52, %v2042_v30  ;;  %v1766_v25 = vrot.slane %v10852_v34, 7 }
  0xdf   : > { %16940 = vst [vmem:[#allocation217_spill] sm:$0xff] %v12957_v12  ;;  %v1890_v37 = vmul.f32 %v16945_v4, %v1821_v36  ;;  %v2040_v36 = vsel %vm1984_vm4, %v1927_v3, %v1928_v45  ;;  %v2041_v4 = vsel %vm1984_vm4, %v1926_v56, %v1927_v3  ;;  %v1817_v52 = vsel %vm1791_vm2, %v1764_v50, %v1765_v18  ;;  %v16953_v3 = vld [vmem:[#allocation102_spill] sm:$0xff] }
  0xe0   : > { %16944 = vst [vmem:[#allocation219_spill] sm:$0xff] %v12974_v55  ;;  %v13003_v30 = vpack.c.bf16 %v12971_v47, %v12974_v55  ;;  %v16952_v55 = vld [vmem:[#allocation42_spill] sm:$0xff]  ;;  %v1816_v56 = vsel %vm1791_vm2, %v1765_v18, %v1766_v25  ;;  %v1894_v53 = vmul.f32 %v16953_v3, %v1817_v52  ;;  %v16954_v18 = vld [vmem:[#allocation45_spill] sm:$0xff] }
  0xe1   : > { %v2056_v5 = vmul.f32 %v16952_v55, %v2040_v36  ;;  %v2039_v55 = vsel %vm1984_vm4, %v1928_v45, %v1929_v46 }
  0xe2   : > { %8757 = vmatmul.mubr.msk.bf16.gmra.mrb[28].mxu1 %vm2265_vm3, %v12923_v61  ;;  %v1930_v61 = vrot.slane %v10968_v15, 1  ;;  %16948 = vst [vmem:[#allocation221_spill] sm:$0xff] %v13003_v30 }
  0xe3   : > { %8760 = vmatprep.mubr.msk.bf16.mxu1 %vm2265_vm3, %v2225_v54  ;;  %v1819_v54 = vsel %vm1791_vm2, %v1762_v19, %v1763_v24  ;;  %v1818_v19 = vsel %vm1791_vm2, %v1763_v24, %v1764_v50  ;;  %v1931_v24 = vrot.slane %v10964_v17, 1  ;;  %v1933_v50 = vrot.slane %v10956_v23, 1 }
  0xe4   : > { %v2038_v47 = vsel %vm1984_vm4, %v1929_v46, %v1930_v61  ;;  %v13046_v3 = vpack.c.bf16 %v2056_v5, %v2041_v4 }
  0xe5   : > { %9045 = vmatmul.mubr.msk.bf16.gmra.mrb[28].mxu0 %vm2265_vm3, %v12950_v59  ;;  %v12996_v59 = vpack.c.bf16 %v2052_v6, %v2045_v48  ;;  %v13011_v48 = vpack.c.bf16 %v1820_v51, %v1890_v37  ;;  %v13013_v6 = vpack.c.bf16 %v2054_v10, %v2043_v58  ;;  %v1767_v58 = vrot.slane %v10848_v38, 7 }
  0xe6   : > { %9088 = vmatprep.mubr.msk.bf16.mxu0 %vm2265_vm3, %v12957_v12  ;;  %v16951_v12 = vld [vmem:[#allocation101_spill] sm:$0xff]  ;;  %v1769_v51 = vrot.slane %v10840_v44, 7  ;;  %v2058_v37 = vmul.f32 %v16954_v18, %v2038_v47  ;;  %v1768_v10 = vrot.slane %v10844_v40, 7  ;;  %16957 = vst [vmem:[#allocation225_spill] sm:$0xff] %v13046_v3  ;;  %v10432_v47 = vld [vmem:[%s12691_s7 + $0xd0] sm:$0xff]   ;;  %v2037_v5 = vsel %vm1984_vm4, %v1930_v61, %v1931_v24 }
  0xe7   : > { %16947 = vst [vmem:[#allocation220_spill] sm:$0xff] %v12996_v59  ;;  %16949 = vst [vmem:[#allocation222_spill] sm:$0xff] %v13011_v48  ;;  %v1892_v15 = vmul.f32 %v16951_v12, %v1819_v54  ;;  %v1932_v12 = vrot.slane %v10960_v21, 1  ;;  %v16955_v54 = vld [vmem:[#allocation186_spill] sm:$0xff]  ;;  %v1815_v45 = vsel %vm1791_vm2, %v1766_v25, %v1767_v58  ;;  %v1936_v61 = vrot.slane %v10944_v29, 1 }
  0xe8   : > { %16950 = vst [vmem:[#allocation223_spill] sm:$0xff] %v13013_v6  ;;  %v1934_v36 = vrot.slane %v16955_v54, 1  ;;  %v1813_v46 = vsel %vm1791_vm2, %v1768_v10, %v1769_v51  ;;  %v13057_v18 = vpack.c.bf16 %v2058_v37, %v2039_v55  ;;  %v16961_v25 = vld [vmem:[#allocation103_spill] sm:$0xff]  ;;  %v16964_v37 = vld [vmem:[#allocation156_spill] sm:$0xff] }
  0xe9   : > { %v13044_v52 = vpack.c.bf16 %v1818_v19, %v1892_v15  ;;  %v16960_v15 = vld [vmem:[#allocation157_spill] sm:$0xff]  ;;  %v10434_v55 = vld [vmem:[%s12691_s7 + $0xd8] sm:$0xff]  }
  0xea   : > { %8761 = vmatmul.mubr.msk.bf16.gmra.mrb[32].mxu1 %vm2265_vm3, %v13003_v30  ;;  %v13048_v30 = vpack.c.bf16 %v1816_v56, %v1894_v53  ;;  %16959 = vst [vmem:[#allocation227_spill] sm:$0xff] %v13057_v18  ;;  %v1770_v19 = vrot.slane %v16960_v15, 7  ;;  %v1814_v53 = vsel %vm1791_vm2, %v1767_v58, %v1768_v10  ;;  %v2034_v4 = vsel %vm1984_vm4, %v1933_v50, %v1934_v36 }
  0xeb   : > { %8764 = vmatprep.mubr.msk.bf16.mxu1 %vm2265_vm3, %v13011_v48  ;;  %16956 = vst [vmem:[#allocation224_spill] sm:$0xff] %v13044_v52  ;;  %v1896_v56 = vmul.f32 %v16961_v25, %v1815_v45  ;;  %v16963_v48 = vld [vmem:[#allocation104_spill] sm:$0xff]  ;;  %v1771_v58 = vrot.slane %v16964_v37, 7  ;;  %v1935_v10 = vrot.slane %v10948_v9, 1  ;;  %v16966_v45 = vld [vmem:[#allocation154_spill] sm:$0xff]  ;;  %v1938_v25 = vrot.slane %v10936_v13, 1 }
  0xec   : > { %16958 = vst [vmem:[#allocation226_spill] sm:$0xff] %v13048_v30  ;;  %v1898_v54 = vmul.f32 %v16963_v48, %v1813_v46  ;;  %v2035_v48 = vsel %vm1984_vm4, %v1932_v12, %v1933_v50  ;;  %v1937_v46 = vrot.slane %v10940_v43, 1  ;;  %v16975_v13 = vld [vmem:[#allocation50_spill] sm:$0xff]  ;;  %v1939_v43 = vrot.slane %v10932_v60, 1 }
  0xed   : > { %9089 = vmatmul.mubr.msk.bf16.vlgmr.msra.gmra.mrb[0].mxu0 %vm2265_vm3, %v12996_v59 }
  0xee   : > { %9153 = vmatpush3.bf16.msra.mxu0 %v12801_v27  ;;  %9092 = vmatprep.mubr.msk.bf16.mxu0 %vm2265_vm3, %v13013_v6  ;;  %v2036_v27 = vsel %vm1984_vm4, %v1931_v24, %v1932_v12  ;;  %v16962_v6 = vld [vmem:[#allocation46_spill] sm:$0xff]  ;;  %v13095_v12 = vld [vmem:[%s12691_s7 + $0xe0] sm:$0xff]  }
  0xef   : > { %9154 = vmatprep.subr.bf16.mxu0 %v10430_v31  ;;  %v2060_v59 = vmul.f32 %v16962_v6, %v2036_v27  ;;  %v16965_v6 = vld [vmem:[#allocation49_spill] sm:$0xff]  ;;  %v1773_v27 = vrot.slane %v16966_v45, 7  ;;  %16970 = vst [vmem:[#allocation230_spill] sm:$0xff] %v13095_v12 }
  0xf0   : > { %v2062_v24 = vmul.f32 %v16965_v6, %v2034_v4  ;;  %v1811_v4 = vsel %vm1791_vm2, %v1770_v19, %v1771_v58  ;;  %v2032_v6 = vsel %vm1984_vm4, %v1935_v10, %v1936_v61 }
  0xf2   : > { %9155 = vmatpush3.bf16.msra.mxu0 %v10430_v31  ;;  %8765 = vmatmul.mubr.msk.bf16.gmra.mrb[36].mxu1 %vm2265_vm3, %v13044_v52  ;;  %v1812_v31 = vsel %vm1791_vm2, %v1769_v51, %v1770_v19  ;;  %v16969_v51 = vld [vmem:[#allocation155_spill] sm:$0xff] }
  0xf3   : > { %9156 = vmatprep.subr.bf16.mxu0 %v10432_v47  ;;  %8768 = vmatprep.mubr.msk.bf16.mxu1 %vm2265_vm3, %v13048_v30  ;;  %v13091_v30 = vpack.c.bf16 %v2060_v59, %v2037_v5  ;;  %v1772_v52 = vrot.slane %v16969_v51, 7  ;;  %v13097_v50 = vpack.c.bf16 %v1812_v31, %v1898_v54  ;;  %v16973_v59 = vld [vmem:[#allocation153_spill] sm:$0xff]  ;;  %v2030_v54 = vsel %vm1984_vm4, %v1937_v46, %v1938_v25 }
  0xf5   : > { %9093 = vmatmul.mubr.msk.bf16.gmra.mrb[4].mxu0 %vm2265_vm3, %v13046_v3  ;;  %v13089_v3 = vpack.c.bf16 %v1814_v53, %v1896_v56  ;;  %16968 = vst [vmem:[#allocation229_spill] sm:$0xff] %v13091_v30  ;;  %16971 = vst [vmem:[#allocation231_spill] sm:$0xff] %v13097_v50  ;;  %v1774_v53 = vrot.slane %v16973_v59, 7  ;;  %v1809_v5 = vsel %vm1791_vm2, %v1772_v52, %v1773_v27  ;;  %v16974_v56 = vld [vmem:[#allocation105_spill] sm:$0xff] }
  0xf6   : > { %9096 = vmatprep.mubr.msk.bf16.mxu0 %vm2265_vm3, %v13057_v18  ;;  %9157 = vmatpush3.bf16.msra.mxu0 %v10432_v47  ;;  %v13103_v18 = vpack.c.bf16 %v2062_v24, %v2035_v48  ;;  %v2033_v47 = vsel %vm1984_vm4, %v1934_v36, %v1935_v10  ;;  %v1810_v19 = vsel %vm1791_vm2, %v1771_v58, %v1772_v52  ;;  %v16976_v10 = vld [vmem:[#allocation152_spill] sm:$0xff] }
  0xf7   : > { %16967 = vst [vmem:[#allocation228_spill] sm:$0xff] %v13089_v3  ;;  %9158 = vmatprep.subr.bf16.mxu0 %v10434_v55  ;;  %v1900_v31 = vmul.f32 %v16974_v56, %v1811_v4  ;;  %v2064_v48 = vmul.f32 %v16975_v13, %v2032_v6  ;;  %v2031_v36 = vsel %vm1984_vm4, %v1936_v61, %v1937_v46  ;;  %v1775_v24 = vrot.slane %v16976_v10, 7  ;;  %v16977_v13 = vld [vmem:[#allocation106_spill] sm:$0xff]  ;;  %v16978_v58 = vld [vmem:[#allocation53_spill] sm:$0xff]  ;;  %v16979_v6 = vld [vmem:[#allocation150_spill] sm:$0xff] }
  0xf8   : > { %16972 = vst [vmem:[#allocation232_spill] sm:$0xff] %v13103_v18  ;;  %v1902_v52 = vmul.f32 %v16977_v13, %v1809_v5  ;;  %v2066_v4 = vmul.f32 %v16978_v58, %v2030_v54  ;;  %v1777_v56 = vrot.slane %v16979_v6, 7  ;;  %v1808_v61 = vsel %vm1791_vm2, %v1773_v27, %v1774_v53  ;;  %v16980_v46 = vld [vmem:[#allocation151_spill] sm:$0xff]  ;;  %v16983_v13 = vld [vmem:[#allocation149_spill] sm:$0xff] }
  0xf9   : > { %v1807_v5 = vsel %vm1791_vm2, %v1774_v53, %v1775_v24  ;;  %v1778_v58 = vrot.slane %v16983_v13, 7 }
  0xfa   : > { %9159 = vmatpush3.bf16.msra.mxu0 %v10434_v55  ;;  %8769 = vmatmul.mubr.msk.bf16.gmra.mrb[40].mxu1 %vm2265_vm3, %v13089_v3  ;;  %v1940_v55 = vrot.slane %v10928_v33, 1  ;;  %v1776_v3 = vrot.slane %v16980_v46, 7  ;;  %v13138_v33 = vpack.c.bf16 %v1810_v19, %v1900_v31  ;;  %v13149_v27 = vpack.c.bf16 %v2066_v4, %v2031_v36  ;;  %v16986_v31 = vld [vmem:[#allocation107_spill] sm:$0xff] }
  0xfb   : > { %9224 = vmatprep.subr.bf16.mxu0 %v13095_v12  ;;  %8772 = vmatprep.mubr.msk.bf16.mxu1 %vm2265_vm3, %v13097_v50  ;;  %v1941_v12 = vrot.slane %v10924_v49, 1  ;;  %v13140_v50 = vpack.c.bf16 %v2064_v48, %v2033_v47  ;;  %v2029_v47 = vsel %vm1984_vm4, %v1938_v25, %v1939_v43  ;;  %v1904_v48 = vmul.f32 %v16986_v31, %v1807_v5 }
  0xfc   : > { %16981 = vst [vmem:[#allocation233_spill] sm:$0xff] %v13138_v33  ;;  %v2028_v54 = vsel %vm1984_vm4, %v1939_v43, %v1940_v55  ;;  %16985 = vst [vmem:[#allocation236_spill] sm:$0xff] %v13149_v27  ;;  %v1805_v49 = vsel %vm1791_vm2, %v1776_v3, %v1777_v56  ;;  %v1806_v19 = vsel %vm1791_vm2, %v1775_v24, %v1776_v3  ;;  %v16989_v43 = vld [vmem:[#allocation115_spill] sm:$0xff]  ;;  %v1944_v5 = vrot.slane %v10912_v62, 1 }
  0xfd   : > { %9097 = vmatmul.mubr.msk.bf16.gmra.mrb[8].mxu0 %vm2265_vm3, %v13091_v30  ;;  %v1942_v30 = vrot.slane %v10920_v11, 1  ;;  %16982 = vst [vmem:[#allocation234_spill] sm:$0xff] %v13140_v50  ;;  %v16987_v11 = vld [vmem:[#allocation54_spill] sm:$0xff]  ;;  %v1804_v36 = vsel %vm1791_vm2, %v1777_v56, %v1778_v58  ;;  %v2027_v3 = vsel %vm1984_vm4, %v1940_v55, %v1941_v12  ;;  %v1946_v55 = vrot.slane %v10904_v63, 1 }
  0xfe   : > { %9100 = vmatprep.mubr.msk.bf16.mxu0 %vm2265_vm3, %v13103_v18  ;;  %v13147_v18 = vpack.c.bf16 %v1808_v61, %v1902_v52  ;;  %v2068_v60 = vmul.f32 %v16987_v11, %v2028_v54  ;;  %v16988_v52 = vld [vmem:[#allocation108_spill] sm:$0xff]  ;;  %v16990_v11 = vld [vmem:[#allocation148_spill] sm:$0xff]  ;;  %v1943_v61 = vrot.slane %v10916_v35, 1 }
  0xff   : > { %v2026_v53 = vsel %vm1984_vm4, %v1941_v12, %v1942_v30  ;;  %v1906_v4 = vmul.f32 %v16988_v52, %v1805_v49  ;;  %v1779_v24 = vrot.slane %v16990_v11, 7  ;;  %v16991_v49 = vld [vmem:[#allocation146_spill] sm:$0xff]  ;;  %v1945_v12 = vrot.slane %v10908_v39, 1  ;;  %v16992_v54 = vld [vmem:[#allocation147_spill] sm:$0xff] }
 0x100   : > { %16984 = vst [vmem:[#allocation235_spill] sm:$0xff] %v13147_v18  ;;  %v2070_v25 = vmul.f32 %v16989_v43, %v2026_v53  ;;  %v1781_v56 = vrot.slane %v16991_v49, 7  ;;  %v1780_v31 = vrot.slane %v16992_v54, 7  ;;  %v13182_v52 = vpack.c.bf16 %v1806_v19, %v1904_v48 }
 0x101   : > { %v13184_v53 = vpack.c.bf16 %v2068_v60, %v2029_v47  ;;  %v13186_v43 = vpack.c.bf16 %v1804_v36, %v1906_v4  ;;  %v2022_v19 = vsel %vm1984_vm4, %v1945_v12, %v1946_v55  ;;  %v2025_v47 = vsel %vm1984_vm4, %v1942_v30, %v1943_v61  ;;  %v16999_v36 = vld [vmem:[#allocation116_spill] sm:$0xff] }
 0x102   : > { %8773 = vmatmul.mubr.msk.bf16.gmra.mrb[44].mxu1 %vm2265_vm3, %v13138_v33  ;;  %16993 = vst [vmem:[#allocation237_spill] sm:$0xff] %v13182_v52  ;;  %v16997_v33 = vld [vmem:[#allocation145_spill] sm:$0xff]  ;;  %v1801_v63 = vsel %vm1791_vm2, %v1780_v31, %v1781_v56  ;;  %v1802_v60 = vsel %vm1791_vm2, %v1779_v24, %v1780_v31  ;;  %v17001_v31 = vld [vmem:[#allocation117_spill] sm:$0xff] }
 0x103   : > { %8776 = vmatprep.mubr.msk.bf16.mxu1 %vm2265_vm3, %v13147_v18  ;;  %16994 = vst [vmem:[#allocation238_spill] sm:$0xff] %v13184_v53  ;;  %16995 = vst [vmem:[#allocation239_spill] sm:$0xff] %v13186_v43  ;;  %v1803_v18 = vsel %vm1791_vm2, %v1778_v58, %v1779_v24  ;;  %v1782_v39 = vrot.slane %v16997_v33, 7  ;;  %v16998_v58 = vld [vmem:[#allocation109_spill] sm:$0xff]  ;;  %v2074_v30 = vmul.f32 %v17001_v31, %v2022_v19  ;;  %v17005_v19 = vld [vmem:[#allocation143_spill] sm:$0xff] }
 0x104   : > { %v1908_v48 = vmul.f32 %v16998_v58, %v1803_v18  ;;  %v1784_v31 = vrot.slane %v17005_v19, 7 }
 0x105   : > { %9101 = vmatmul.mubr.msk.bf16.gmra.mrb[12].mxu0 %vm2265_vm3, %v13140_v50  ;;  %v13188_v50 = vpack.c.bf16 %v2070_v25, %v2027_v3  ;;  %v2023_v3 = vsel %vm1984_vm4, %v1944_v5, %v1945_v12  ;;  %v17000_v25 = vld [vmem:[#allocation110_spill] sm:$0xff]  ;;  %v1800_v18 = vsel %vm1791_vm2, %v1781_v56, %v1782_v39  ;;  %v17003_v12 = vld [vmem:[#allocation142_spill] sm:$0xff] }
 0x106   : > { %9104 = vmatprep.mubr.msk.bf16.mxu0 %vm2265_vm3, %v13149_v27  ;;  %v2024_v27 = vsel %vm1984_vm4, %v1943_v61, %v1944_v5  ;;  %v1910_v24 = vmul.f32 %v17000_v25, %v1801_v63  ;;  %v17002_v61 = vld [vmem:[#allocation144_spill] sm:$0xff]  ;;  %v1948_v5 = vrot.slane %v10896_v1, 1  ;;  %v1785_v58 = vrot.slane %v17003_v12, 7  ;;  %v17009_v1 = vld [vmem:[#allocation141_spill] sm:$0xff] }
 0x107   : > { %16996 = vst [vmem:[#allocation240_spill] sm:$0xff] %v13188_v50  ;;  %v2072_v4 = vmul.f32 %v16999_v36, %v2024_v27  ;;  %v1783_v62 = vrot.slane %v17002_v61, 7  ;;  %v1947_v27 = vrot.slane %v10900_v2, 1  ;;  %v1949_v36 = vrot.slane %v10892_v41, 1  ;;  %v17013_v2 = vld [vmem:[#allocation140_spill] sm:$0xff] }
 0x108   : > { %v1950_v63 = vrot.slane %v10888_v0, 1  ;;  %v13225_v25 = vpack.c.bf16 %v1802_v60, %v1908_v48  ;;  %v1786_v41 = vrot.slane %v17009_v1, 7  ;;  %v1797_v60 = vsel %vm1791_vm2, %v1784_v31, %v1785_v58 }
 0x109   : > { %v1799_v56 = vsel %vm1791_vm2, %v1782_v39, %v1783_v62  ;;  %v1798_v39 = vsel %vm1791_vm2, %v1783_v62, %v1784_v31  ;;  %v2019_v62 = vsel %vm1984_vm4, %v1948_v5, %v1949_v36  ;;  %v1954_v31 = vrot.slane %v10872_v20, 1 }
 0x10a   : > { %8777 = vmatmul.mubr.msk.bf16.gmra.mrb[48].mxu1 %vm2265_vm3, %v13182_v52  ;;  %17004 = vst [vmem:[#allocation241_spill] sm:$0xff] %v13225_v25  ;;  %v2020_v52 = vsel %vm1984_vm4, %v1947_v27, %v1948_v5  ;;  %v2018_v48 = vsel %vm1984_vm4, %v1949_v36, %v1950_v63  ;;  %v17019_v36 = vld [vmem:[#allocation113_spill] sm:$0xff] }
 0x10b   : > { %8780 = vmatprep.mubr.msk.bf16.mxu1 %vm2265_vm3, %v13186_v43  ;;  %v13232_v43 = vpack.c.bf16 %v2074_v30, %v2023_v3  ;;  %v2021_v3 = vsel %vm1984_vm4, %v1946_v55, %v1947_v27  ;;  %v1796_v55 = vsel %vm1791_vm2, %v1785_v58, %v1786_v41  ;;  %v17014_v27 = vld [vmem:[#allocation119_spill] sm:$0xff] }
 0x10d   : > { %9105 = vmatmul.mubr.msk.bf16.gmra.mrb[16].mxu0 %vm2265_vm3, %v13184_v53  ;;  %v13228_v53 = vpack.c.bf16 %v2072_v4, %v2025_v47  ;;  %17008 = vst [vmem:[#allocation244_spill] sm:$0xff] %v13232_v43  ;;  %v17010_v47 = vld [vmem:[#allocation111_spill] sm:$0xff] }
 0x10e   : > { %9108 = vmatprep.mubr.msk.bf16.mxu0 %vm2265_vm3, %v13188_v50  ;;  %v13230_v50 = vpack.c.bf16 %v1800_v18, %v1910_v24  ;;  %v1912_v4 = vmul.f32 %v17010_v47, %v1799_v56  ;;  %v17011_v24 = vld [vmem:[#allocation118_spill] sm:$0xff]  ;;  %v17012_v18 = vld [vmem:[#allocation112_spill] sm:$0xff]  ;;  %v2078_v56 = vmul.f32 %v17014_v27, %v2018_v48  ;;  %v1951_v47 = vrot.slane %v10884_v42, 1 }
 0x10f   : > { %17006 = vst [vmem:[#allocation242_spill] sm:$0xff] %v13228_v53  ;;  %v2076_v30 = vmul.f32 %v17011_v24, %v2020_v52  ;;  %v1914_v0 = vmul.f32 %v17012_v18, %v1797_v60  ;;  %v1953_v52 = vrot.slane %v10876_v16, 1 }
 0x110   : > { %17007 = vst [vmem:[#allocation243_spill] sm:$0xff] %v13230_v50  ;;  %v13268_v60 = vpack.c.bf16 %v1798_v39, %v1912_v4  ;;  %v13276_v48 = vpack.c.bf16 %v2078_v56, %v2019_v62  ;;  %v17022_v39 = vld [vmem:[#allocation120_spill] sm:$0xff]  ;;  %v17025_v56 = vld [vmem:[#allocation121_spill] sm:$0xff] }
 0x111   : > { %v13270_v24 = vpack.c.bf16 %v2076_v30, %v2021_v3  ;;  %v13272_v18 = vpack.c.bf16 %v1796_v55, %v1914_v0  ;;  %v2014_v5 = vsel %vm1984_vm4, %v1953_v52, %v1954_v31  ;;  %v13300_v55 = vsel %vm1984_vm4, %v1950_v63, %v1951_v47 }
 0x112   : > { %8781 = vmatmul.mubr.msk.bf16.gmra.mrb[52].mxu1 %vm2265_vm3, %v13225_v25  ;;  %v1787_v25 = vrot.slane %v17013_v2, 7  ;;  %17015 = vst [vmem:[#allocation245_spill] sm:$0xff] %v13268_v60  ;;  %17018 = vst [vmem:[#allocation248_spill] sm:$0xff] %v13276_v48  ;;  %v13303_v62 = vmul.f32 %v17025_v56, %v2014_v5 }
 0x113   : > { %8784 = vmatprep.mubr.msk.bf16.mxu1 %vm2265_vm3, %v13230_v50  ;;  %17016 = vst [vmem:[#allocation246_spill] sm:$0xff] %v13270_v24  ;;  %17017 = vst [vmem:[#allocation247_spill] sm:$0xff] %v13272_v18  ;;  %v10437_v50 = vld [vmem:[%s12691_s7 + $0x38] sm:$0xff]  }
 0x114   : > { %v1795_v58 = vsel %vm1791_vm2, %v1786_v41, %v1787_v25  ;;  %v17020_v41 = vld [vmem:[#allocation139_spill] sm:$0xff]  ;;  %17024 = vst [vmem:[#allocation250_spill] sm:$0xff] %v13300_v55  ;;  %17026 = vst [vmem:[#allocation251_spill] sm:$0xff] %v13303_v62 }
 0x115   : > { %9109 = vmatmul.mubr.msk.bf16.gmra.mrb[20].mxu0 %vm2265_vm3, %v13228_v53  ;;  %v1952_v53 = vrot.slane %v10880_v14, 1  ;;  %v1916_v4 = vmul.f32 %v17019_v36, %v1795_v58  ;;  %v17021_v0 = vrot.slane %v17020_v41, 7  ;;  %v1955_v58 = vrot.slane %v10868_v22, 1 }
 0x116   : > { %9112 = vmatprep.mubr.msk.bf16.mxu0 %vm2265_vm3, %v13232_v43  ;;  %v1956_v36 = vrot.slane %v10864_v26, 1  ;;  %v10433_v43 = vld [vmem:[%s12691_s7 + $0x28] sm:$0xff]  }
 0x117   : > { %v2016_v27 = vsel %vm1984_vm4, %v1951_v47, %v1952_v53  ;;  %v1794_v3 = vsel %vm1791_vm2, %v1787_v25, %v17021_v0  ;;  %v13309_v25 = vsel %vm1984_vm4, %v1952_v53, %v1953_v52  ;;  %v1958_v0 = vrot.slane %v10856_v32, 1 }
 0x118   : > { %v13294_v30 = vmul.f32 %v17022_v39, %v2016_v27  ;;  %17027 = vst [vmem:[#allocation252_spill] sm:$0xff] %v13309_v25  ;;  %v1957_v27 = vrot.slane %v10860_v28, 1  ;;  %v13313_v39 = vpack.c.bf16 %v1794_v3, %v1916_v4  ;;  %v13321_v47 = vpack.c.bf16 %v11004_v57, %v16896_v7  ;;  %v17031_v4 = vld [vmem:[#allocation122_spill] sm:$0xff] }
 0x119   : > { %v13325_v5 = vpack.c.bf16 %v13303_v62, %v13309_v25  ;;  %v2012_v53 = vsel %vm1984_vm4, %v1955_v58, %v1956_v36  ;;  %v2013_v56 = vsel %vm1984_vm4, %v1954_v31, %v1955_v58  ;;  %v17032_v62 = vld [vmem:[#allocation123_spill] sm:$0xff]  ;;  %v1962_v57 = vrot.slane %v10840_v44, 1  ;;  %v17036_v31 = vld [vmem:[#allocation88_spill] sm:$0xff] }
 0x11a   : > { %8785 = vmatmul.mubr.msk.bf16.gmra.mrb[56].mxu1 %vm2265_vm3, %v13268_v60  ;;  %17023 = vst [vmem:[#allocation249_spill] sm:$0xff] %v13294_v30  ;;  %17028 = vst [vmem:[#allocation253_spill] sm:$0xff] %v13313_v39  ;;  %v13317_v63 = vpack.c.bf16 %v13294_v30, %v13300_v55  ;;  %v2010_v52 = vsel %vm1984_vm4, %v1957_v27, %v1958_v0  ;;  %v2084_v3 = vmul.f32 %v17031_v4, %v2012_v53  ;;  %v17033_v53 = vld [vmem:[#allocation86_spill] sm:$0xff]  ;;  %v17034_v4 = vld [vmem:[#allocation87_spill] sm:$0xff] }
 0x11b   : > { %8788 = vmatprep.mubr.msk.bf16.mxu1 %vm2265_vm3, %v13272_v18  ;;  %17030 = vst [vmem:[#allocation255_spill] sm:$0xff] %v13325_v5  ;;  %v2086_v25 = vmul.f32 %v17032_v62, %v2010_v52  ;;  %v1960_v30 = vrot.slane %v10848_v38, 1  ;;  %v1961_v55 = vrot.slane %v10844_v40, 1  ;;  %v17037_v58 = vld [vmem:[#allocation194_spill] sm:$0xff] }
 0x11c   : > { %17029 = vst [vmem:[#allocation254_spill] sm:$0xff] %v13317_v63  ;;  %v13357_v62 = vpack.c.bf16 %v17037_v58, %v17036_v31 }
 0x11d   : > { %9113 = vmatmul.mubr.msk.bf16.gmra.mrb[24].mxu0 %vm2265_vm3, %v13270_v24  ;;  %v13351_v24 = vpack.c.bf16 %v17034_v4, %v17033_v53  ;;  %v1963_v4 = vrot.slane %v16960_v15, 1  ;;  %v1964_v53 = vrot.slane %v16964_v37, 1 }
 0x11e   : > { %9116 = vmatprep.mubr.msk.bf16.mxu0 %vm2265_vm3, %v13276_v48  ;;  %v1959_v48 = vrot.slane %v10852_v34, 1 }
 0x122   : > { %8789 = vmatmul.mubr.msk.bf16.gmra.mrb[60].mxu1 %vm2265_vm3, %v13313_v39  ;;  %v17043_v39 = vld [vmem:[#allocation193_spill] sm:$0xff] }
 0x123   : > { %8800 = vmatprep.mubr.msk.bf16.mxu1 %vm2265_vm3, %v13321_v47 }
 0x125   : > { %9117 = vmatmul.mubr.msk.bf16.gmra.mrb[28].mxu0 %vm2265_vm3, %v13317_v63  ;;  %v2011_v63 = vsel %vm1984_vm4, %v1956_v36, %v1957_v27  ;;  %v2008_v36 = vsel %vm1984_vm4, %v1959_v48, %v1960_v30  ;;  %v2006_v27 = vsel %vm1984_vm4, %v1961_v55, %v1962_v57 }
 0x126   : > { %9120 = vmatprep.mubr.msk.bf16.mxu0 %vm2265_vm3, %v13325_v5  ;;  %v13353_v5 = vpack.c.bf16 %v2084_v3, %v2013_v56  ;;  %v13359_v52 = vpack.c.bf16 %v2086_v25, %v2011_v63  ;;  %v17039_v3 = vld [vmem:[#allocation203_spill] sm:$0xff]  ;;  %v2009_v25 = vsel %vm1984_vm4, %v1958_v0, %v1959_v48  ;;  %v17041_v63 = vld [vmem:[#allocation125_spill] sm:$0xff] }
 0x127   : > { %v17040_v56 = vld [vmem:[#allocation124_spill] sm:$0xff]  ;;  %v2090_v31 = vmul.f32 %v17041_v63, %v2006_v27  ;;  %v17045_v0 = vld [vmem:[#allocation192_spill] sm:$0xff] }
 0x128   : > { %17035 = vst [vmem:[#allocation256_spill] sm:$0xff] %v13353_v5  ;;  %17038 = vst [vmem:[#allocation257_spill] sm:$0xff] %v13359_v52  ;;  %v2088_v58 = vmul.f32 %v17040_v56, %v2008_v36  ;;  %v2007_v36 = vsel %vm1984_vm4, %v1960_v30, %v1961_v55  ;;  %v1966_v56 = vrot.slane %v16966_v45, 1  ;;  %v17046_v27 = vld [vmem:[#allocation191_spill] sm:$0xff]  ;;  %v2004_v30 = vsel %vm1984_vm4, %v1963_v4, %v1964_v53 }
 0x129   : > { %v13394_v63 = vpack.c.bf16 %v17046_v27, %v17045_v0  ;;  %v13396_v60 = vpack.c.bf16 %v2090_v31, %v2007_v36  ;;  %v1967_v27 = vrot.slane %v16973_v59, 1  ;;  %v1968_v0 = vrot.slane %v16976_v10, 1 }
 0x12a   : > { %8801 = vmatmul.mubr.msk.bf16.vlgmr.msra.gmra.mrb[0].mxu1 %vm2265_vm3, %v13351_v24  ;;  %v13390_v48 = vpack.c.bf16 %v2088_v58, %v2009_v25  ;;  %v2005_v58 = vsel %vm1984_vm4, %v1962_v57, %v1963_v4  ;;  %v17049_v25 = vld [vmem:[#allocation127_spill] sm:$0xff] }
 0x12b   : > { %8865 = vmatpush3.bf16.msra.mxu1 %v17039_v3  ;;  %8804 = vmatprep.mubr.msk.bf16.mxu1 %vm2265_vm3, %v13357_v62  ;;  %v1965_v3 = vrot.slane %v16969_v51, 1  ;;  %17047 = vst [vmem:[#allocation258_spill] sm:$0xff] %v13396_v60 }
 0x12c   : > { %8866 = vmatprep.subr.bf16.mxu1 %v10433_v43  ;;  %17044 = vst [vmem:[#allocation203_spill] sm:$0xff] %v13390_v48 }
 0x12d   : > { %9121 = vmatmul.mubr.msk.bf16.gmra.mrb[32].mxu0 %vm2265_vm3, %v13353_v5  ;;  %v10435_v5 = vld [vmem:[%s12691_s7 + $0x30] sm:$0xff]   ;;  %v2002_v55 = vsel %vm1984_vm4, %v1965_v3, %v1966_v56 }
 0x12e   : > { %9124 = vmatprep.mubr.msk.bf16.mxu0 %vm2265_vm3, %v13359_v52  ;;  %v17042_v52 = vld [vmem:[#allocation89_spill] sm:$0xff]  ;;  %v2094_v36 = vmul.f32 %v17049_v25, %v2002_v55  ;;  %v13432_v55 = vpack.c.bf16 %v10956_v23, %v10960_v21  ;;  %v1972_v23 = vrot.slane %v16990_v11, 1 }
 0x12f   : > { %v13388_v18 = vpack.c.bf16 %v17043_v39, %v17042_v52  ;;  %8867 = vmatpush3.bf16.msra.mxu1 %v10433_v43  ;;  %v17048_v43 = vld [vmem:[#allocation126_spill] sm:$0xff]  ;;  %v2003_v39 = vsel %vm1984_vm4, %v1964_v53, %v1965_v3  ;;  %v1969_v52 = vrot.slane %v16980_v46, 1  ;;  %v2000_v53 = vsel %vm1984_vm4, %v1967_v27, %v1968_v0 }
 0x130   : > { %8868 = vmatprep.subr.bf16.mxu1 %v10435_v5  ;;  %v2092_v31 = vmul.f32 %v17048_v43, %v2004_v30  ;;  %v1970_v30 = vrot.slane %v16979_v6, 1  ;;  %v13422_v43 = vld [vmem:[%s12691_s7 + $0x40] sm:$0xff]  }
 0x131   : > { %v1999_v21 = vsel %vm1984_vm4, %v1968_v0, %v1969_v52  ;;  %v17060_v0 = vld [vmem:[#allocation130_spill] sm:$0xff] }
 0x132   : > { %8805 = vmatmul.mubr.msk.bf16.gmra.mrb[4].mxu1 %vm2265_vm3, %v13388_v18  ;;  %v13428_v4 = vpack.c.bf16 %v2092_v31, %v2005_v58  ;;  %v1998_v3 = vsel %vm1984_vm4, %v1969_v52, %v1970_v30  ;;  %v17054_v58 = vld [vmem:[#allocation129_spill] sm:$0xff] }
 0x133   : > { %8808 = vmatprep.mubr.msk.bf16.mxu1 %vm2265_vm3, %v13394_v63  ;;  %8869 = vmatpush3.bf16.msra.mxu1 %v10435_v5  ;;  %v13434_v5 = vpack.c.bf16 %v2094_v36, %v2003_v39  ;;  %v17053_v39 = vld [vmem:[#allocation128_spill] sm:$0xff]  ;;  %v2098_v25 = vmul.f32 %v17054_v58, %v1998_v3  ;;  %v1971_v36 = vrot.slane %v16983_v13, 1 }
 0x134   : > { %8870 = vmatprep.subr.bf16.mxu1 %v10437_v50  ;;  %17051 = vst [vmem:[#allocation259_spill] sm:$0xff] %v13428_v4  ;;  %v2096_v31 = vmul.f32 %v17053_v39, %v2000_v53  ;;  %v17055_v53 = vld [vmem:[#allocation186_spill] sm:$0xff] }
 0x135   : > { %9125 = vmatmul.mubr.msk.bf16.gmra.mrb[36].mxu0 %vm2265_vm3, %v13390_v48  ;;  %17052 = vst [vmem:[#allocation260_spill] sm:$0xff] %v13434_v5  ;;  %v13461_v39 = vpack.c.bf16 %v10948_v9, %v17055_v53  ;;  %v13469_v3 = vpack.c.bf16 %v2098_v25, %v1999_v21  ;;  %v1996_v58 = vsel %vm1984_vm4, %v1971_v36, %v1972_v23  ;;  %v1977_v53 = vrot.slane %v17005_v19, 1 }
 0x136   : > { %9128 = vmatprep.mubr.msk.bf16.mxu0 %vm2265_vm3, %v13396_v60  ;;  %v17050_v60 = vld [vmem:[#allocation190_spill] sm:$0xff]  ;;  %v1997_v21 = vsel %vm1984_vm4, %v1970_v30, %v1971_v36  ;;  %v17066_v30 = vld [vmem:[#allocation180_spill] sm:$0xff]  ;;  %v17067_v36 = vld [vmem:[#allocation179_spill] sm:$0xff] }
 0x137   : > { %v13426_v57 = vpack.c.bf16 %v10964_v17, %v17050_v60  ;;  %8871 = vmatpush3.bf16.msra.mxu1 %v10437_v50  ;;  %v2001_v50 = vsel %vm1984_vm4, %v1966_v56, %v1967_v27  ;;  %v1973_v17 = vrot.slane %v16992_v54, 1  ;;  %v1974_v60 = vrot.slane %v16991_v49, 1  ;;  %v17057_v56 = vld [vmem:[#allocation183_spill] sm:$0xff]  ;;  %17059 = vst [vmem:[#allocation263_spill] sm:$0xff] %v13469_v3 }
 0x138   : > { %8936 = vmatprep.subr.bf16.mxu1 %v13422_v43  ;;  %v13467_v27 = vpack.c.bf16 %v17057_v56, %v10944_v29  ;;  %v1975_v56 = vrot.slane %v16997_v33, 1  ;;  %v1976_v29 = vrot.slane %v17002_v61, 1 }
 0x139   : > { %v1994_v52 = vsel %vm1984_vm4, %v1973_v17, %v1974_v60  ;;  %v1995_v9 = vsel %vm1984_vm4, %v1972_v23, %v1973_v17  ;;  %v17070_v23 = vld [vmem:[#allocation132_spill] sm:$0xff] }
 0x13a   : > { %8809 = vmatmul.mubr.msk.bf16.gmra.mrb[8].mxu1 %vm2265_vm3, %v13426_v57  ;;  %17058 = vst [vmem:[#allocation262_spill] sm:$0xff] %v13467_v27  ;;  %v1992_v48 = vsel %vm1984_vm4, %v1975_v56, %v1976_v29 }
 0x13b   : > { %8812 = vmatprep.mubr.msk.bf16.mxu1 %vm2265_vm3, %v13432_v55 }
 0x13d   : > { %9129 = vmatmul.mubr.msk.bf16.gmra.mrb[40].mxu0 %vm2265_vm3, %v13428_v4 }
 0x13e   : > { %9132 = vmatprep.mubr.msk.bf16.mxu0 %vm2265_vm3, %v13434_v5  ;;  %v13463_v5 = vpack.c.bf16 %v2096_v31, %v2001_v50  ;;  %v2100_v31 = vmul.f32 %v17060_v0, %v1996_v58  ;;  %v17061_v50 = vld [vmem:[#allocation131_spill] sm:$0xff]  ;;  %v17063_v0 = vld [vmem:[#allocation181_spill] sm:$0xff] }
 0x13f   : > { %v2102_v25 = vmul.f32 %v17061_v50, %v1994_v52  ;;  %v17062_v58 = vld [vmem:[#allocation182_spill] sm:$0xff]  ;;  %v13501_v52 = vpack.c.bf16 %v17067_v36, %v17066_v30  ;;  %v1979_v36 = vrot.slane %v17009_v1, 1  ;;  %v1980_v30 = vrot.slane %v17013_v2, 1 }
 0x140   : > { %17056 = vst [vmem:[#allocation261_spill] sm:$0xff] %v13463_v5  ;;  %v13495_v4 = vpack.c.bf16 %v17063_v0, %v17062_v58  ;;  %v1991_v0 = vsel %vm1984_vm4, %v1976_v29, %v1977_v53  ;;  %v1981_v58 = vrot.slane %v17020_v41, 1 }
 0x141   : > { %17068 = vst [vmem:[#allocation266_spill] sm:$0xff] %v13501_v52  ;;  %v13503_v50 = vpack.c.bf16 %v2102_v25, %v1995_v9  ;;  %v1993_v9 = vsel %vm1984_vm4, %v1974_v60, %v1975_v56  ;;  %v17076_v60 = vld [vmem:[#allocation176_spill] sm:$0xff]  ;;  %v17077_v56 = vld [vmem:[#allocation175_spill] sm:$0xff] }
 0x142   : > { %8813 = vmatmul.mubr.msk.bf16.gmra.mrb[12].mxu1 %vm2265_vm3, %v13461_v39  ;;  %17064 = vst [vmem:[#allocation264_spill] sm:$0xff] %v13495_v4 }
 0x143   : > { %8816 = vmatprep.mubr.msk.bf16.mxu1 %vm2265_vm3, %v13467_v27  ;;  %17069 = vst [vmem:[#allocation267_spill] sm:$0xff] %v13503_v50 }
 0x145   : > { %9133 = vmatmul.mubr.msk.bf16.gmra.mrb[44].mxu0 %vm2265_vm3, %v13463_v5  ;;  %v1978_v5 = vrot.slane %v17003_v12, 1 }
 0x146   : > { %9136 = vmatprep.mubr.msk.bf16.mxu0 %vm2265_vm3, %v13469_v3  ;;  %v13497_v3 = vpack.c.bf16 %v2100_v31, %v1997_v21  ;;  %v2104_v31 = vmul.f32 %v17070_v23, %v1992_v48  ;;  %v17071_v21 = vld [vmem:[#allocation133_spill] sm:$0xff]  ;;  %v17073_v48 = vld [vmem:[#allocation178_spill] sm:$0xff] }
 0x147   : > { %v1990_v17 = vsel %vm1984_vm4, %v1977_v53, %v1978_v5  ;;  %v13529_v23 = vpack.c.bf16 %v10916_v35, %v17073_v48  ;;  %v17080_v53 = vld [vmem:[#allocation134_spill] sm:$0xff]  ;;  %v1987_v35 = vsel %vm1984_vm4, %v1980_v30, %v1981_v58  ;;  %v17083_v48 = vld [vmem:[#allocation174_spill] sm:$0xff] }
 0x148   : > { %17065 = vst [vmem:[#allocation265_spill] sm:$0xff] %v13497_v3  ;;  %v2106_v25 = vmul.f32 %v17071_v21, %v1990_v17  ;;  %v13535_v17 = vpack.c.bf16 %v17077_v56, %v17076_v60  ;;  %v17082_v56 = vld [vmem:[#allocation137_spill] sm:$0xff] }
 0x149   : > { %17074 = vst [vmem:[#allocation268_spill] sm:$0xff] %v13529_v23  ;;  %v1983_v60 = vrot.slane %v17082_v56, 1 }
 0x14a   : > { %8817 = vmatmul.mubr.msk.bf16.gmra.mrb[16].mxu1 %vm2265_vm3, %v13495_v4  ;;  %17078 = vst [vmem:[#allocation270_spill] sm:$0xff] %v13535_v17  ;;  %v13537_v21 = vpack.c.bf16 %v2106_v25, %v1991_v0  ;;  %v1988_v4 = vsel %vm1984_vm4, %v1979_v36, %v1980_v30  ;;  %v1989_v0 = vsel %vm1984_vm4, %v1978_v5, %v1979_v36  ;;  %v17087_v5 = vrot.slane %v16896_v7, 1 }
 0x14b   : > { %8820 = vmatprep.mubr.msk.bf16.mxu1 %vm2265_vm3, %v13501_v52 }
 0x14c   : > { %17079 = vst [vmem:[#allocation271_spill] sm:$0xff] %v13537_v21  ;;  %v2048_v36 = vsel %vm1984_vm4, %v1983_v60, %v17087_v5  ;;  %v10438_v5 = vld [vmem:[%s12691_s7 + $0xe8] sm:$0xff]  }
 0x14d   : > { %9137 = vmatmul.mubr.msk.bf16.gmra.mrb[48].mxu0 %vm2265_vm3, %v13497_v3  ;;  %v17072_v3 = vld [vmem:[#allocation138_spill] sm:$0xff] }
 0x14e   : > { %9140 = vmatprep.mubr.msk.bf16.mxu0 %vm2265_vm3, %v13503_v50  ;;  %v1982_v52 = vrot.slane %v17072_v3, 1  ;;  %v13531_v50 = vpack.c.bf16 %v2104_v31, %v1993_v9  ;;  %v2108_v31 = vmul.f32 %v17080_v53, %v1988_v4  ;;  %v17081_v9 = vld [vmem:[#allocation135_spill] sm:$0xff]  ;;  %v17085_v4 = vld [vmem:[#allocation172_spill] sm:$0xff]  ;;  %v17086_v53 = vld [vmem:[#allocation171_spill] sm:$0xff] }
 0x14f   : > { %v13566_v27 = vpack.c.bf16 %v17086_v53, %v17085_v4  ;;  %v17127_v53 = vld [vmem:[#allocation196_spill] sm:$0xff] }
 0x150   : > { %17075 = vst [vmem:[#allocation269_spill] sm:$0xff] %v13531_v50  ;;  %v1986_v29 = vsel %vm1984_vm4, %v1981_v58, %v1982_v52  ;;  %v17088_v58 = vld [vmem:[#allocation136_spill] sm:$0xff] }
 0x151   : > { %v2110_v25 = vmul.f32 %v17081_v9, %v1986_v29  ;;  %v13581_v30 = vmul.f32 %v17088_v58, %v2048_v36  ;;  %v17089_v29 = vld [vmem:[#allocation170_spill] sm:$0xff]  ;;  %v13599_v9 = vpack.c.bf16 %v10876_v16, %v10880_v14  ;;  %v17091_v36 = vld [vmem:[#allocation200_spill] sm:$0xff] }
 0x152   : > { %8821 = vmatmul.mubr.msk.bf16.gmra.mrb[20].mxu1 %vm2265_vm3, %v13529_v23  ;;  %v17092_v58 = vld [vmem:[#allocation230_spill] sm:$0xff] }
 0x153   : > { %8824 = vmatprep.mubr.msk.bf16.mxu1 %vm2265_vm3, %v13535_v17  ;;  %v13562_v17 = vpack.c.bf16 %v2108_v31, %v1989_v0  ;;  %v13591_v31 = vpack.c.bf16 %v10884_v42, %v17089_v29 }
 0x155   : > { %9141 = vmatmul.mubr.msk.bf16.gmra.mrb[52].mxu0 %vm2265_vm3, %v13531_v50  ;;  %v17084_v50 = vld [vmem:[#allocation173_spill] sm:$0xff] }
 0x156   : > { %9144 = vmatprep.mubr.msk.bf16.mxu0 %vm2265_vm3, %v13537_v21  ;;  %v13560_v23 = vpack.c.bf16 %v17084_v50, %v17083_v48  ;;  %v13568_v21 = vpack.c.bf16 %v2110_v25, %v1987_v35  ;;  %v13587_v35 = vsel %vm1984_vm4, %v1982_v52, %v1983_v60  ;;  %v17090_v52 = vld [vmem:[#allocation199_spill] sm:$0xff]  ;;  %v13611_v60 = vpack.c.bf16 %v10868_v22, %v10872_v20  ;;  %v10440_v22 = vld [vmem:[%s12691_s7 + $0xf0] sm:$0xff]   ;;  %v17129_v48 = vld [vmem:[#allocation198_spill] sm:$0xff] }
 0x157   : > { %v13595_v0 = vpack.c.bf16 %v13581_v30, %v13587_v35  ;;  %v13615_v25 = vpack.c.bf16 %v10860_v28, %v10864_v26  ;;  %v13630_v28 = vpack.c.bf16 %v10852_v34, %v10856_v32  ;;  %v13634_v26 = vpack.c.bf16 %v10844_v40, %v10848_v38  ;;  %v13646_v34 = vld [vmem:[%s12691_s7 + $0x100] sm:$0xff]   ;;  %v17126_v38 = vld [vmem:[#allocation253_spill] sm:$0xff] }
 0x158   : > { %v13654_v40 = vpack.c.bf16 %v16969_v51, %v16964_v37  ;;  %v17098_v51 = vld [vmem:[#allocation207_spill] sm:$0xff]  ;;  %v17123_v37 = vld [vmem:[#allocation268_spill] sm:$0xff]  ;;  %v3092_v32 = vmul.f32 0.0, %v17089_v29  ;;  %v3093_v20 = vmul.f32 0.0, %v10884_v42  ;;  %v17128_v50 = vld [vmem:[#allocation197_spill] sm:$0xff] }
 0x159   : > { %v17130_v8 = vpack.c.bf16 %v17128_v50, %v17129_v48  ;;  %v10446_v29 = vld [vmem:[%s12691_s7 + $0x108] sm:$0xff]   ;;  %v17138_v50 = vld [vmem:[#allocation234_spill] sm:$0xff] }
 0x15a   : > { %8825 = vmatmul.mubr.msk.bf16.gmra.mrb[24].mxu1 %vm2265_vm3, %v13560_v23  ;;  %v3140_v4 = vpack.c.bf16 %v3093_v20, %v3092_v32  ;;  %v10448_v20 = vld [vmem:[%s12691_s7 + $0x118] sm:$0xff]   ;;  %v5807_v32 = vmul.f32 0.0, %v10880_v14  ;;  %v17139_v48 = vld [vmem:[#allocation236_spill] sm:$0xff] }
 0x15b   : > { %8828 = vmatprep.mubr.msk.bf16.mxu1 %vm2265_vm3, %v13566_v27 }
 0x15d   : > { %9145 = vmatmul.mubr.msk.bf16.gmra.mrb[56].mxu0 %vm2265_vm3, %v13562_v17 }
 0x15e   : > { %9148 = vmatprep.mubr.msk.bf16.mxu0 %vm2265_vm3, %v13568_v21 }
 0x162   : > { %8829 = vmatmul.mubr.msk.bf16.gmra.mrb[28].mxu1 %vm2265_vm3, %v13591_v31 }
 0x163   : > { %8832 = vmatprep.mubr.msk.bf16.mxu1 %vm2265_vm3, %v13599_v9 }
 0x165   : > { %9149 = vmatmul.mubr.msk.bf16.gmra.mrb[60].mxu0 %vm2265_vm3, %v13595_v0 }
 0x166   : > { %9160 = vmatprep.mubr.msk.bf16.mxu0 %vm2265_vm3, %v17090_v52  ;;  %v17093_v52 = vld [vmem:[#allocation201_spill] sm:$0xff] }
 0x16a   : > { %8833 = vmatmul.mubr.msk.bf16.gmra.mrb[32].mxu1 %vm2265_vm3, %v13611_v60 }
 0x16b   : > { %8836 = vmatprep.mubr.msk.bf16.mxu1 %vm2265_vm3, %v13615_v25 }
 0x16d   : > { %9161 = vmatmul.mubr.msk.bf16.vlgmr.msra.gmra.mrb[0].mxu0 %vm2265_vm3, %v17091_v36  ;;  %v10442_v36 = vld [vmem:[%s12691_s7 + $0xf8] sm:$0xff]  }
 0x16e   : > { %9225 = vmatpush3.bf16.msra.mxu0 %v17092_v58  ;;  %9164 = vmatprep.mubr.msk.bf16.mxu0 %vm2265_vm3, %v17093_v52  ;;  %v17094_v58 = vld [vmem:[#allocation202_spill] sm:$0xff]  ;;  %v17095_v52 = vld [vmem:[#allocation204_spill] sm:$0xff] }
 0x16f   : > { %9226 = vmatprep.subr.bf16.mxu0 %v10438_v5 }
 0x172   : > { %9227 = vmatpush3.bf16.msra.mxu0 %v10438_v5  ;;  %8837 = vmatmul.mubr.msk.bf16.gmra.mrb[36].mxu1 %vm2265_vm3, %v13630_v28  ;;  %v13650_v5 = vpack.c.bf16 %v16960_v15, %v10840_v44  ;;  %v17124_v15 = vld [vmem:[#allocation247_spill] sm:$0xff]  ;;  %v17125_v44 = vld [vmem:[#allocation270_spill] sm:$0xff] }
 0x173   : > { %9228 = vmatprep.subr.bf16.mxu0 %v10440_v22  ;;  %8840 = vmatprep.mubr.msk.bf16.mxu1 %vm2265_vm3, %v13634_v26 }
 0x175   : > { %9165 = vmatmul.mubr.msk.bf16.gmra.mrb[4].mxu0 %vm2265_vm3, %v17094_v58  ;;  %v17096_v58 = vld [vmem:[#allocation205_spill] sm:$0xff] }
 0x176   : > { %9168 = vmatprep.mubr.msk.bf16.mxu0 %vm2265_vm3, %v17095_v52  ;;  %9229 = vmatpush3.bf16.msra.mxu0 %v10440_v22  ;;  %v17097_v22 = vld [vmem:[#allocation206_spill] sm:$0xff]  ;;  %v13667_v52 = vpack.c.bf16 %v16973_v59, %v16966_v45  ;;  %v17122_v45 = vld [vmem:[#allocation245_spill] sm:$0xff] }
 0x177   : > { %9230 = vmatprep.subr.bf16.mxu0 %v10442_v36  ;;  %v17121_v59 = vld [vmem:[#allocation266_spill] sm:$0xff] }
 0x17a   : > { %9231 = vmatpush3.bf16.msra.mxu0 %v10442_v36  ;;  %8841 = vmatmul.mubr.msk.bf16.gmra.mrb[40].mxu1 %vm2265_vm3, %v13650_v5  ;;  %v13671_v36 = vpack.c.bf16 %v16980_v46, %v16976_v10  ;;  %v13687_v46 = vpack.c.bf16 %v16992_v54, %v16990_v11  ;;  %v17100_v10 = vld [vmem:[#allocation209_spill] sm:$0xff]  ;;  %v13703_v54 = vpack.c.bf16 %v17005_v19, %v17002_v61  ;;  %v17102_v11 = vld [vmem:[#allocation211_spill] sm:$0xff] }
 0x17b   : > { %9296 = vmatprep.subr.bf16.mxu0 %v13646_v34  ;;  %8844 = vmatprep.mubr.msk.bf16.mxu1 %vm2265_vm3, %v13654_v40  ;;  %v13719_v19 = vpack.c.bf16 %v17020_v41, %v17013_v2  ;;  %v17104_v61 = vld [vmem:[#allocation213_spill] sm:$0xff]  ;;  %v3061_v41 = vmul.f32 0.0, %v17082_v56  ;;  %v17107_v2 = vld [vmem:[#allocation216_spill] sm:$0xff] }
 0x17d   : > { %9169 = vmatmul.mubr.msk.bf16.gmra.mrb[8].mxu0 %vm2265_vm3, %v17096_v58  ;;  %v17099_v58 = vld [vmem:[#allocation208_spill] sm:$0xff] }
 0x17e   : > { %9172 = vmatprep.mubr.msk.bf16.mxu0 %vm2265_vm3, %v17097_v22  ;;  %v13683_v22 = vpack.c.bf16 %v16983_v13, %v16979_v6  ;;  %v17120_v6 = vld [vmem:[#allocation243_spill] sm:$0xff] }
 0x182   : > { %8845 = vmatmul.mubr.msk.bf16.gmra.mrb[44].mxu1 %vm2265_vm3, %v13667_v52 }
 0x183   : > { %8848 = vmatprep.mubr.msk.bf16.mxu1 %vm2265_vm3, %v13671_v36 }
 0x185   : > { %9173 = vmatmul.mubr.msk.bf16.gmra.mrb[12].mxu0 %vm2265_vm3, %v17098_v51  ;;  %v17101_v51 = vld [vmem:[#allocation210_spill] sm:$0xff] }
 0x186   : > { %9176 = vmatprep.mubr.msk.bf16.mxu0 %vm2265_vm3, %v17099_v58  ;;  %v13699_v58 = vpack.c.bf16 %v16997_v33, %v16991_v49  ;;  %v17106_v33 = vld [vmem:[#allocation218_spill] sm:$0xff] }
 0x187   : > { %v5239_v49 = vmul.f32 0.0, %v17106_v33  ;;  %v17108_v33 = vld [vmem:[#allocation222_spill] sm:$0xff] }
 0x18a   : > { %8849 = vmatmul.mubr.msk.bf16.gmra.mrb[48].mxu1 %vm2265_vm3, %v13683_v22 }
 0x18b   : > { %8852 = vmatprep.mubr.msk.bf16.mxu1 %vm2265_vm3, %v13687_v46 }
 0x18d   : > { %9177 = vmatmul.mubr.msk.bf16.gmra.mrb[16].mxu0 %vm2265_vm3, %v17100_v10  ;;  %v17103_v10 = vld [vmem:[#allocation212_spill] sm:$0xff] }
 0x18e   : > { %9180 = vmatprep.mubr.msk.bf16.mxu0 %vm2265_vm3, %v17101_v51  ;;  %v13715_v51 = vpack.c.bf16 %v17009_v1, %v17003_v12  ;;  %v3060_v1 = vmul.f32 0.0, %v17072_v3  ;;  %v13735_v12 = vpack.c.bf16 %v17082_v56, %v17072_v3  ;;  %v17118_v56 = vld [vmem:[#allocation241_spill] sm:$0xff]  ;;  %v17119_v3 = vld [vmem:[#allocation264_spill] sm:$0xff] }
 0x190   : > { %v3124_v13 = vpack.c.bf16 %v3061_v41, %v3060_v1  ;;  %v17110_v1 = vld [vmem:[#allocation226_spill] sm:$0xff]  ;;  %v17111_v41 = vld [vmem:[#allocation228_spill] sm:$0xff] }
 0x192   : > { %8853 = vmatmul.mubr.msk.bf16.gmra.mrb[52].mxu1 %vm2265_vm3, %v13699_v58 }
 0x193   : > { %8856 = vmatprep.mubr.msk.bf16.mxu1 %vm2265_vm3, %v13703_v54 }
 0x195   : > { %9181 = vmatmul.mubr.msk.bf16.gmra.mrb[20].mxu0 %vm2265_vm3, %v17102_v11  ;;  %v17105_v11 = vld [vmem:[#allocation219_spill] sm:$0xff] }
 0x196   : > { %9184 = vmatprep.mubr.msk.bf16.mxu0 %vm2265_vm3, %v17103_v10  ;;  %v5238_v10 = vmul.f32 0.0, %v17105_v11  ;;  %v10441_v11 = vld [vmem:[%s12691_s7 + $0x48] sm:$0xff]  }
 0x19a   : > { %8857 = vmatmul.mubr.msk.bf16.gmra.mrb[56].mxu1 %vm2265_vm3, %v13715_v51 }
 0x19b   : > { %8860 = vmatprep.mubr.msk.bf16.mxu1 %vm2265_vm3, %v13719_v19 }
 0x19d   : > { %9185 = vmatmul.mubr.msk.bf16.gmra.mrb[24].mxu0 %vm2265_vm3, %v17104_v61  ;;  %v5287_v61 = vpack.c.bf16 %v5239_v49, %v5238_v10  ;;  %v10445_v49 = vld [vmem:[%s12691_s7 + $0x58] sm:$0xff]   ;;  %v17113_v10 = vld [vmem:[#allocation233_spill] sm:$0xff] }
 0x19e   : > { %9188 = vmatprep.mubr.msk.bf16.mxu0 %vm2265_vm3, %v17107_v2  ;;  %v17109_v2 = vld [vmem:[#allocation224_spill] sm:$0xff] }
 0x1a2   : > { %8861 = vmatmul.mubr.msk.bf16.gmra.mrb[60].mxu1 %vm2265_vm3, %v13735_v12 }
 0x1a3   : > { %8872 = vmatprep.mubr.msk.bf16.mxu1 %vm2265_vm3, %v3124_v13  ;;  %v10443_v13 = vld [vmem:[%s12691_s7 + $0x50] sm:$0xff]  }
 0x1a5   : > { %9189 = vmatmul.mubr.msk.bf16.gmra.mrb[28].mxu0 %vm2265_vm3, %v5287_v61  ;;  %v17114_v61 = vld [vmem:[#allocation235_spill] sm:$0xff] }
 0x1a6   : > { %9192 = vmatprep.mubr.msk.bf16.mxu0 %vm2265_vm3, %v17108_v33 }
 0x1aa   : > { %8873 = vmatmul.mubr.msk.bf16.vlgmr.msra.gmra.mrb[0].mxu1 %vm2265_vm3, %v13321_v47  ;;  %v17112_v47 = vld [vmem:[#allocation231_spill] sm:$0xff] }
 0x1ab   : > { %8937 = vmatpush3.bf16.msra.mxu1 %v13422_v43  ;;  %8876 = vmatprep.mubr.msk.bf16.mxu1 %vm2265_vm3, %v13351_v24  ;;  %v13764_v43 = vld [vmem:[%s12691_s7 + $0x60] sm:$0xff]  }
 0x1ac   : > { %8938 = vmatprep.subr.bf16.mxu1 %v10441_v11 }
 0x1ad   : > { %9193 = vmatmul.mubr.msk.bf16.gmra.mrb[32].mxu0 %vm2265_vm3, %v17109_v2 }
 0x1ae   : > { %9196 = vmatprep.mubr.msk.bf16.mxu0 %vm2265_vm3, %v17110_v1 }
 0x1af   : > { %8939 = vmatpush3.bf16.msra.mxu1 %v10441_v11  ;;  %v17115_v11 = vld [vmem:[#allocation237_spill] sm:$0xff] }
 0x1b0   : > { %8940 = vmatprep.subr.bf16.mxu1 %v10443_v13 }
 0x1b2   : > { %8877 = vmatmul.mubr.msk.bf16.gmra.mrb[4].mxu1 %vm2265_vm3, %v13357_v62 }
 0x1b3   : > { %8880 = vmatprep.mubr.msk.bf16.mxu1 %vm2265_vm3, %v13388_v18  ;;  %8941 = vmatpush3.bf16.msra.mxu1 %v10443_v13  ;;  %v17116_v13 = vld [vmem:[#allocation239_spill] sm:$0xff] }
 0x1b4   : > { %8942 = vmatprep.subr.bf16.mxu1 %v10445_v49 }
 0x1b5   : > { %9197 = vmatmul.mubr.msk.bf16.gmra.mrb[36].mxu0 %vm2265_vm3, %v17111_v41 }
 0x1b6   : > { %9200 = vmatprep.mubr.msk.bf16.mxu0 %vm2265_vm3, %v17112_v47 }
 0x1b7   : > { %8943 = vmatpush3.bf16.msra.mxu1 %v10445_v49  ;;  %v17117_v49 = vld [vmem:[#allocation262_spill] sm:$0xff] }
 0x1b8   : > { %9368 = vmatprep.subr.bf16.mxu1 %v13764_v43 }
 0x1ba   : > { %8881 = vmatmul.mubr.msk.bf16.gmra.mrb[8].mxu1 %vm2265_vm3, %v13394_v63 }
 0x1bb   : > { %8884 = vmatprep.mubr.msk.bf16.mxu1 %vm2265_vm3, %v13426_v57 }
 0x1bd   : > { %9201 = vmatmul.mubr.msk.bf16.gmra.mrb[40].mxu0 %vm2265_vm3, %v17113_v10 }
 0x1be   : > { %9204 = vmatprep.mubr.msk.bf16.mxu0 %vm2265_vm3, %v17114_v61 }
 0x1c2   : > { %8885 = vmatmul.mubr.msk.bf16.gmra.mrb[12].mxu1 %vm2265_vm3, %v13432_v55 }
 0x1c3   : > { %8888 = vmatprep.mubr.msk.bf16.mxu1 %vm2265_vm3, %v13461_v39 }
 0x1c5   : > { %9205 = vmatmul.mubr.msk.bf16.gmra.mrb[44].mxu0 %vm2265_vm3, %v17115_v11 }
 0x1c6   : > { %9208 = vmatprep.mubr.msk.bf16.mxu0 %vm2265_vm3, %v17116_v13 }
 0x1ca   : > { %8889 = vmatmul.mubr.msk.bf16.gmra.mrb[16].mxu1 %vm2265_vm3, %v17117_v49 }
 0x1cb   : > { %8892 = vmatprep.mubr.msk.bf16.mxu1 %vm2265_vm3, %v17119_v3 }
 0x1cd   : > { %9209 = vmatmul.mubr.msk.bf16.gmra.mrb[48].mxu0 %vm2265_vm3, %v17118_v56 }
 0x1ce   : > { %9212 = vmatprep.mubr.msk.bf16.mxu0 %vm2265_vm3, %v17120_v6 }
 0x1d2   : > { %8893 = vmatmul.mubr.msk.bf16.gmra.mrb[20].mxu1 %vm2265_vm3, %v17121_v59 }
 0x1d3   : > { %8896 = vmatprep.mubr.msk.bf16.mxu1 %vm2265_vm3, %v17123_v37 }
 0x1d5   : > { %9213 = vmatmul.mubr.msk.bf16.gmra.mrb[52].mxu0 %vm2265_vm3, %v17122_v45 }
 0x1d6   : > { %9216 = vmatprep.mubr.msk.bf16.mxu0 %vm2265_vm3, %v17124_v15 }
 0x1da   : > { %8897 = vmatmul.mubr.msk.bf16.gmra.mrb[24].mxu1 %vm2265_vm3, %v17125_v44 }
 0x1db   : > { %8900 = vmatprep.mubr.msk.bf16.mxu1 %vm2265_vm3, %v13560_v23 }
 0x1dd   : > { %9217 = vmatmul.mubr.msk.bf16.gmra.mrb[56].mxu0 %vm2265_vm3, %v17126_v38 }
 0x1de   : > { %9220 = vmatprep.mubr.msk.bf16.mxu0 %vm2265_vm3, %v17127_v53 }
 0x1e2   : > { %8901 = vmatmul.mubr.msk.bf16.gmra.mrb[28].mxu1 %vm2265_vm3, %v13566_v27 }
 0x1e3   : > { %8904 = vmatprep.mubr.msk.bf16.mxu1 %vm2265_vm3, %v3140_v4  ;;  %v17142_v4 = vld [vmem:[#allocation242_spill] sm:$0xff] }
 0x1e5   : > { %9221 = vmatmul.mubr.msk.bf16.gmra.mrb[60].mxu0 %vm2265_vm3, %v17130_v8  ;;  %v10447_v8 = vld [vmem:[%s12691_s7 + $0x110] sm:$0xff]  }
 0x1e6   : > { %9232 = vmatprep.mubr.msk.bf16.mxu0 %vm2265_vm3, %v13351_v24 }
 0x1ea   : > { %8905 = vmatmul.mubr.msk.bf16.gmra.mrb[32].mxu1 %vm2265_vm3, %v13599_v9 }
 0x1eb   : > { %8908 = vmatprep.mubr.msk.bf16.mxu1 %vm2265_vm3, %v13611_v60 }
 0x1ed   : > { %9233 = vmatmul.mubr.msk.bf16.vlgmr.msra.gmra.mrb[0].mxu0 %vm2265_vm3, %v13357_v62  ;;  %v17132_v62 = vld [vmem:[#allocation220_spill] sm:$0xff] }
 0x1ee   : > { %9297 = vmatpush3.bf16.msra.mxu0 %v13646_v34  ;;  %9236 = vmatprep.mubr.msk.bf16.mxu0 %vm2265_vm3, %v13388_v18  ;;  %v5808_v34 = vmul.f32 0.0, %v10876_v16  ;;  %v17131_v18 = vld [vmem:[#allocation217_spill] sm:$0xff] }
 0x1ef   : > { %9298 = vmatprep.subr.bf16.mxu0 %v10446_v29 }
 0x1f2   : > { %9299 = vmatpush3.bf16.msra.mxu0 %v10446_v29  ;;  %8909 = vmatmul.mubr.msk.bf16.gmra.mrb[36].mxu1 %vm2265_vm3, %v13615_v25  ;;  %v17145_v29 = vld [vmem:[#allocation195_spill] sm:$0xff] }
 0x1f3   : > { %9300 = vmatprep.subr.bf16.mxu0 %v10447_v8  ;;  %8912 = vmatprep.mubr.msk.bf16.mxu1 %vm2265_vm3, %v13630_v28 }
 0x1f5   : > { %9237 = vmatmul.mubr.msk.bf16.gmra.mrb[4].mxu0 %vm2265_vm3, %v13394_v63  ;;  %v10452_v63 = vld [vmem:[%s12691_s7 + $0x68] sm:$0xff]  }
 0x1f6   : > { %9240 = vmatprep.mubr.msk.bf16.mxu0 %vm2265_vm3, %v13426_v57  ;;  %9301 = vmatpush3.bf16.msra.mxu0 %v10447_v8  ;;  %v10453_v57 = vld [vmem:[%s12691_s7 + $0x70] sm:$0xff]  }
 0x1f7   : > { %9302 = vmatprep.subr.bf16.mxu0 %v10448_v20  ;;  %v17156_v8 = vld [vmem:[#allocation261_spill] sm:$0xff] }
 0x1fa   : > { %9303 = vmatpush3.bf16.msra.mxu0 %v10448_v20  ;;  %8913 = vmatmul.mubr.msk.bf16.gmra.mrb[40].mxu1 %vm2265_vm3, %v13634_v26  ;;  %v17157_v20 = vld [vmem:[#allocation263_spill] sm:$0xff] }
 0x1fb   : > { %8916 = vmatprep.mubr.msk.bf16.mxu1 %vm2265_vm3, %v13650_v5 }
 0x1fd   : > { %9241 = vmatmul.mubr.msk.bf16.gmra.mrb[8].mxu0 %vm2265_vm3, %v13432_v55  ;;  %v17133_v55 = vld [vmem:[#allocation223_spill] sm:$0xff] }
 0x1fe   : > { %9244 = vmatprep.mubr.msk.bf16.mxu0 %vm2265_vm3, %v13461_v39  ;;  %v17134_v39 = vld [vmem:[#allocation225_spill] sm:$0xff] }
 0x202   : > { %8917 = vmatmul.mubr.msk.bf16.gmra.mrb[44].mxu1 %vm2265_vm3, %v13654_v40 }
 0x203   : > { %8920 = vmatprep.mubr.msk.bf16.mxu1 %vm2265_vm3, %v13667_v52 }
 0x205   : > { %9245 = vmatmul.mubr.msk.bf16.gmra.mrb[12].mxu0 %vm2265_vm3, %v17117_v49  ;;  %v17155_v49 = vld [vmem:[#allocation260_spill] sm:$0xff] }
 0x206   : > { %9248 = vmatprep.mubr.msk.bf16.mxu0 %vm2265_vm3, %v17119_v3  ;;  %v17136_v3 = vld [vmem:[#allocation229_spill] sm:$0xff] }
 0x20a   : > { %8921 = vmatmul.mubr.msk.bf16.gmra.mrb[48].mxu1 %vm2265_vm3, %v13671_v36 }
 0x20b   : > { %8924 = vmatprep.mubr.msk.bf16.mxu1 %vm2265_vm3, %v13683_v22 }
 0x20d   : > { %9249 = vmatmul.mubr.msk.bf16.gmra.mrb[16].mxu0 %vm2265_vm3, %v17121_v59  ;;  %v5856_v59 = vpack.c.bf16 %v5808_v34, %v5807_v32  ;;  %v17158_v32 = vld [vmem:[#allocation265_spill] sm:$0xff]  ;;  %v17159_v34 = vld [vmem:[#allocation267_spill] sm:$0xff] }
 0x20e   : > { %9252 = vmatprep.mubr.msk.bf16.mxu0 %vm2265_vm3, %v17123_v37  ;;  %v3630_v37 = vmul.f32 0.0, %v13581_v30  ;;  %v17143_v30 = vld [vmem:[#allocation244_spill] sm:$0xff] }
 0x212   : > { %8925 = vmatmul.mubr.msk.bf16.gmra.mrb[52].mxu1 %vm2265_vm3, %v13687_v46 }
 0x213   : > { %8928 = vmatprep.mubr.msk.bf16.mxu1 %vm2265_vm3, %v13699_v58 }
 0x215   : > { %9253 = vmatmul.mubr.msk.bf16.gmra.mrb[20].mxu0 %vm2265_vm3, %v17125_v44  ;;  %v3629_v44 = vmul.f32 0.0, %v13587_v35  ;;  %v5839_v35 = vmul.f32 0.0, %v16896_v7 }
 0x216   : > { %9256 = vmatprep.mubr.msk.bf16.mxu0 %vm2265_vm3, %v13560_v23  ;;  %v17141_v23 = vld [vmem:[#allocation240_spill] sm:$0xff] }
 0x217   : > { %v3693_v24 = vpack.c.bf16 %v3630_v37, %v3629_v44  ;;  %v17160_v44 = vld [vmem:[#allocation269_spill] sm:$0xff]  ;;  %v17161_v37 = vld [vmem:[#allocation271_spill] sm:$0xff] }
 0x21a   : > { %8929 = vmatmul.mubr.msk.bf16.gmra.mrb[56].mxu1 %vm2265_vm3, %v13703_v54 }
 0x21b   : > { %8932 = vmatprep.mubr.msk.bf16.mxu1 %vm2265_vm3, %v13715_v51 }
 0x21d   : > { %9257 = vmatmul.mubr.msk.bf16.gmra.mrb[24].mxu0 %vm2265_vm3, %v13566_v27  ;;  %v10454_v27 = vld [vmem:[%s12691_s7 + $0x78] sm:$0xff]  }
 0x21e   : > { %9260 = vmatprep.mubr.msk.bf16.mxu0 %vm2265_vm3, %v13591_v31  ;;  %v5840_v31 = vmul.f32 0.0, %v17145_v29 }
 0x222   : > { %8933 = vmatmul.mubr.msk.bf16.gmra.mrb[60].mxu1 %vm2265_vm3, %v13719_v19 }
 0x223   : > { %8944 = vmatprep.mubr.msk.bf16.mxu1 %vm2265_vm3, %v3693_v24 }
 0x225   : > { %9261 = vmatmul.mubr.msk.bf16.gmra.mrb[28].mxu0 %vm2265_vm3, %v5856_v59  ;;  %v17162_v59 = vld [vmem:[#allocation252_spill] sm:$0xff] }
 0x226   : > { %9264 = vmatprep.mubr.msk.bf16.mxu0 %vm2265_vm3, %v13611_v60  ;;  %v17147_v60 = vld [vmem:[#allocation249_spill] sm:$0xff]  ;;  %v6376_v24 = vmul.f32 0.0, %v17162_v59 }
 0x22a   : > { %8945 = vmatmul.mubr.msk.bf16.vlgmr.msra.gmra.mrb[0].mxu1 %vm2265_vm3, %v17131_v18  ;;  %v17163_v18 = vld [vmem:[#allocation251_spill] sm:$0xff] }
 0x22b   : > { %9372 = vmatpush3.bf16.msra.mxu1 %v13764_v43  ;;  %8948 = vmatprep.mubr.msk.bf16.mxu1 %vm2265_vm3, %v17132_v62  ;;  %v17154_v43 = vld [vmem:[#allocation259_spill] sm:$0xff] }
 0x22c   : > { %9369 = vmatprep.subr.bf16.mxu1 %v10452_v63 }
 0x22d   : > { %9265 = vmatmul.mubr.msk.bf16.gmra.mrb[32].mxu0 %vm2265_vm3, %v13615_v25  ;;  %v3662_v25 = vmul.f32 0.0, %v17147_v60 }
 0x22e   : > { %9268 = vmatprep.mubr.msk.bf16.mxu0 %vm2265_vm3, %v13630_v28  ;;  %v17135_v28 = vld [vmem:[#allocation227_spill] sm:$0xff] }
 0x22f   : > { %9373 = vmatpush3.bf16.msra.mxu1 %v10452_v63  ;;  %v17164_v63 = vld [vmem:[#allocation254_spill] sm:$0xff] }
 0x230   : > { %9370 = vmatprep.subr.bf16.mxu1 %v10453_v57 }
 0x232   : > { %8949 = vmatmul.mubr.msk.bf16.gmra.mrb[4].mxu1 %vm2265_vm3, %v17133_v55 }
 0x233   : > { %8952 = vmatprep.mubr.msk.bf16.mxu1 %vm2265_vm3, %v17134_v39  ;;  %9374 = vmatpush3.bf16.msra.mxu1 %v10453_v57 }
 0x234   : > { %9371 = vmatprep.subr.bf16.mxu1 %v10454_v27 }
 0x235   : > { %9269 = vmatmul.mubr.msk.bf16.gmra.mrb[36].mxu0 %vm2265_vm3, %v13634_v26  ;;  %v17137_v26 = vld [vmem:[#allocation232_spill] sm:$0xff] }
 0x236   : > { %9272 = vmatprep.mubr.msk.bf16.mxu0 %vm2265_vm3, %v13650_v5  ;;  %v5872_v5 = vpack.c.bf16 %v5840_v31, %v5839_v35 }
 0x237   : > { %9375 = vmatpush3.bf16.msra.mxu1 %v10454_v27 }
 0x23a   : > { %8953 = vmatmul.mubr.msk.bf16.gmra.mrb[8].mxu1 %vm2265_vm3, %v17135_v28 }
 0x23b   : > { %8956 = vmatprep.mubr.msk.bf16.mxu1 %vm2265_vm3, %v17136_v3 }
 0x23d   : > { %9273 = vmatmul.mubr.msk.bf16.gmra.mrb[40].mxu0 %vm2265_vm3, %v13654_v40  ;;  %v17140_v40 = vld [vmem:[#allocation238_spill] sm:$0xff] }
 0x23e   : > { %9276 = vmatprep.mubr.msk.bf16.mxu0 %vm2265_vm3, %v13667_v52 }
 0x242   : > { %8957 = vmatmul.mubr.msk.bf16.gmra.mrb[12].mxu1 %vm2265_vm3, %v17137_v26 }
 0x243   : > { %8960 = vmatprep.mubr.msk.bf16.mxu1 %vm2265_vm3, %v17138_v50 }
 0x245   : > { %9277 = vmatmul.mubr.msk.bf16.gmra.mrb[44].mxu0 %vm2265_vm3, %v13671_v36  ;;  %v17148_v36 = vld [vmem:[#allocation248_spill] sm:$0xff] }
 0x246   : > { %9280 = vmatprep.mubr.msk.bf16.mxu0 %vm2265_vm3, %v13683_v22  ;;  %v17150_v22 = vld [vmem:[#allocation256_spill] sm:$0xff] }
 0x24a   : > { %8961 = vmatmul.mubr.msk.bf16.gmra.mrb[16].mxu1 %vm2265_vm3, %v17139_v48 }
 0x24b   : > { %8964 = vmatprep.mubr.msk.bf16.mxu1 %vm2265_vm3, %v17140_v40 }
 0x24d   : > { %9281 = vmatmul.mubr.msk.bf16.gmra.mrb[48].mxu0 %vm2265_vm3, %v13687_v46  ;;  %v17144_v46 = vld [vmem:[#allocation246_spill] sm:$0xff] }
 0x24e   : > { %9284 = vmatprep.mubr.msk.bf16.mxu0 %vm2265_vm3, %v13699_v58  ;;  %v17152_v58 = vld [vmem:[#allocation203_spill] sm:$0xff] }
 0x252   : > { %8965 = vmatmul.mubr.msk.bf16.gmra.mrb[20].mxu1 %vm2265_vm3, %v17141_v23 }
 0x253   : > { %8968 = vmatprep.mubr.msk.bf16.mxu1 %vm2265_vm3, %v17142_v4 }
 0x255   : > { %9285 = vmatmul.mubr.msk.bf16.gmra.mrb[52].mxu0 %vm2265_vm3, %v13703_v54  ;;  %v17146_v54 = vld [vmem:[#allocation250_spill] sm:$0xff] }
 0x256   : > { %9288 = vmatprep.mubr.msk.bf16.mxu0 %vm2265_vm3, %v13715_v51  ;;  %v3661_v9 = vmul.f32 0.0, %v17146_v54  ;;  %v17153_v51 = vld [vmem:[#allocation258_spill] sm:$0xff] }
 0x258   : > { %v3709_v52 = vpack.c.bf16 %v3662_v25, %v3661_v9 }
 0x25a   : > { %8969 = vmatmul.mubr.msk.bf16.gmra.mrb[24].mxu1 %vm2265_vm3, %v17143_v30 }
 0x25b   : > { %8972 = vmatprep.mubr.msk.bf16.mxu1 %vm2265_vm3, %v17144_v46 }
 0x25d   : > { %9289 = vmatmul.mubr.msk.bf16.gmra.mrb[56].mxu0 %vm2265_vm3, %v13719_v19  ;;  %v17149_v19 = vld [vmem:[#allocation255_spill] sm:$0xff] }
 0x25e   : > { %9292 = vmatprep.mubr.msk.bf16.mxu0 %vm2265_vm3, %v13735_v12  ;;  %v17151_v12 = vld [vmem:[#allocation257_spill] sm:$0xff] }
 0x262   : > { %8973 = vmatmul.mubr.msk.bf16.gmra.mrb[28].mxu1 %vm2265_vm3, %v17148_v36 }
 0x263   : > { %8976 = vmatprep.mubr.msk.bf16.mxu1 %vm2265_vm3, %v3709_v52  ;;  %v14146_v52 = vld [vmem:[%s14143_s11] ss:$0 sm:$0xff] }
 0x265   : > { %9293 = vmatmul.mubr.msk.bf16.gmra.mrb[60].mxu0 %vm2265_vm3, %v5872_v5 }
 0x266   : > { %9304 = vmatprep.mubr.msk.bf16.mxu0 %vm2265_vm3, %v17132_v62  ;;  %v6377_v62 = vmul.f32 0.0, %v17163_v18 }
 0x268   : > { %v6425_v57 = vpack.c.bf16 %v6377_v62, %v6376_v24 }
 0x26a   : > { %8977 = vmatmul.mubr.msk.bf16.gmra.mrb[32].mxu1 %vm2265_vm3, %v17149_v19 }
 0x26b   : > { %8980 = vmatprep.mubr.msk.bf16.mxu1 %vm2265_vm3, %v17150_v22 }
 0x26d   : > { %9305 = vmatmul.mubr.msk.bf16.vlgmr.msra.gmra.mrb[0].mxu0 %vm2265_vm3, %v17133_v55  ;;  %v17165_v55 = vld [vmem:[#allocation221_spill] sm:$0xff] }
 0x26e   : > { %9308 = vmatprep.mubr.msk.bf16.mxu0 %vm2265_vm3, %v17134_v39 }
 0x272   : > { %8981 = vmatmul.mubr.msk.bf16.gmra.mrb[36].mxu1 %vm2265_vm3, %v17151_v12 }
 0x273   : > { %8984 = vmatprep.mubr.msk.bf16.mxu1 %vm2265_vm3, %v17152_v58 }
 0x275   : > { %9309 = vmatmul.mubr.msk.bf16.gmra.mrb[4].mxu0 %vm2265_vm3, %v17135_v28 }
 0x276   : > { %9312 = vmatprep.mubr.msk.bf16.mxu0 %vm2265_vm3, %v17136_v3 }
 0x27a   : > { %8985 = vmatmul.mubr.msk.bf16.gmra.mrb[40].mxu1 %vm2265_vm3, %v17153_v51 }
 0x27b   : > { %8988 = vmatprep.mubr.msk.bf16.mxu1 %vm2265_vm3, %v17154_v43 }
 0x27d   : > { %9313 = vmatmul.mubr.msk.bf16.gmra.mrb[8].mxu0 %vm2265_vm3, %v17137_v26 }
 0x27e   : > { %9316 = vmatprep.mubr.msk.bf16.mxu0 %vm2265_vm3, %v17138_v50 }
 0x282   : > { %8989 = vmatmul.mubr.msk.bf16.gmra.mrb[44].mxu1 %vm2265_vm3, %v17155_v49 }
 0x283   : > { %8992 = vmatprep.mubr.msk.bf16.mxu1 %vm2265_vm3, %v17156_v8 }
 0x285   : > { %9317 = vmatmul.mubr.msk.bf16.gmra.mrb[12].mxu0 %vm2265_vm3, %v17139_v48 }
 0x286   : > { %9320 = vmatprep.mubr.msk.bf16.mxu0 %vm2265_vm3, %v17140_v40 }
 0x28a   : > { %8993 = vmatmul.mubr.msk.bf16.gmra.mrb[48].mxu1 %vm2265_vm3, %v17157_v20 }
 0x28b   : > { %8996 = vmatprep.mubr.msk.bf16.mxu1 %vm2265_vm3, %v17158_v32 }
 0x28d   : > { %9321 = vmatmul.mubr.msk.bf16.gmra.mrb[16].mxu0 %vm2265_vm3, %v17141_v23 }
 0x28e   : > { %9324 = vmatprep.mubr.msk.bf16.mxu0 %vm2265_vm3, %v17142_v4 }
 0x292   : > { %8997 = vmatmul.mubr.msk.bf16.gmra.mrb[52].mxu1 %vm2265_vm3, %v17159_v34 }
 0x293   : > { %9000 = vmatprep.mubr.msk.bf16.mxu1 %vm2265_vm3, %v17160_v44 }
 0x295   : > { %9325 = vmatmul.mubr.msk.bf16.gmra.mrb[20].mxu0 %vm2265_vm3, %v17143_v30 }
 0x296   : > { %9328 = vmatprep.mubr.msk.bf16.mxu0 %vm2265_vm3, %v17144_v46 }
 0x29a   : > { %9001 = vmatmul.mubr.msk.bf16.gmra.mrb[56].mxu1 %vm2265_vm3, %v17161_v37 }
 0x29b   : > { %9004 = vmatprep.mubr.msk.bf16.mxu1 %vm2265_vm3, %v13562_v17 }
 0x29d   : > { %9329 = vmatmul.mubr.msk.bf16.gmra.mrb[24].mxu0 %vm2265_vm3, %v17148_v36 }
 0x29e   : > { %9332 = vmatprep.mubr.msk.bf16.mxu0 %vm2265_vm3, %v17164_v63 }
 0x2a2   : > { %9005 = vmatmul.mubr.msk.bf16.gmra.mrb[60].mxu1 %vm2265_vm3, %v13568_v21 }
 0x2a3   : > { %9048 = vmatprep.mubr.msk.bf16.mxu1 %vm2265_vm3, %v17165_v55 }
 0x2a5   : > { %9333 = vmatmul.mubr.msk.bf16.gmra.mrb[28].mxu0 %vm2265_vm3, %v6425_v57 }
 0x2a6   : > { %9336 = vmatprep.mubr.msk.bf16.mxu0 %vm2265_vm3, %v17150_v22 }
 0x2aa   : > { %9049 = vmatmul.mubr.msk.bf16.vlgmr.msra.gmra.mrb[32].mxu1 %vm2265_vm3, %v17108_v33  ;;  %v17167_v33 = vld [vmem:[#allocation215_spill] sm:$0xff] }
 0x2ab   : > { %9052 = vmatprep.mubr.msk.bf16.mxu1 %vm2265_vm3, %v17109_v2  ;;  %v6409_v2 = vmul.f32 0.0, %v17167_v33 }
 0x2ad   : > { %9337 = vmatmul.mubr.msk.bf16.gmra.mrb[32].mxu0 %vm2265_vm3, %v17151_v12  ;;  %v14148_v12 = vstv %s1726_s8 }
 0x2ae   : > { %9340 = vmatprep.mubr.msk.bf16.mxu0 %vm2265_vm3, %v17152_v58 }
 0x2b2   : > { %9053 = vmatmul.mubr.msk.bf16.gmra.mrb[36].mxu1 %vm2265_vm3, %v17110_v1 }
 0x2b3   : > { %9056 = vmatprep.mubr.msk.bf16.mxu1 %vm2265_vm3, %v17111_v41 }
 0x2b5   : > { %9341 = vmatmul.mubr.msk.bf16.gmra.mrb[36].mxu0 %vm2265_vm3, %v17153_v51 }
 0x2b6   : > { %9344 = vmatprep.mubr.msk.bf16.mxu0 %vm2265_vm3, %v17154_v43 }
 0x2ba   : > { %9057 = vmatmul.mubr.msk.bf16.gmra.mrb[40].mxu1 %vm2265_vm3, %v17112_v47 }
 0x2bb   : > { %9060 = vmatprep.mubr.msk.bf16.mxu1 %vm2265_vm3, %v17113_v10 }
 0x2bd   : > { %9345 = vmatmul.mubr.msk.bf16.gmra.mrb[40].mxu0 %vm2265_vm3, %v17155_v49 }
 0x2be   : > { %9348 = vmatprep.mubr.msk.bf16.mxu0 %vm2265_vm3, %v17156_v8 }
 0x2c2   : > { %9061 = vmatmul.mubr.msk.bf16.gmra.mrb[44].mxu1 %vm2265_vm3, %v17114_v61 }
 0x2c3   : > { %9064 = vmatprep.mubr.msk.bf16.mxu1 %vm2265_vm3, %v17115_v11 }
 0x2c5   : > { %9349 = vmatmul.mubr.msk.bf16.gmra.mrb[44].mxu0 %vm2265_vm3, %v17157_v20 }
 0x2c6   : > { %9352 = vmatprep.mubr.msk.bf16.mxu0 %vm2265_vm3, %v17158_v32 }
 0x2ca   : > { %9065 = vmatmul.mubr.msk.bf16.gmra.mrb[48].mxu1 %vm2265_vm3, %v17116_v13 }
 0x2cb   : > { %9068 = vmatprep.mubr.msk.bf16.mxu1 %vm2265_vm3, %v17118_v56  ;;  %v17166_v56 = vld [vmem:[#allocation214_spill] sm:$0xff] }
 0x2cd   : > { %9353 = vmatmul.mubr.msk.bf16.gmra.mrb[48].mxu0 %vm2265_vm3, %v17159_v34 }
 0x2ce   : > { %9356 = vmatprep.mubr.msk.bf16.mxu0 %vm2265_vm3, %v17160_v44 }
 0x2d2   : > { %9069 = vmatmul.mubr.msk.bf16.gmra.mrb[52].mxu1 %vm2265_vm3, %v17120_v6  ;;  %v6408_v6 = vmul.f32 0.0, %v17166_v56 }
 0x2d3   : > { %9072 = vmatprep.mubr.msk.bf16.mxu1 %vm2265_vm3, %v17122_v45 }
 0x2d4   : > { %v6441_v45 = vpack.c.bf16 %v6409_v2, %v6408_v6 }
 0x2d5   : > { %9357 = vmatmul.mubr.msk.bf16.gmra.mrb[52].mxu0 %vm2265_vm3, %v17161_v37 }
 0x2d6   : > { %9360 = vmatprep.mubr.msk.bf16.mxu0 %vm2265_vm3, %v13562_v17 }
 0x2da   : > { %9073 = vmatmul.mubr.msk.bf16.gmra.mrb[56].mxu1 %vm2265_vm3, %v17124_v15 }
 0x2db   : > { %9076 = vmatprep.mubr.msk.bf16.mxu1 %vm2265_vm3, %v17126_v38 }
 0x2dd   : > { %9361 = vmatmul.mubr.msk.bf16.gmra.mrb[56].mxu0 %vm2265_vm3, %v13568_v21 }
 0x2de   : > { %9364 = vmatprep.mubr.msk.bf16.mxu0 %vm2265_vm3, %v13595_v0 }
 0x2e2   : > { %9077 = vmatmul.mubr.msk.bf16.gmra.mrb[60].mxu1 %vm2265_vm3, %v17127_v53 }
 0x2e5   : > { %9365 = vmatmul.mubr.msk.bf16.gmra.mrb[60].mxu0 %vm2265_vm3, %v6441_v45 }
 0x2fd   : > { %v8946_v15 = vpop.f32.mrb[0].mxu1 }
 0x2fe   : > { %v3879_v17 = vpop.f32.mrb[1].mxu1 }
 0x2ff   : > { %v8947_v1 = vpop.f32.mrb[2].mxu1 }
 0x300   : > { %v3882_v21 = vpop.f32.mrb[3].mxu1 }
 0x305   : > { %v8950_v41 = vpop.f32.mrb[4].mxu1 }
 0x306   : > { %v14084_v47 = vpop.f32.mrb[5].mxu1 }
 0x307   : > { %v14086_v38 = vpop.f32.mrb[6].mxu1 }
 0x308   : > { %v14088_v10 = vpop.f32.mrb[7].mxu1 }
 0x30d   : > { %v14090_v61 = vpop.f32.mrb[8].mxu1 }
 0x30e   : > { %v14092_v0 = vpop.f32.mrb[9].mxu1 }
 0x30f   : > { %v14094_v11 = vpop.f32.mrb[10].mxu1 }
 0x310   : > { %v14096_v53 = vpop.f32.mrb[11].mxu1 }
 0x315   : > { %v14098_v13 = vpop.f32.mrb[12].mxu1 }
 0x316   : > { %v14100_v39 = vpop.f32.mrb[13].mxu1 }
 0x317   : > { %v14102_v27 = vpop.f32.mrb[14].mxu1 }
 0x318   : > { %v14104_v28 = vpop.f32.mrb[15].mxu1 }
 0x31d   : > { %v14106_v3 = vpop.f32.mrb[16].mxu1 }
 0x31e   : > { %v14108_v26 = vpop.f32.mrb[17].mxu1 }
 0x31f   : > { %v14110_v50 = vpop.f32.mrb[18].mxu1 }
 0x320   : > { %v14112_v48 = vpop.f32.mrb[19].mxu1 }
 0x325   : > { %v14114_v40 = vpop.f32.mrb[20].mxu1 }
 0x326   : > { %v14116_v23 = vpop.f32.mrb[21].mxu1 }
 0x327   : > { %v14118_v4 = vpop.f32.mrb[22].mxu1 }
 0x328   : > { %v14120_v30 = vpop.f32.mrb[23].mxu1 }
 0x32d   : > { %v14122_v46 = vpop.f32.mrb[24].mxu1 }
 0x32e   : > { %v14124_v35 = vpop.f32.mrb[25].mxu1 }
 0x32f   : > { %v14126_v31 = vpop.f32.mrb[26].mxu1 }
 0x330   : > { %v14128_v54 = vpop.f32.mrb[27].mxu1 }
 0x335   : > { %v14130_v9 = vpop.f32.mrb[28].mxu1 }
 0x336   : > { %v14132_v60 = vpop.f32.mrb[29].mxu1 }
 0x337   : > { %v14134_v25 = vpop.f32.mrb[30].mxu1 }
 0x338   : > { %v14136_v5 = vpop.f32.mrb[31].mxu1 }
 0x340   : > { %v9306_v36 = vpop.f32.mrb[0].mxu0 }
 0x341   : > { %v9376_v19 = vadd.f32 %v9306_v36, %v8946_v15  ;;  %v6596_v22 = vpop.f32.mrb[1].mxu0 }
 0x342   : > { %v9377_v58 = vadd.f32 %v6596_v22, %v3879_v17  ;;  %v9307_v51 = vpop.f32.mrb[2].mxu0 }
 0x343   : > { %v6923_v43 = vadd.f32 %v9376_v19, %v14146_v52  ;;  %v9378_v49 = vadd.f32 %v9307_v51, %v8947_v1  ;;  %v6599_v8 = vpop.f32.mrb[3].mxu0 }
 0x344   : > { %v6921_v20 = vadd.f32 %v9377_v58, %v14146_v52  ;;  %v9379_v32 = vadd.f32 %v6599_v8, %v3882_v21 }
 0x345   : > { %vm6987_vm5 = vcmp.ge.f32.partialorder %v6923_v43, 0.0  ;;  %v7052_v34 = vmul.f32 %v14148_v12, %v6923_v43  ;;  %v6924_v44 = vadd.f32 %v9378_v49, %v14146_v52 }
 0x346   : > { %vm6985_vm13 = vcmp.ge.f32.partialorder %v6921_v20, 0.0  ;;  %v7050_v37 = vmul.f32 %v14148_v12, %v6921_v20  ;;  %v6922_v59 = vadd.f32 %v9379_v32, %v14146_v52 }
 0x347   : > { %v14156_v24 = vsel %vm6987_vm5, %v6923_v43, %v7052_v34  ;;  %vm6988_vm15 = vcmp.ge.f32.partialorder %v6924_v44, 0.0  ;;  %v7053_v18 = vmul.f32 %v14148_v12, %v6924_v44 }
 0x348   : > { %v7313_v62 = vmul.f32 %v14156_v24, %v14156_v24  ;;  %v14161_v63 = vsel %vm6985_vm13, %v6921_v20, %v7050_v37  ;;  %vm6986_vm6 = vcmp.ge.f32.partialorder %v6922_v59, 0.0  ;;  %v9310_v57 = vpop.f32.mrb[4].mxu0  ;;  %v7181_v55 = vsel %vm2265_vm3, %v14156_v24, 0.0 }
 0x349   : > { %v14165_v56 = vsel %vm6988_vm15, %v6924_v44, %v7053_v18  ;;  %v7051_v6 = vmul.f32 %v14148_v12, %v6922_v59  ;;  %v6612_v33 = vpop.f32.mrb[5].mxu0  ;;  %v7178_v45 = vsel %vm2265_vm3, %v14161_v63, 0.0  ;;  %v7311_v15 = vmul.f32 %v14161_v63, %v14161_v63 }
 0x34a   : > { %v7378_v2 = vsel %vm2265_vm3, %v7313_v62, 0.0  ;;  %v9380_v17 = vadd.f32 %v9310_v57, %v8950_v41  ;;  %v9311_v1 = vpop.f32.mrb[6].mxu0  ;;  %v7183_v21 = vsel %vm2265_vm3, %v14165_v56, 0.0  ;;  %v9381_v19 = vadd.f32 %v6612_v33, %v14084_v47 }
 0x34b   : > { %v14175_v36 = vsel %vm6986_vm6, %v6922_v59, %v7051_v6  ;;  %v9382_v22 = vadd.f32 %v9311_v1, %v14086_v38  ;;  %v6615_v58 = vpop.f32.mrb[7].mxu0  ;;  %v7314_v51 = vmul.f32 %v14165_v56, %v14165_v56  ;;  %v7375_v38 = vsel %vm2265_vm3, %v7311_v15, 0.0 }
 0x34c   : > { %v7179_v43 = vsel %vm2265_vm3, %v14175_v36, 0.0  ;;  %v7312_v41 = vmul.f32 %v14175_v36, %v14175_v36  ;;  %v6927_v49 = vadd.f32 %v9380_v17, %v14146_v52  ;;  %v6925_v20 = vadd.f32 %v9381_v19, %v14146_v52 }
 0x34d   : > { %v7180_v8 = vadd.f32 %v7179_v43, %v7178_v45  ;;  %v6928_v32 = vadd.f32 %v9382_v22, %v14146_v52  ;;  %v9383_v47 = vadd.f32 %v6615_v58, %v14088_v10  ;;  %v7380_v33 = vsel %vm2265_vm3, %v7314_v51, 0.0 }
 0x34e   : > { %v7376_v34 = vsel %vm2265_vm3, %v7312_v41, 0.0  ;;  %vm6991_vm7 = vcmp.ge.f32.partialorder %v6927_v49, 0.0  ;;  %v7056_v44 = vmul.f32 %v14148_v12, %v6927_v49  ;;  %vm6989_vm8 = vcmp.ge.f32.partialorder %v6925_v20, 0.0 }
 0x34f   : > { %v7182_v37 = vadd.f32 %v7181_v55, %v7180_v8  ;;  %v7377_v59 = vadd.f32 %v7376_v34, %v7375_v38  ;;  %v7054_v18 = vmul.f32 %v14148_v12, %v6925_v20  ;;  %vm6992_vm9 = vcmp.ge.f32.partialorder %v6928_v32, 0.0 }
 0x350   : > { %v14193_v62 = vsel %vm6991_vm7, %v6927_v49, %v7056_v44  ;;  %v7057_v57 = vmul.f32 %v14148_v12, %v6928_v32  ;;  %v6926_v6 = vadd.f32 %v9383_v47, %v14146_v52  ;;  %v9314_v10 = vpop.f32.mrb[8].mxu0 }
 0x351   : > { %v7379_v45 = vadd.f32 %v7378_v2, %v7377_v59  ;;  %v7317_v15 = vmul.f32 %v14193_v62, %v14193_v62  ;;  %v14200_v17 = vsel %vm6989_vm8, %v6925_v20, %v7054_v18  ;;  %v6628_v55 = vpop.f32.mrb[9].mxu0  ;;  %v7184_v1 = vadd.f32 %v7183_v21, %v7182_v37 }
 0x352   : > { %v7185_v19 = vsel %vm2265_vm3, %v14200_v17, 0.0  ;;  %v7315_v22 = vmul.f32 %v14200_v17, %v14200_v17  ;;  %v14206_v58 = vsel %vm6992_vm9, %v6928_v32, %v7057_v57  ;;  %v9315_v43 = vpop.f32.mrb[10].mxu0  ;;  %v7189_v51 = vsel %vm2265_vm3, %v14193_v62, 0.0 }
 0x353   : > { %v7381_v2 = vadd.f32 %v7380_v33, %v7379_v45  ;;  %v6631_v41 = vpop.f32.mrb[11].mxu0  ;;  %v7186_v49 = vadd.f32 %v7185_v19, %v7184_v1  ;;  %vm6990_vm0 = vcmp.ge.f32.partialorder %v6926_v6, 0.0  ;;  %v7055_v21 = vmul.f32 %v14148_v12, %v6926_v6 }
 0x354   : > { %v7382_v8 = vsel %vm2265_vm3, %v7315_v22, 0.0  ;;  %v7386_v20 = vsel %vm2265_vm3, %v7317_v15, 0.0  ;;  %v7318_v47 = vmul.f32 %v14206_v58, %v14206_v58  ;;  %v9384_v32 = vadd.f32 %v9314_v10, %v14090_v61 }
 0x355   : > { %v9385_v38 = vadd.f32 %v6628_v55, %v14092_v0  ;;  %v7383_v34 = vadd.f32 %v7382_v8, %v7381_v2  ;;  %v14217_v44 = vsel %vm6990_vm0, %v6926_v6, %v7055_v21  ;;  %v9386_v37 = vadd.f32 %v9315_v43, %v14094_v11 }
 0x356   : > { %v9387_v59 = vadd.f32 %v6631_v41, %v14096_v53  ;;  %v7187_v18 = vsel %vm2265_vm3, %v14217_v44, 0.0  ;;  %v7316_v57 = vmul.f32 %v14217_v44, %v14217_v44  ;;  %v6931_v33 = vadd.f32 %v9384_v32, %v14146_v52 }
 0x357   : > { %v6929_v45 = vadd.f32 %v9385_v38, %v14146_v52  ;;  %v7191_v61 = vsel %vm2265_vm3, %v14206_v58, 0.0  ;;  %v7188_v0 = vadd.f32 %v7187_v18, %v7186_v49  ;;  %v6932_v6 = vadd.f32 %v9386_v37, %v14146_v52 }
 0x358   : > { %v6930_v11 = vadd.f32 %v9387_v59, %v14146_v52  ;;  %v9318_v10 = vpop.f32.mrb[12].mxu0  ;;  %v7384_v53 = vsel %vm2265_vm3, %v7316_v57, 0.0  ;;  %vm6995_vm1 = vcmp.ge.f32.partialorder %v6931_v33, 0.0  ;;  %v7060_v15 = vmul.f32 %v14148_v12, %v6931_v33 }
 0x359   : > { %vm6993_vm14 = vcmp.ge.f32.partialorder %v6929_v45, 0.0  ;;  %v6644_v55 = vpop.f32.mrb[13].mxu0  ;;  %v7190_v1 = vadd.f32 %v7189_v51, %v7188_v0  ;;  %v7385_v19 = vadd.f32 %v7384_v53, %v7383_v34  ;;  %v7058_v22 = vmul.f32 %v14148_v12, %v6929_v45 }
 0x35a   : > { %vm6996_vm10 = vcmp.ge.f32.partialorder %v6932_v6, 0.0  ;;  %v9319_v43 = vpop.f32.mrb[14].mxu0  ;;  %v7388_v2 = vsel %vm2265_vm3, %v7318_v47, 0.0  ;;  %v14235_v41 = vsel %vm6995_vm1, %v6931_v33, %v7060_v15  ;;  %v7061_v49 = vmul.f32 %v14148_v12, %v6932_v6 }
 0x35b   : > { %v7059_v8 = vmul.f32 %v14148_v12, %v6930_v11  ;;  %v6647_v21 = vpop.f32.mrb[15].mxu0  ;;  %v7387_v32 = vadd.f32 %v7386_v20, %v7385_v19  ;;  %v7321_v38 = vmul.f32 %v14235_v41, %v14235_v41  ;;  %v14241_v37 = vsel %vm6993_vm14, %v6929_v45, %v7058_v22 }
 0x35c   : > { %vm6994_vm11 = vcmp.ge.f32.partialorder %v6930_v11, 0.0  ;;  %v7192_v51 = vadd.f32 %v7191_v61, %v7190_v1  ;;  %v7193_v34 = vsel %vm2265_vm3, %v14241_v37, 0.0  ;;  %v7319_v47 = vmul.f32 %v14241_v37, %v14241_v37 }
 0x35d   : > { %v14247_v59 = vsel %vm6996_vm10, %v6932_v6, %v7061_v49  ;;  %v7197_v18 = vsel %vm2265_vm3, %v14235_v41, 0.0  ;;  %v7394_v20 = vsel %vm2265_vm3, %v7321_v38, 0.0  ;;  %v7389_v57 = vadd.f32 %v7388_v2, %v7387_v32 }
 0x35e   : > { %v7194_v33 = vadd.f32 %v7193_v34, %v7192_v51  ;;  %v7390_v45 = vsel %vm2265_vm3, %v7319_v47, 0.0  ;;  %v14253_v0 = vsel %vm6994_vm11, %v6930_v11, %v7059_v8  ;;  %v9388_v61 = vadd.f32 %v9318_v10, %v14098_v13 }
 0x35f   : > { %v7391_v53 = vadd.f32 %v7390_v45, %v7389_v57  ;;  %v7322_v15 = vmul.f32 %v14247_v59, %v14247_v59  ;;  %v7195_v6 = vsel %vm2265_vm3, %v14253_v0, 0.0  ;;  %v7320_v1 = vmul.f32 %v14253_v0, %v14253_v0 }
 0x360   : > { %v9322_v19 = vpop.f32.mrb[16].mxu0  ;;  %v7196_v22 = vadd.f32 %v7195_v6, %v7194_v33  ;;  %v6935_v2 = vadd.f32 %v9388_v61, %v14146_v52  ;;  %v9389_v49 = vadd.f32 %v6644_v55, %v14100_v39  ;;  %v9390_v11 = vadd.f32 %v9319_v43, %v14102_v27 }
 0x361   : > { %v6660_v8 = vpop.f32.mrb[17].mxu0  ;;  %v7392_v13 = vsel %vm2265_vm3, %v7320_v1, 0.0  ;;  %v9391_v10 = vadd.f32 %v6647_v21, %v14104_v28  ;;  %v9392_v32 = vadd.f32 %v9322_v19, %v14106_v3  ;;  %v7199_v28 = vsel %vm2265_vm3, %v14247_v59, 0.0 }
 0x362   : > { %v9393_v38 = vadd.f32 %v6660_v8, %v14108_v26  ;;  %v9323_v51 = vpop.f32.mrb[18].mxu0  ;;  %v7198_v34 = vadd.f32 %v7197_v18, %v7196_v22  ;;  %v7393_v47 = vadd.f32 %v7392_v13, %v7391_v53  ;;  %vm6999_vm12 = vcmp.ge.f32.partialorder %v6935_v2, 0.0 }
 0x363   : > { %v7064_v57 = vmul.f32 %v14148_v12, %v6935_v2  ;;  %v6663_v33 = vpop.f32.mrb[19].mxu0  ;;  %v6933_v39 = vadd.f32 %v9389_v49, %v14146_v52  ;;  %v6936_v27 = vadd.f32 %v9390_v11, %v14146_v52  ;;  %v6934_v55 = vadd.f32 %v9391_v10, %v14146_v52 }
 0x364   : > { %v6939_v43 = vadd.f32 %v9392_v32, %v14146_v52  ;;  %v7396_v3 = vsel %vm2265_vm3, %v7322_v15, 0.0  ;;  %v7395_v26 = vadd.f32 %v7394_v20, %v7393_v47  ;;  %v7200_v45 = vadd.f32 %v7199_v28, %v7198_v34 }
 0x365   : > { %v14277_v21 = vsel %vm6999_vm12, %v6935_v2, %v7064_v57  ;;  %vm6997_vm2 = vcmp.ge.f32.partialorder %v6933_v39, 0.0  ;;  %v7062_v18 = vmul.f32 %v14148_v12, %v6933_v39  ;;  %v6937_v61 = vadd.f32 %v9393_v38, %v14146_v52 }
 0x366   : > { %17168 = vst [vmem:[#allocation199_spill] sm:$0xff] %v14277_v21  ;;  %v7325_v53 = vmul.f32 %v14277_v21, %v14277_v21  ;;  %vm7000_vm4 = vcmp.ge.f32.partialorder %v6936_v27, 0.0  ;;  %v7065_v6 = vmul.f32 %v14148_v12, %v6936_v27  ;;  %vm6998_vm5 = vcmp.ge.f32.partialorder %v6934_v55, 0.0 }
 0x367   : > { %v14284_v1 = vsel %vm6997_vm2, %v6933_v39, %v7062_v18  ;;  %v7397_v19 = vadd.f32 %v7396_v3, %v7395_v26  ;;  %v7063_v20 = vmul.f32 %v14148_v12, %v6934_v55  ;;  %vm7003_vm13 = vcmp.ge.f32.partialorder %v6939_v43, 0.0 }
 0x368   : > { %v9326_v15 = vpop.f32.mrb[20].mxu0  ;;  %v7201_v22 = vsel %vm2265_vm3, %v14284_v1, 0.0  ;;  %v7323_v2 = vmul.f32 %v14284_v1, %v14284_v1  ;;  %v14291_v49 = vsel %vm7000_vm4, %v6936_v27, %v7065_v6  ;;  %v7068_v11 = vmul.f32 %v14148_v12, %v6939_v43 }
 0x369   : > { %17169 = vst [vmem:[#allocation200_spill] sm:$0xff] %v14291_v49  ;;  %v6676_v8 = vpop.f32.mrb[21].mxu0  ;;  %v7205_v13 = vsel %vm2265_vm3, %v14277_v21, 0.0  ;;  %v7202_v10 = vadd.f32 %v7201_v22, %v7200_v45  ;;  %v7326_v32 = vmul.f32 %v14291_v49, %v14291_v49  ;;  %v14298_v38 = vsel %vm6998_vm5, %v6934_v55, %v7063_v20 }
 0x36a   : > { %17170 = vst [vmem:[#allocation230_spill] sm:$0xff] %v14298_v38  ;;  %v9327_v34 = vpop.f32.mrb[22].mxu0  ;;  %v7402_v47 = vsel %vm2265_vm3, %v7325_v53, 0.0  ;;  %v7398_v57 = vsel %vm2265_vm3, %v7323_v2, 0.0  ;;  %v7203_v39 = vsel %vm2265_vm3, %v14298_v38, 0.0  ;;  %v7324_v27 = vmul.f32 %v14298_v38, %v14298_v38 }
 0x36b   : > { %v14306_v28 = vpop.f32.mrb[23].mxu0  ;;  %v7399_v3 = vadd.f32 %v7398_v57, %v7397_v19  ;;  %v7207_v26 = vsel %vm2265_vm3, %v14291_v49, 0.0  ;;  %v7204_v18 = vadd.f32 %v7203_v39, %v7202_v10  ;;  %v14311_v55 = vsel %vm7003_vm13, %v6939_v43, %v7068_v11 }
 0x36c   : > { %17171 = vst [vmem:[#allocation201_spill] sm:$0xff] %v14311_v55  ;;  %v7404_v45 = vsel %vm2265_vm3, %v7326_v32, 0.0  ;;  %v7400_v53 = vsel %vm2265_vm3, %v7324_v27, 0.0  ;;  %vm7001_vm15 = vcmp.ge.f32.partialorder %v6937_v61, 0.0  ;;  %v7066_v6 = vmul.f32 %v14148_v12, %v6937_v61 }
 0x36d   : > { %v7206_v20 = vadd.f32 %v7205_v13, %v7204_v18  ;;  %v7401_v22 = vadd.f32 %v7400_v53, %v7399_v3  ;;  %v9394_v2 = vadd.f32 %v9323_v51, %v14110_v50  ;;  %v9395_v19 = vadd.f32 %v6663_v33, %v14112_v48 }
 0x36e   : > { %v7329_v57 = vmul.f32 %v14311_v55, %v14311_v55  ;;  %v14320_v10 = vsel %vm7001_vm15, %v6937_v61, %v7066_v6  ;;  %v9396_v43 = vadd.f32 %v9326_v15, %v14114_v40  ;;  %v9397_v11 = vadd.f32 %v6676_v8, %v14116_v23 }
 0x36f   : > { %17172 = vst [vmem:[#allocation202_spill] sm:$0xff] %v14320_v10  ;;  %v7403_v32 = vadd.f32 %v7402_v47, %v7401_v22  ;;  %v7208_v39 = vadd.f32 %v7207_v26, %v7206_v20  ;;  %v7209_v27 = vsel %vm2265_vm3, %v14320_v10, 0.0  ;;  %v7327_v13 = vmul.f32 %v14320_v10, %v14320_v10 }
 0x370   : > { %v9330_v50 = vpop.f32.mrb[24].mxu0  ;;  %v6940_v48 = vadd.f32 %v9394_v2, %v14146_v52  ;;  %v6938_v51 = vadd.f32 %v9395_v19, %v14146_v52  ;;  %v6943_v33 = vadd.f32 %v9396_v43, %v14146_v52  ;;  %v6941_v61 = vadd.f32 %v9397_v11, %v14146_v52 }
 0x371   : > { %v6692_v40 = vpop.f32.mrb[25].mxu0  ;;  %v7210_v15 = vadd.f32 %v7209_v27, %v7208_v39  ;;  %v7405_v23 = vadd.f32 %v7404_v45, %v7403_v32  ;;  %v7406_v8 = vsel %vm2265_vm3, %v7327_v13, 0.0  ;;  %v9398_v47 = vadd.f32 %v9327_v34, %v14118_v4 }
 0x372   : > { %v9331_v3 = vpop.f32.mrb[26].mxu0  ;;  %vm7004_vm6 = vcmp.ge.f32.partialorder %v6940_v48, 0.0  ;;  %v7069_v26 = vmul.f32 %v14148_v12, %v6940_v48  ;;  %vm7002_vm7 = vcmp.ge.f32.partialorder %v6938_v51, 0.0  ;;  %v7067_v18 = vmul.f32 %v14148_v12, %v6938_v51 }
 0x373   : > { %v6695_v53 = vpop.f32.mrb[27].mxu0  ;;  %v7407_v6 = vadd.f32 %v7406_v8, %v7405_v23  ;;  %vm7007_vm8 = vcmp.ge.f32.partialorder %v6943_v33, 0.0  ;;  %v7072_v20 = vmul.f32 %v14148_v12, %v6943_v33  ;;  %vm7005_vm9 = vcmp.ge.f32.partialorder %v6941_v61, 0.0 }
 0x374   : > { %v14337_v22 = vsel %vm7004_vm6, %v6940_v48, %v7069_v26  ;;  %v14339_v45 = vsel %vm7002_vm7, %v6938_v51, %v7067_v18  ;;  %v7070_v2 = vmul.f32 %v14148_v12, %v6941_v61  ;;  %v6944_v4 = vadd.f32 %v9398_v47, %v14146_v52 }
 0x375   : > { %17173 = vst [vmem:[#allocation204_spill] sm:$0xff] %v14337_v22  ;;  %17174 = vst [vmem:[#allocation205_spill] sm:$0xff] %v14339_v45  ;;  %v7213_v34 = vsel %vm2265_vm3, %v14311_v55, 0.0  ;;  %v7330_v19 = vmul.f32 %v14337_v22, %v14337_v22  ;;  %v7211_v43 = vsel %vm2265_vm3, %v14339_v45, 0.0  ;;  %v7328_v11 = vmul.f32 %v14339_v45, %v14339_v45 }
 0x376   : > { %v7410_v32 = vsel %vm2265_vm3, %v7329_v57, 0.0  ;;  %v7212_v39 = vadd.f32 %v7211_v43, %v7210_v15  ;;  %v14352_v27 = vsel %vm7007_vm8, %v6943_v33, %v7072_v20  ;;  %v14354_v13 = vsel %vm7005_vm9, %v6941_v61, %v7070_v2 }
 0x377   : > { %17175 = vst [vmem:[#allocation206_spill] sm:$0xff] %v14352_v27  ;;  %17176 = vst [vmem:[#allocation207_spill] sm:$0xff] %v14354_v13  ;;  %v7215_v48 = vsel %vm2265_vm3, %v14337_v22, 0.0  ;;  %v7412_v51 = vsel %vm2265_vm3, %v7330_v19, 0.0  ;;  %v7408_v23 = vsel %vm2265_vm3, %v7328_v11, 0.0  ;;  %vm7008_vm0 = vcmp.ge.f32.partialorder %v6944_v4, 0.0 }
 0x378   : > { %v9334_v8 = vpop.f32.mrb[28].mxu0  ;;  %v7214_v47 = vadd.f32 %v7213_v34, %v7212_v39  ;;  %v7409_v26 = vadd.f32 %v7408_v23, %v7407_v6  ;;  %v7333_v18 = vmul.f32 %v14352_v27, %v14352_v27  ;;  %v7331_v57 = vmul.f32 %v14354_v13, %v14354_v13 }
 0x379   : > { %v14364_v33 = vpop.f32.mrb[29].mxu0  ;;  %v7217_v61 = vsel %vm2265_vm3, %v14354_v13, 0.0  ;;  %v7073_v15 = vmul.f32 %v14148_v12, %v6944_v4  ;;  %v9399_v20 = vadd.f32 %v14306_v28, %v14120_v30  ;;  %v9400_v2 = vadd.f32 %v9330_v50, %v14122_v46 }
 0x37a   : > { %v14372_v34 = vpop.f32.mrb[30].mxu0  ;;  %v7411_v6 = vadd.f32 %v7410_v32, %v7409_v26  ;;  %v7216_v19 = vadd.f32 %v7215_v48, %v7214_v47  ;;  %v7414_v43 = vsel %vm2265_vm3, %v7331_v57, 0.0  ;;  %v9401_v11 = vadd.f32 %v6692_v40, %v14124_v35 }
 0x37b   : > { %v14376_v39 = vpop.f32.mrb[31].mxu0  ;;  %v14379_v23 = vsel %vm7008_vm0, %v6944_v4, %v7073_v15  ;;  %v6942_v16 = vadd.f32 %v9399_v20, %v14146_v52  ;;  %v6947_v14 = vadd.f32 %v9400_v2, %v14146_v52  ;;  %v9402_v30 = vadd.f32 %v9331_v3, %v14126_v31 }
 0x37c   : > { %17177 = vst [vmem:[#allocation208_spill] sm:$0xff] %v14379_v23  ;;  %v7221_v46 = vsel %vm2265_vm3, %v14352_v27, 0.0  ;;  %v7218_v28 = vadd.f32 %v7217_v61, %v7216_v19  ;;  %v7413_v50 = vadd.f32 %v7412_v51, %v7411_v6  ;;  %v7334_v32 = vmul.f32 %v14379_v23, %v14379_v23 }
 0x37d   : > { %vm7006_vm1 = vcmp.ge.f32.partialorder %v6942_v16, 0.0  ;;  %v7071_v35 = vmul.f32 %v14148_v12, %v6942_v16  ;;  %vm7011_vm14 = vcmp.ge.f32.partialorder %v6947_v14, 0.0  ;;  %v7076_v40 = vmul.f32 %v14148_v12, %v6947_v14  ;;  %v14393_v3 = vpop.f32.mrb[32].mxu1 }
 0x37e   : > { %v7418_v4 = vsel %vm2265_vm3, %v7333_v18, 0.0  ;;  %v7415_v48 = vadd.f32 %v7414_v43, %v7413_v50  ;;  %v6945_v47 = vadd.f32 %v9401_v11, %v14146_v52  ;;  %v6948_v31 = vadd.f32 %v9402_v30, %v14146_v52  ;;  %v4512_v20 = vpop.f32.mrb[33].mxu1 }
 0x37f   : > { %v14395_v26 = vsel %vm7006_vm1, %v6942_v16, %v7071_v35  ;;  %v14397_v51 = vsel %vm7011_vm14, %v6947_v14, %v7076_v40  ;;  %v9403_v57 = vadd.f32 %v6695_v53, %v14128_v54  ;;  %v9404_v61 = vadd.f32 %v9334_v8, %v14130_v9  ;;  %v14408_v14 = vpop.f32.mrb[34].mxu1 }
 0x380   : > { %17178 = vst [vmem:[#allocation209_spill] sm:$0xff] %v14395_v26  ;;  %17179 = vst [vmem:[#allocation210_spill] sm:$0xff] %v14397_v51  ;;  %v9338_v15 = vpop.f32.mrb[32].mxu0  ;;  %v7223_v18 = vsel %vm2265_vm3, %v14379_v23, 0.0  ;;  %v7420_v2 = vsel %vm2265_vm3, %v7334_v32, 0.0  ;;  %v7219_v6 = vsel %vm2265_vm3, %v14395_v26, 0.0  ;;  %v7332_v16 = vmul.f32 %v14395_v26, %v14395_v26 }
 0x381   : > { %v6724_v19 = vpop.f32.mrb[33].mxu0  ;;  %v7220_v43 = vadd.f32 %v7219_v6, %v7218_v28  ;;  %vm7009_vm10 = vcmp.ge.f32.partialorder %v6945_v47, 0.0  ;;  %v7074_v54 = vmul.f32 %v14148_v12, %v6945_v47  ;;  %vm7012_vm11 = vcmp.ge.f32.partialorder %v6948_v31, 0.0  ;;  %v14413_v53 = vpop.f32.mrb[35].mxu1 }
 0x382   : > { %v14411_v9 = vpop.f32.mrb[34].mxu0  ;;  %v7416_v8 = vsel %vm2265_vm3, %v7332_v16, 0.0  ;;  %v7337_v11 = vmul.f32 %v14397_v51, %v14397_v51  ;;  %v7077_v30 = vmul.f32 %v14148_v12, %v6948_v31  ;;  %v6946_v50 = vadd.f32 %v9403_v57, %v14146_v52 }
 0x383   : > { %v14420_v32 = vpop.f32.mrb[35].mxu0  ;;  %v7222_v28 = vadd.f32 %v7221_v46, %v7220_v43  ;;  %v7417_v35 = vadd.f32 %v7416_v8, %v7415_v48  ;;  %v14422_v40 = vsel %vm7009_vm10, %v6945_v47, %v7074_v54  ;;  %v6951_v6 = vadd.f32 %v9404_v61, %v14146_v52 }
 0x384   : > { %17180 = vst [vmem:[#allocation211_spill] sm:$0xff] %v14422_v40  ;;  %v7229_v42 = vsel %vm2265_vm3, %v14397_v51, 0.0  ;;  %v7225_v16 = vsel %vm2265_vm3, %v14422_v40, 0.0  ;;  %v7335_v29 = vmul.f32 %v14422_v40, %v14422_v40  ;;  %v14431_v7 = vsel %vm7012_vm11, %v6948_v31, %v7077_v30 }
 0x385   : > { %17181 = vst [vmem:[#allocation212_spill] sm:$0xff] %v14431_v7  ;;  %v7419_v57 = vadd.f32 %v7418_v4, %v7417_v35  ;;  %v7224_v23 = vadd.f32 %v7223_v18, %v7222_v28  ;;  %v7338_v46 = vmul.f32 %v14431_v7, %v14431_v7  ;;  %vm7010_vm12 = vcmp.ge.f32.partialorder %v6946_v50, 0.0  ;;  %v14438_v43 = vpop.f32.mrb[36].mxu1 }
 0x386   : > { %v7422_v48 = vsel %vm2265_vm3, %v7335_v29, 0.0  ;;  %v7075_v47 = vmul.f32 %v14148_v12, %v6946_v50  ;;  %vm7015_vm2 = vcmp.ge.f32.partialorder %v6951_v6, 0.0  ;;  %v7080_v61 = vmul.f32 %v14148_v12, %v6951_v6  ;;  %v14445_v30 = vpop.f32.mrb[37].mxu1 }
 0x387   : > { %v7426_v54 = vsel %vm2265_vm3, %v7337_v11, 0.0  ;;  %v7226_v8 = vadd.f32 %v7225_v16, %v7224_v23  ;;  %v7421_v31 = vadd.f32 %v7420_v2, %v7419_v57  ;;  %v9405_v4 = vadd.f32 %v14364_v33, %v14132_v60  ;;  %v14457_v2 = vpop.f32.mrb[38].mxu1 }
 0x388   : > { %v14443_v18 = vpop.f32.mrb[36].mxu0  ;;  %v7231_v29 = vsel %vm2265_vm3, %v14431_v7, 0.0  ;;  %v14449_v28 = vsel %vm7010_vm12, %v6946_v50, %v7075_v47  ;;  %v9406_v35 = vadd.f32 %v14372_v34, %v14134_v25  ;;  %v9407_v11 = vadd.f32 %v14376_v39, %v14136_v5  ;;  %v14468_v25 = vpop.f32.mrb[39].mxu1 }
 0x389   : > { %17182 = vst [vmem:[#allocation213_spill] sm:$0xff] %v14449_v28  ;;  %v14455_v23 = vpop.f32.mrb[37].mxu0  ;;  %v7423_v60 = vadd.f32 %v7422_v48, %v7421_v31  ;;  %v7227_v33 = vsel %vm2265_vm3, %v14449_v28, 0.0  ;;  %v7336_v16 = vmul.f32 %v14449_v28, %v14449_v28  ;;  %v14464_v50 = vsel %vm7015_vm2, %v6951_v6, %v7080_v61 }
 0x38a   : > { %17183 = vst [vmem:[#allocation219_spill] sm:$0xff] %v14464_v50  ;;  %v14466_v57 = vpop.f32.mrb[38].mxu0  ;;  %v7428_v5 = vsel %vm2265_vm3, %v7338_v46, 0.0  ;;  %v7228_v34 = vadd.f32 %v7227_v33, %v7226_v8  ;;  %v6949_v39 = vadd.f32 %v9405_v4, %v14146_v52  ;;  %v6952_v48 = vadd.f32 %v9406_v35, %v14146_v52 }
 0x38b   : > { %v14473_v47 = vpop.f32.mrb[39].mxu0  ;;  %v7424_v31 = vsel %vm2265_vm3, %v7336_v16, 0.0  ;;  %v6950_v7 = vadd.f32 %v9407_v11, %v14146_v52  ;;  %v9408_v6 = vadd.f32 %v9338_v15, %v14393_v3  ;;  %v9409_v61 = vadd.f32 %v6724_v19, %v4512_v20 }
 0x38c   : > { %v7230_v51 = vadd.f32 %v7229_v42, %v7228_v34  ;;  %v7425_v28 = vadd.f32 %v7424_v31, %v7423_v60  ;;  %v7341_v40 = vmul.f32 %v14464_v50, %v14464_v50  ;;  %vm7013_vm4 = vcmp.ge.f32.partialorder %v6949_v39, 0.0 }
 0x38d   : > { %v7078_v46 = vmul.f32 %v14148_v12, %v6949_v39  ;;  %vm7016_vm5 = vcmp.ge.f32.partialorder %v6952_v48, 0.0  ;;  %v7081_v8 = vmul.f32 %v14148_v12, %v6952_v48  ;;  %vm7014_vm13 = vcmp.ge.f32.partialorder %v6950_v7, 0.0  ;;  %v14484_v3 = vpop.f32.mrb[40].mxu1 }
 0x38e   : > { %v7427_v4 = vadd.f32 %v7426_v54, %v7425_v28  ;;  %v7232_v35 = vadd.f32 %v7231_v29, %v7230_v51  ;;  %v7079_v33 = vmul.f32 %v14148_v12, %v6950_v7  ;;  %v6955_v11 = vadd.f32 %v9408_v6, %v14146_v52  ;;  %v14495_v16 = vpop.f32.mrb[41].mxu1 }
 0x38f   : > { %v14486_v42 = vsel %vm7013_vm4, %v6949_v39, %v7078_v46  ;;  %v14488_v15 = vsel %vm7016_vm5, %v6952_v48, %v7081_v8  ;;  %v6953_v20 = vadd.f32 %v9409_v61, %v14146_v52  ;;  %v9410_v19 = vadd.f32 %v14411_v9, %v14408_v14  ;;  %v14505_v39 = vpop.f32.mrb[42].mxu1 }
 0x390   : > { %17184 = vst [vmem:[#allocation218_spill] sm:$0xff] %v14486_v42  ;;  %17185 = vst [vmem:[#allocation216_spill] sm:$0xff] %v14488_v15  ;;  %v14493_v60 = vpop.f32.mrb[40].mxu0  ;;  %v7237_v51 = vsel %vm2265_vm3, %v14464_v50, 0.0  ;;  %v7233_v54 = vsel %vm2265_vm3, %v14486_v42, 0.0  ;;  %v7339_v29 = vmul.f32 %v14486_v42, %v14486_v42  ;;  %v7429_v28 = vadd.f32 %v7428_v5, %v7427_v4  ;;  %v14514_v6 = vpop.f32.mrb[43].mxu1 }
 0x391   : > { %v14503_v34 = vpop.f32.mrb[41].mxu0  ;;  %v7234_v48 = vadd.f32 %v7233_v54, %v7232_v35  ;;  %v7342_v14 = vmul.f32 %v14488_v15, %v14488_v15  ;;  %v14510_v9 = vsel %vm7014_vm13, %v6950_v7, %v7079_v33  ;;  %vm7019_vm15 = vcmp.ge.f32.partialorder %v6955_v11, 0.0 }
 0x392   : > { %17186 = vst [vmem:[#allocation222_spill] sm:$0xff] %v14510_v9  ;;  %v14512_v31 = vpop.f32.mrb[42].mxu0  ;;  %v7430_v61 = vsel %vm2265_vm3, %v7339_v29, 0.0  ;;  %v7235_v5 = vsel %vm2265_vm3, %v14510_v9, 0.0  ;;  %v7340_v46 = vmul.f32 %v14510_v9, %v14510_v9  ;;  %v7084_v8 = vmul.f32 %v14148_v12, %v6955_v11 }
 0x393   : > { %v14522_v4 = vpop.f32.mrb[43].mxu0  ;;  %v7434_v7 = vsel %vm2265_vm3, %v7341_v40, 0.0  ;;  %v7431_v35 = vadd.f32 %v7430_v61, %v7429_v28  ;;  %v7236_v33 = vadd.f32 %v7235_v5, %v7234_v48  ;;  %vm7017_vm6 = vcmp.ge.f32.partialorder %v6953_v20, 0.0 }
 0x394   : > { %v7432_v54 = vsel %vm2265_vm3, %v7340_v46, 0.0  ;;  %v14526_v50 = vsel %vm7019_vm15, %v6955_v11, %v7084_v8  ;;  %v7082_v29 = vmul.f32 %v14148_v12, %v6953_v20  ;;  %v6956_v42 = vadd.f32 %v9410_v19, %v14146_v52 }
 0x395   : > { %17187 = vst [vmem:[#allocation224_spill] sm:$0xff] %v14526_v50  ;;  %v7239_v9 = vsel %vm2265_vm3, %v14488_v15, 0.0  ;;  %v7436_v27 = vsel %vm2265_vm3, %v7342_v14, 0.0  ;;  %v7238_v26 = vadd.f32 %v7237_v51, %v7236_v33  ;;  %v7433_v13 = vadd.f32 %v7432_v54, %v7431_v35  ;;  %v14538_v28 = vpop.f32.mrb[44].mxu1 }
 0x396   : > { %v14533_v22 = vsel %vm7017_vm6, %v6953_v20, %v7082_v29  ;;  %vm7020_vm7 = vcmp.ge.f32.partialorder %v6956_v42, 0.0  ;;  %v7085_v40 = vmul.f32 %v14148_v12, %v6956_v42  ;;  %v9411_v11 = vadd.f32 %v14420_v32, %v14413_v53  ;;  %v14546_v20 = vpop.f32.mrb[45].mxu1 }
 0x397   : > { %17188 = vst [vmem:[#allocation226_spill] sm:$0xff] %v14533_v22  ;;  %v7435_v48 = vadd.f32 %v7434_v7, %v7433_v13  ;;  %v7345_v19 = vmul.f32 %v14526_v50, %v14526_v50  ;;  %v7240_v61 = vadd.f32 %v7239_v9, %v7238_v26  ;;  %v7241_v14 = vsel %vm2265_vm3, %v14533_v22, 0.0  ;;  %v14557_v26 = vpop.f32.mrb[46].mxu1 }
 0x398   : > { %v14544_v51 = vpop.f32.mrb[44].mxu0  ;;  %v7343_v5 = vmul.f32 %v14533_v22, %v14533_v22  ;;  %v14550_v46 = vsel %vm7020_vm7, %v6956_v42, %v7085_v40  ;;  %v6954_v53 = vadd.f32 %v9411_v11, %v14146_v52  ;;  %v9412_v13 = vadd.f32 %v14443_v18, %v14438_v43  ;;  %v14563_v33 = vpop.f32.mrb[47].mxu1 }
 0x399   : > { %17189 = vst [vmem:[#allocation228_spill] sm:$0xff] %v14550_v46  ;;  %v14555_v32 = vpop.f32.mrb[45].mxu0  ;;  %v7245_v9 = vsel %vm2265_vm3, %v14526_v50, 0.0  ;;  %v7242_v8 = vadd.f32 %v7241_v14, %v7240_v61  ;;  %v7437_v7 = vadd.f32 %v7436_v27, %v7435_v48  ;;  %v7442_v29 = vsel %vm2265_vm3, %v7345_v19, 0.0 }
 0x39a   : > { %v14561_v35 = vpop.f32.mrb[46].mxu0  ;;  %v7438_v42 = vsel %vm2265_vm3, %v7343_v5, 0.0  ;;  %vm7018_vm8 = vcmp.ge.f32.partialorder %v6954_v53, 0.0  ;;  %v7083_v54 = vmul.f32 %v14148_v12, %v6954_v53  ;;  %v6959_v43 = vadd.f32 %v9412_v13, %v14146_v52 }
 0x39b   : > { %v14568_v18 = vpop.f32.mrb[47].mxu0  ;;  %v7346_v40 = vmul.f32 %v14550_v46, %v14550_v46  ;;  %v9413_v27 = vadd.f32 %v14455_v23, %v14445_v30  ;;  %v9414_v11 = vadd.f32 %v14466_v57, %v14457_v2  ;;  %v7439_v48 = vadd.f32 %v7438_v42, %v7437_v7 }
 0x39c   : > { %v14577_v61 = vsel %vm7018_vm8, %v6954_v53, %v7083_v54  ;;  %v7088_v14 = vmul.f32 %v14148_v12, %v6959_v43  ;;  %v9415_v5 = vadd.f32 %v14473_v47, %v14468_v25  ;;  %vm7023_vm9 = vcmp.ge.f32.partialorder %v6959_v43, 0.0 }
 0x39d   : > { %17190 = vst [vmem:[#allocation231_spill] sm:$0xff] %v14577_v61  ;;  %v7243_v19 = vsel %vm2265_vm3, %v14577_v61, 0.0  ;;  %v7344_v13 = vmul.f32 %v14577_v61, %v14577_v61  ;;  %v6957_v50 = vadd.f32 %v9413_v27, %v14146_v52  ;;  %v6960_v30 = vadd.f32 %v9414_v11, %v14146_v52  ;;  %v14591_v53 = vpop.f32.mrb[48].mxu1 }
 0x39e   : > { %v7244_v23 = vadd.f32 %v7243_v19, %v7242_v8  ;;  %v6958_v2 = vadd.f32 %v9415_v5, %v14146_v52  ;;  %v9416_v57 = vadd.f32 %v14493_v60, %v14484_v3  ;;  %v7247_v25 = vsel %vm2265_vm3, %v14550_v46, 0.0  ;;  %v14599_v54 = vpop.f32.mrb[49].mxu1 }
 0x39f   : > { %v7444_v47 = vsel %vm2265_vm3, %v7346_v40, 0.0  ;;  %v7440_v7 = vsel %vm2265_vm3, %v7344_v13, 0.0  ;;  %vm7021_vm0 = vcmp.ge.f32.partialorder %v6957_v50, 0.0  ;;  %v7086_v11 = vmul.f32 %v14148_v12, %v6957_v50  ;;  %v14604_v60 = vpop.f32.mrb[50].mxu1 }
 0x3a0   : > { %v14597_v42 = vpop.f32.mrb[48].mxu0  ;;  %v7246_v8 = vadd.f32 %v7245_v9, %v7244_v23  ;;  %v7441_v27 = vadd.f32 %v7440_v7, %v7439_v48  ;;  %vm7024_vm1 = vcmp.ge.f32.partialorder %v6960_v30, 0.0  ;;  %v14607_v5 = vsel %vm7023_vm9, %v6959_v43, %v7088_v14  ;;  %v14613_v46 = vpop.f32.mrb[51].mxu1 }
 0x3a1   : > { %v14602_v3 = vpop.f32.mrb[49].mxu0  ;;  %17191 = vst [vmem:[#allocation233_spill] sm:$0xff] %v14607_v5  ;;  %v7089_v40 = vmul.f32 %v14148_v12, %v6960_v30  ;;  %vm7022_vm14 = vcmp.ge.f32.partialorder %v6958_v2, 0.0  ;;  %v7087_v19 = vmul.f32 %v14148_v12, %v6958_v2  ;;  %v14616_v48 = vsel %vm7021_vm0, %v6957_v50, %v7086_v11 }
 0x3a2   : > { %v14611_v13 = vpop.f32.mrb[50].mxu0  ;;  %v7443_v9 = vadd.f32 %v7442_v29, %v7441_v27  ;;  %17192 = vst [vmem:[#allocation235_spill] sm:$0xff] %v14616_v48  ;;  %v7248_v23 = vadd.f32 %v7247_v25, %v7246_v8  ;;  %v6963_v7 = vadd.f32 %v9416_v57, %v14146_v52  ;;  %v7249_v43 = vsel %vm2265_vm3, %v14616_v48, 0.0 }
 0x3a3   : > { %v14619_v61 = vpop.f32.mrb[51].mxu0  ;;  %v7347_v14 = vmul.f32 %v14616_v48, %v14616_v48  ;;  %v14626_v22 = vsel %vm7024_vm1, %v6960_v30, %v7089_v40  ;;  %v14628_v15 = vsel %vm7022_vm14, %v6958_v2, %v7087_v19  ;;  %v7253_v50 = vsel %vm2265_vm3, %v14607_v5, 0.0 }
 0x3a4   : > { %17193 = vst [vmem:[#allocation237_spill] sm:$0xff] %v14626_v22  ;;  %17194 = vst [vmem:[#allocation239_spill] sm:$0xff] %v14628_v15  ;;  %v7349_v29 = vmul.f32 %v14607_v5, %v14607_v5  ;;  %v7250_v57 = vadd.f32 %v7249_v43, %v7248_v23  ;;  %v7445_v25 = vadd.f32 %v7444_v47, %v7443_v9  ;;  %v7251_v11 = vsel %vm2265_vm3, %v14628_v15, 0.0 }
 0x3a5   : > { %v7446_v8 = vsel %vm2265_vm3, %v7347_v14, 0.0  ;;  %v7350_v27 = vmul.f32 %v14626_v22, %v14626_v22  ;;  %v7348_v30 = vmul.f32 %v14628_v15, %v14628_v15  ;;  %vm7027_vm10 = vcmp.ge.f32.partialorder %v6963_v7, 0.0  ;;  %v14642_v48 = vpop.f32.mrb[52].mxu1 }
 0x3a6   : > { %v7447_v2 = vadd.f32 %v7446_v8, %v7445_v25  ;;  %v7252_v40 = vadd.f32 %v7251_v11, %v7250_v57  ;;  %v7092_v19 = vmul.f32 %v14148_v12, %v6963_v7  ;;  %v9417_v9 = vadd.f32 %v14503_v34, %v14495_v16  ;;  %v14653_v25 = vpop.f32.mrb[53].mxu1 }
 0x3a7   : > { %v7448_v47 = vsel %vm2265_vm3, %v7348_v30, 0.0  ;;  %v9418_v23 = vadd.f32 %v14512_v31, %v14505_v39  ;;  %v9419_v43 = vadd.f32 %v14522_v4, %v14514_v6  ;;  %v7450_v57 = vsel %vm2265_vm3, %v7349_v29, 0.0  ;;  %v14660_v16 = vpop.f32.mrb[54].mxu1 }
 0x3a8   : > { %v14651_v14 = vpop.f32.mrb[52].mxu0  ;;  %v7254_v8 = vadd.f32 %v7253_v50, %v7252_v40  ;;  %v7449_v11 = vadd.f32 %v7448_v47, %v7447_v2  ;;  %v9420_v30 = vadd.f32 %v14544_v51, %v14538_v28  ;;  %v7255_v34 = vsel %vm2265_vm3, %v14626_v22, 0.0  ;;  %v14671_v50 = vpop.f32.mrb[55].mxu1 }
 0x3a9   : > { %v14658_v5 = vpop.f32.mrb[53].mxu0  ;;  %v14665_v39 = vsel %vm7027_vm10, %v6963_v7, %v7092_v19  ;;  %v6961_v31 = vadd.f32 %v9417_v9, %v14146_v52  ;;  %v6964_v6 = vadd.f32 %v9418_v23, %v14146_v52  ;;  %v7452_v28 = vsel %vm2265_vm3, %v7350_v27, 0.0 }
 0x3aa   : > { %17195 = vst [vmem:[#allocation262_spill] sm:$0xff] %v14665_v39  ;;  %v14669_v4 = vpop.f32.mrb[54].mxu0  ;;  %v7451_v51 = vadd.f32 %v7450_v57, %v7449_v11  ;;  %v6962_v29 = vadd.f32 %v9419_v43, %v14146_v52  ;;  %v6967_v2 = vadd.f32 %v9420_v30, %v14146_v52  ;;  %v7256_v19 = vadd.f32 %v7255_v34, %v7254_v8 }
 0x3ab   : > { %v14676_v40 = vpop.f32.mrb[55].mxu0  ;;  %vm7025_vm11 = vcmp.ge.f32.partialorder %v6961_v31, 0.0  ;;  %v7090_v7 = vmul.f32 %v14148_v12, %v6961_v31  ;;  %vm7028_vm12 = vcmp.ge.f32.partialorder %v6964_v6, 0.0  ;;  %v7353_v47 = vmul.f32 %v14665_v39, %v14665_v39 }
 0x3ac   : > { %v7093_v9 = vmul.f32 %v14148_v12, %v6964_v6  ;;  %vm7026_vm2 = vcmp.ge.f32.partialorder %v6962_v29, 0.0  ;;  %v7091_v27 = vmul.f32 %v14148_v12, %v6962_v29  ;;  %v7453_v43 = vadd.f32 %v7452_v28, %v7451_v51 }
 0x3ad   : > { %v14683_v23 = vsel %vm7025_vm11, %v6961_v31, %v7090_v7  ;;  %v7096_v52 = vmul.f32 %v14148_v12, %v6967_v2  ;;  %v9421_v57 = vadd.f32 %v14555_v32, %v14546_v20  ;;  %v14696_v22 = vpop.f32.mrb[56].mxu1  ;;  %v7261_v31 = vsel %vm2265_vm3, %v14665_v39, 0.0 }
 0x3ae   : > { %17196 = vst [vmem:[#allocation241_spill] sm:$0xff] %v14683_v23  ;;  %v7257_v8 = vsel %vm2265_vm3, %v14683_v23, 0.0  ;;  %v7351_v11 = vmul.f32 %v14683_v23, %v14683_v23  ;;  %v14692_v30 = vsel %vm7028_vm12, %v6964_v6, %v7093_v9  ;;  %v14694_v34 = vsel %vm7026_vm2, %v6962_v29, %v7091_v27  ;;  %v14704_v32 = vpop.f32.mrb[57].mxu1  ;;  %v14712_v9 = vld [vmem:[%s14143_s11] ss:$0 sm:$0xff] }
 0x3af   : > { %17197 = vst [vmem:[#allocation264_spill] sm:$0xff] %v14692_v30  ;;  %17198 = vst [vmem:[#allocation243_spill] sm:$0xff] %v14694_v34  ;;  %v7258_v28 = vadd.f32 %v7257_v8, %v7256_v19  ;;  %v7259_v51 = vsel %vm2265_vm3, %v14694_v34, 0.0  ;;  %vm7031_vm4 = vcmp.ge.f32.partialorder %v6967_v2, 0.0  ;;  %v7354_v6 = vmul.f32 %v14692_v30, %v14692_v30  ;;  %v14717_v8 = vpop.f32.mrb[58].mxu1 }
 0x3b0   : > { %v14702_v20 = vpop.f32.mrb[56].mxu0  ;;  %v7454_v7 = vsel %vm2265_vm3, %v7351_v11, 0.0  ;;  %v7352_v29 = vmul.f32 %v14694_v34, %v14694_v34  ;;  %v6965_v19 = vadd.f32 %v14712_v9, %v9421_v57  ;;  %v7458_v39 = vsel %vm2265_vm3, %v7353_v47, 0.0  ;;  %v14724_v45 = vpop.f32.mrb[59].mxu1 }
 0x3b1   : > { %v14715_v27 = vpop.f32.mrb[57].mxu0  ;;  %v7455_v23 = vadd.f32 %v7454_v7, %v7453_v43  ;;  %v7263_v11 = vsel %vm2265_vm3, %v14692_v30, 0.0  ;;  %v7260_v15 = vadd.f32 %v7259_v51, %v7258_v28  ;;  %v14728_v10 = vsel %vm7031_vm4, %v6967_v2, %v7096_v52 }
 0x3b2   : > { %v14722_v55 = vpop.f32.mrb[58].mxu0  ;;  %v7456_v34 = vsel %vm2265_vm3, %v7352_v29, 0.0  ;;  %vm7029_vm5 = vcmp.ge.f32.partialorder %v6965_v19, 0.0  ;;  %v7094_v57 = vmul.f32 %v14148_v12, %v6965_v19  ;;  %v9422_v7 = vadd.f32 %v14561_v35, %v14557_v26 }
 0x3b3   : > { %v14731_v49 = vpop.f32.mrb[59].mxu0  ;;  %v7262_v47 = vadd.f32 %v7261_v31, %v7260_v15  ;;  %v7457_v43 = vadd.f32 %v7456_v34, %v7455_v23  ;;  %v9423_v28 = vadd.f32 %v14568_v18, %v14563_v33  ;;  %v7460_v51 = vsel %vm2265_vm3, %v7354_v6, 0.0 }
 0x3b4   : > { %v14738_v30 = vsel %vm7029_vm5, %v6965_v19, %v7094_v57  ;;  %v9424_v2 = vadd.f32 %v14597_v42, %v14591_v53  ;;  %v9425_v52 = vadd.f32 %v14602_v3, %v14599_v54  ;;  %v6968_v35 = vadd.f32 %v14712_v9, %v9422_v7 }
 0x3b5   : > { %17199 = vst [vmem:[#allocation266_spill] sm:$0xff] %v14738_v30  ;;  %v7459_v29 = vadd.f32 %v7458_v39, %v7457_v43  ;;  %v7264_v21 = vadd.f32 %v7263_v11, %v7262_v47  ;;  %v7265_v15 = vsel %vm2265_vm3, %v14738_v30, 0.0  ;;  %v7355_v26 = vmul.f32 %v14738_v30, %v14738_v30  ;;  %v14752_v53 = vpop.f32.mrb[60].mxu1 }
 0x3b6   : > { %v6966_v33 = vadd.f32 %v14712_v9, %v9423_v28  ;;  %v6971_v18 = vadd.f32 %v14712_v9, %v9424_v2  ;;  %v6969_v23 = vadd.f32 %v14712_v9, %v9425_v52  ;;  %v9426_v39 = vadd.f32 %v14611_v13, %v14604_v60  ;;  %v14759_v31 = vpop.f32.mrb[61].mxu1 }
 0x3b7   : > { %v7266_v42 = vadd.f32 %v7265_v15, %v7264_v21  ;;  %v7461_v54 = vadd.f32 %v7460_v51, %v7459_v29  ;;  %v7462_v3 = vsel %vm2265_vm3, %v7355_v26, 0.0  ;;  %vm7032_vm13 = vcmp.ge.f32.partialorder %v6968_v35, 0.0  ;;  %v14765_v57 = vpop.f32.mrb[62].mxu1 }
 0x3b8   : > { %v14757_v34 = vpop.f32.mrb[60].mxu0  ;;  %v7097_v6 = vmul.f32 %v14148_v12, %v6968_v35  ;;  %vm7030_vm15 = vcmp.ge.f32.partialorder %v6966_v33, 0.0  ;;  %v7095_v19 = vmul.f32 %v14148_v12, %v6966_v33  ;;  %v7357_v21 = vmul.f32 %v14728_v10, %v14728_v10  ;;  %v14771_v13 = vpop.f32.mrb[63].mxu1 }
 0x3b9   : > { %v14763_v11 = vpop.f32.mrb[61].mxu0  ;;  %v7463_v47 = vadd.f32 %v7462_v3, %v7461_v54  ;;  %vm7033_vm6 = vcmp.ge.f32.partialorder %v6969_v23, 0.0  ;;  %v7100_v28 = vmul.f32 %v14148_v12, %v6971_v18  ;;  %v7098_v51 = vmul.f32 %v14148_v12, %v6969_v23 }
 0x3ba   : > { %v14769_v60 = vpop.f32.mrb[62].mxu0  ;;  %v14773_v43 = vsel %vm7032_vm13, %v6968_v35, %v7097_v6  ;;  %v14775_v7 = vsel %vm7030_vm15, %v6966_v33, %v7095_v19  ;;  %vm7035_vm7 = vcmp.ge.f32.partialorder %v6971_v18, 0.0  ;;  %v6972_v15 = vadd.f32 %v14712_v9, %v9426_v39 }
 0x3bb   : > { %17200 = vst [vmem:[#allocation245_spill] sm:$0xff] %v14775_v7  ;;  %v14779_v2 = vpop.f32.mrb[63].mxu0  ;;  %v7267_v52 = vsel %vm2265_vm3, %v14775_v7, 0.0  ;;  %v7356_v29 = vmul.f32 %v14775_v7, %v14775_v7  ;;  %v7269_v26 = vsel %vm2265_vm3, %v14728_v10, 0.0  ;;  %v14788_v33 = vsel %vm7033_vm6, %v6969_v23, %v7098_v51 }
 0x3bc   : > { %v7268_v35 = vadd.f32 %v7267_v52, %v7266_v42  ;;  %v7466_v54 = vsel %vm2265_vm3, %v7357_v21, 0.0  ;;  %v7271_v3 = vsel %vm2265_vm3, %v14773_v43, 0.0  ;;  %v7358_v6 = vmul.f32 %v14773_v43, %v14773_v43 }
 0x3bd   : > { %v7464_v19 = vsel %vm2265_vm3, %v7356_v29, 0.0  ;;  %v14796_v38 = vsel %vm7035_vm7, %v6971_v18, %v7100_v28  ;;  %v7359_v39 = vmul.f32 %v14788_v33, %v14788_v33  ;;  %v7273_v23 = vsel %vm2265_vm3, %v14788_v33, 0.0 }
 0x3be   : > { %v7270_v7 = vadd.f32 %v7269_v26, %v7268_v35  ;;  %v7465_v30 = vadd.f32 %v7464_v19, %v7463_v47  ;;  %vm7036_vm8 = vcmp.ge.f32.partialorder %v6972_v15, 0.0  ;;  %v9427_v42 = vadd.f32 %v14619_v61, %v14613_v46 }
 0x3bf   : > { %v9428_v21 = vadd.f32 %v14651_v14, %v14642_v48  ;;  %v7101_v29 = vmul.f32 %v14148_v12, %v6972_v15  ;;  %v9429_v18 = vadd.f32 %v14658_v5, %v14653_v25  ;;  %v7468_v47 = vsel %vm2265_vm3, %v7358_v6, 0.0 }
 0x3c0   : > { %v7467_v51 = vadd.f32 %v7466_v54, %v7465_v30  ;;  %v7272_v52 = vadd.f32 %v7271_v3, %v7270_v7  ;;  %v6970_v28 = vadd.f32 %v14712_v9, %v9427_v42  ;;  %v9430_v35 = vadd.f32 %v14669_v4, %v14660_v16 }
 0x3c1   : > { %v6975_v26 = vadd.f32 %v14712_v9, %v9428_v21  ;;  %v7361_v46 = vmul.f32 %v14796_v38, %v14796_v38  ;;  %v7470_v14 = vsel %vm2265_vm3, %v7359_v39, 0.0  ;;  %v7277_v25 = vsel %vm2265_vm3, %v14796_v38, 0.0 }
 0x3c2   : > { %v7274_v61 = vadd.f32 %v7273_v23, %v7272_v52  ;;  %v7469_v48 = vadd.f32 %v7468_v47, %v7467_v51  ;;  %vm7034_vm9 = vcmp.ge.f32.partialorder %v6970_v28, 0.0  ;;  %v7099_v30 = vmul.f32 %v14148_v12, %v6970_v28 }
 0x3c3   : > { %vm7039_vm0 = vcmp.ge.f32.partialorder %v6975_v26, 0.0  ;;  %v7104_v5 = vmul.f32 %v14148_v12, %v6975_v26  ;;  %v14822_v7 = vsel %vm7036_vm8, %v6972_v15, %v7101_v29  ;;  %v6973_v16 = vadd.f32 %v14712_v9, %v9429_v18 }
 0x3c4   : > { %17201 = vst [vmem:[#allocation268_spill] sm:$0xff] %v14822_v7  ;;  %v6976_v4 = vadd.f32 %v14712_v9, %v9430_v35  ;;  %v7471_v54 = vadd.f32 %v7470_v14, %v7469_v48  ;;  %v14826_v3 = vsel %vm7034_vm9, %v6970_v28, %v7099_v30  ;;  %v9431_v6 = vadd.f32 %v14676_v40, %v14671_v50 }
 0x3c5   : > { %v9432_v19 = vadd.f32 %v14702_v20, %v14696_v22  ;;  %v7474_v39 = vsel %vm2265_vm3, %v7361_v46, 0.0  ;;  %v7275_v23 = vsel %vm2265_vm3, %v14826_v3, 0.0  ;;  %v7360_v15 = vmul.f32 %v14826_v3, %v14826_v3 }
 0x3c6   : > { %v14837_v42 = vsel %vm7039_vm0, %v6975_v26, %v7104_v5  ;;  %v7362_v21 = vmul.f32 %v14822_v7, %v14822_v7  ;;  %v7276_v51 = vadd.f32 %v7275_v23, %v7274_v61  ;;  %vm7037_vm1 = vcmp.ge.f32.partialorder %v6973_v16, 0.0 }
 0x3c7   : > { %v7102_v50 = vmul.f32 %v14148_v12, %v6973_v16  ;;  %v7472_v40 = vsel %vm2265_vm3, %v7360_v15, 0.0  ;;  %vm7040_vm14 = vcmp.ge.f32.partialorder %v6976_v4, 0.0  ;;  %v7105_v22 = vmul.f32 %v14148_v12, %v6976_v4 }
 0x3c8   : > { %v6974_v20 = vadd.f32 %v14712_v9, %v9431_v6  ;;  %v7278_v52 = vadd.f32 %v7277_v25, %v7276_v51  ;;  %v7473_v29 = vadd.f32 %v7472_v40, %v7471_v54  ;;  %v7365_v18 = vmul.f32 %v14837_v42, %v14837_v42 }
 0x3c9   : > { %v14847_v47 = vsel %vm7037_vm1, %v6973_v16, %v7102_v50  ;;  %v7279_v28 = vsel %vm2265_vm3, %v14822_v7, 0.0  ;;  %v6979_v46 = vadd.f32 %v14712_v9, %v9432_v19  ;;  %v14856_v14 = vsel %vm7040_vm14, %v6976_v4, %v7105_v22  ;;  %v17237_v7 = vld [vmem:[#allocation241_spill] sm:$0xff] }
 0x3ca   : > { %v7281_v26 = vsel %vm2265_vm3, %v14847_v47, 0.0  ;;  %v7363_v35 = vmul.f32 %v14847_v47, %v14847_v47  ;;  %v7475_v61 = vadd.f32 %v7474_v39, %v7473_v29  ;;  %v7280_v48 = vadd.f32 %v7279_v28, %v7278_v52 }
 0x3cb   : > { %vm7038_vm10 = vcmp.ge.f32.partialorder %v6974_v20, 0.0  ;;  %v7476_v30 = vsel %vm2265_vm3, %v7362_v21, 0.0  ;;  %v7285_v5 = vsel %vm2265_vm3, %v14837_v42, 0.0  ;;  %v7103_v16 = vmul.f32 %v14148_v12, %v6974_v20 }
 0x3cc   : > { %v7478_v25 = vsel %vm2265_vm3, %v7363_v35, 0.0  ;;  %v7482_v54 = vsel %vm2265_vm3, %v7365_v18, 0.0  ;;  %v7282_v6 = vadd.f32 %v7281_v26, %v7280_v48  ;;  %v7477_v23 = vadd.f32 %v7476_v30, %v7475_v61 }
 0x3cd   : > { %v9433_v19 = vadd.f32 %v14715_v27, %v14704_v32  ;;  %v7366_v4 = vmul.f32 %v14856_v14, %v14856_v14  ;;  %v14868_v39 = vsel %vm7038_vm10, %v6974_v20, %v7103_v16  ;;  %v9434_v15 = vadd.f32 %v14722_v55, %v14717_v8 }
 0x3ce   : > { %v9435_v21 = vadd.f32 %v14731_v49, %v14724_v45  ;;  %v7479_v51 = vadd.f32 %v7478_v25, %v7477_v23  ;;  %v7283_v50 = vsel %vm2265_vm3, %v14868_v39, 0.0  ;;  %v7364_v40 = vmul.f32 %v14868_v39, %v14868_v39 }
 0x3cf   : > { %v7108_v32 = vmul.f32 %v14148_v12, %v6979_v46  ;;  %v7284_v27 = vadd.f32 %v7283_v50, %v7282_v6  ;;  %vm7043_vm11 = vcmp.ge.f32.partialorder %v6979_v46, 0.0  ;;  %v6977_v22 = vadd.f32 %v14712_v9, %v9433_v19 }
 0x3d0   : > { %v6980_v20 = vadd.f32 %v14712_v9, %v9434_v15  ;;  %v7480_v55 = vsel %vm2265_vm3, %v7364_v40, 0.0  ;;  %v6978_v8 = vadd.f32 %v14712_v9, %v9435_v21  ;;  %v9436_v49 = vadd.f32 %v14757_v34, %v14752_v53 }
 0x3d1   : > { %v9437_v45 = vadd.f32 %v14763_v11, %v14759_v31  ;;  %v7287_v52 = vsel %vm2265_vm3, %v14856_v14, 0.0  ;;  %v7286_v29 = vadd.f32 %v7285_v5, %v7284_v27  ;;  %v7481_v18 = vadd.f32 %v7480_v55, %v7479_v51 }
 0x3d2   : > { %vm7041_vm12 = vcmp.ge.f32.partialorder %v6977_v22, 0.0  ;;  %v14889_v28 = vsel %vm7043_vm11, %v6979_v46, %v7108_v32  ;;  %v7106_v26 = vmul.f32 %v14148_v12, %v6977_v22  ;;  %vm7044_vm2 = vcmp.ge.f32.partialorder %v6980_v20, 0.0 }
 0x3d3   : > { %v7109_v35 = vmul.f32 %v14148_v12, %v6980_v20  ;;  %v7483_v61 = vadd.f32 %v7482_v54, %v7481_v18  ;;  %v7288_v48 = vadd.f32 %v7287_v52, %v7286_v29  ;;  %vm7042_vm4 = vcmp.ge.f32.partialorder %v6978_v8, 0.0 }
 0x3d4   : > { %v7107_v53 = vmul.f32 %v14148_v12, %v6978_v8  ;;  %v7484_v34 = vsel %vm2265_vm3, %v7366_v4, 0.0  ;;  %v14895_v31 = vsel %vm7041_vm12, %v6977_v22, %v7106_v26  ;;  %v6981_v11 = vadd.f32 %v14712_v9, %v9437_v45 }
 0x3d5   : > { %v9438_v46 = vadd.f32 %v14769_v60, %v14765_v57  ;;  %v7289_v30 = vsel %vm2265_vm3, %v14895_v31, 0.0  ;;  %v7367_v5 = vmul.f32 %v14895_v31, %v14895_v31  ;;  %v7485_v25 = vadd.f32 %v7484_v34, %v7483_v61 }
 0x3d6   : > { %v7369_v16 = vmul.f32 %v14889_v28, %v14889_v28  ;;  %v7290_v54 = vadd.f32 %v7289_v30, %v7288_v48  ;;  %v14906_v6 = vsel %vm7044_vm2, %v6980_v20, %v7109_v35  ;;  %v14908_v23 = vsel %vm7042_vm4, %v6978_v8, %v7107_v53 }
 0x3d7   : > { %v7486_v19 = vsel %vm2265_vm3, %v7367_v5, 0.0  ;;  %v7291_v57 = vsel %vm2265_vm3, %v14908_v23, 0.0  ;;  %v7368_v60 = vmul.f32 %v14908_v23, %v14908_v23  ;;  %v6983_v4 = vadd.f32 %v14712_v9, %v9436_v49 }
 0x3d8   : > { %v7293_v15 = vsel %vm2265_vm3, %v14889_v28, 0.0  ;;  %v7487_v21 = vadd.f32 %v7486_v19, %v7485_v25  ;;  %v7292_v51 = vadd.f32 %v7291_v57, %v7290_v54  ;;  %vm7045_vm5 = vcmp.ge.f32.partialorder %v6981_v11, 0.0 }
 0x3d9   : > { %v7370_v50 = vmul.f32 %v14906_v6, %v14906_v6  ;;  %v7488_v40 = vsel %vm2265_vm3, %v7368_v60, 0.0  ;;  %v7110_v32 = vmul.f32 %v14148_v12, %v6981_v11  ;;  %v6984_v27 = vadd.f32 %v14712_v9, %v9438_v46 }
 0x3da   : > { %v7490_v22 = vsel %vm2265_vm3, %v7369_v16, 0.0  ;;  %v7294_v20 = vadd.f32 %v7293_v15, %v7292_v51  ;;  %v7489_v55 = vadd.f32 %v7488_v40, %v7487_v21  ;;  %v7295_v8 = vsel %vm2265_vm3, %v14906_v6, 0.0 }
 0x3db   : > { %v7112_v49 = vmul.f32 %v14148_v12, %v6983_v4  ;;  %v14927_v45 = vsel %vm7045_vm5, %v6981_v11, %v7110_v32  ;;  %v9439_v52 = vadd.f32 %v14779_v2, %v14771_v13  ;;  %vm7047_vm13 = vcmp.ge.f32.partialorder %v6983_v4, 0.0 }
 0x3dc   : > { %v7491_v29 = vadd.f32 %v7490_v22, %v7489_v55  ;;  %v7296_v18 = vadd.f32 %v7295_v8, %v7294_v20  ;;  %v7297_v26 = vsel %vm2265_vm3, %v14927_v45, 0.0  ;;  %v7492_v35 = vsel %vm2265_vm3, %v7370_v50, 0.0 }
 0x3dd   : > { %v7371_v61 = vmul.f32 %v14927_v45, %v14927_v45  ;;  %v7113_v48 = vmul.f32 %v14148_v12, %v6984_v27  ;;  %v6982_v53 = vadd.f32 %v14712_v9, %v9439_v52  ;;  %vm7048_vm15 = vcmp.ge.f32.partialorder %v6984_v27, 0.0 }
 0x3de   : > { %v7298_v34 = vadd.f32 %v7297_v26, %v7296_v18  ;;  %v7493_v11 = vadd.f32 %v7492_v35, %v7491_v29  ;;  %v14938_v46 = vsel %vm7047_vm13, %v6983_v4, %v7112_v49 }
 0x3df   : > { %v7494_v13 = vsel %vm2265_vm3, %v7371_v61, 0.0  ;;  %vm7046_vm6 = vcmp.ge.f32.partialorder %v6982_v53, 0.0  ;;  %v7111_v2 = vmul.f32 %v14148_v12, %v6982_v53  ;;  %v14942_v5 = vsel %vm7048_vm15, %v6984_v27, %v7113_v48 }
 0x3e0   : > { %v7495_v30 = vadd.f32 %v7494_v13, %v7493_v11  ;;  %v7373_v16 = vmul.f32 %v14938_v46, %v14938_v46  ;;  %v7301_v57 = vsel %vm2265_vm3, %v14938_v46, 0.0  ;;  %v7374_v12 = vmul.f32 %v14942_v5, %v14942_v5 }
 0x3e1   : > { %v14944_v25 = vsel %vm7046_vm6, %v6982_v53, %v7111_v2  ;;  %v7303_v51 = vsel %vm2265_vm3, %v14942_v5, 0.0 }
 0x3e2   : > { %v7299_v9 = vsel %vm2265_vm3, %v14944_v25, 0.0  ;;  %v7372_v54 = vmul.f32 %v14944_v25, %v14944_v25  ;;  %v7498_v21 = vsel %vm2265_vm3, %v7373_v16, 0.0  ;;  %v7500_v32 = vsel %vm2265_vm3, %v7374_v12, 0.0  ;;  %v17202_v16 = vld [vmem:[#allocation14_spill] sm:$0xff] }
 0x3e3   : > { %v7300_v19 = vadd.f32 %v7299_v9, %v7298_v34  ;;  %v16379_v9 = vsub.s32 0, %v17202_v16 }
 0x3e4   : > { %v7496_v60 = vsel %vm2265_vm3, %v7372_v54, 0.0 }
 0x3e5   : > { %v7302_v4 = vadd.f32 %v7301_v57, %v7300_v19  ;;  %v7497_v15 = vadd.f32 %v7496_v60, %v7495_v30  ;;  %v1723_v30 = vld [vmem:[%s1722_s14] sm:$0x1] }
 0x3e6   : > { %v14970_v57 = vld [vmem:[%s1724_s17] sm:$0x1] }
 0x3e7   : > { %v7304_v50 = vadd.f32 %v7303_v51, %v7302_v4  ;;  %v7499_v40 = vadd.f32 %v7498_v21, %v7497_v15  ;;  %17204 = vst [vmem:[#allocation247_spill] sm:$0xff] %v14970_v57  ;;  %v17230_v4 = vld [vmem:[#allocation235_spill] sm:$0xff]  ;;  %v17235_v57 = vld [vmem:[#allocation237_spill] sm:$0xff] }
 0x3e9   : > { %v7305_v27 = vrot.slane %v7304_v50, 4  ;;  %v7501_v22 = vadd.f32 %v7500_v32, %v7499_v40  ;;  %v17206_v32 = vld [vmem:[#allocation230_spill] sm:$0xff] }
 0x3eb   : > { %v7306_v20 = vadd.f32 %v7305_v27, %v7304_v50  ;;  %v7502_v55 = vrot.slane %v7501_v22, 4  ;;  %v17207_v27 = vld [vmem:[#allocation199_spill] sm:$0xff] }
 0x3ed   : > { %v7307_v8 = vrot.slane %v7306_v20, 2  ;;  %v7503_v49 = vadd.f32 %v7502_v55, %v7501_v22  ;;  %v17208_v22 = vld [vmem:[#allocation200_spill] sm:$0xff]  ;;  %v17210_v55 = vld [vmem:[#allocation205_spill] sm:$0xff] }
 0x3ef   : > { %v7308_v52 = vadd.f32 %v7307_v8, %v7306_v20  ;;  %v7504_v29 = vrot.slane %v7503_v49, 2  ;;  %v17209_v20 = vld [vmem:[#allocation202_spill] sm:$0xff]  ;;  %v17211_v8 = vld [vmem:[#allocation201_spill] sm:$0xff] }
 0x3f1   : > { %v7309_v18 = vrot.slane %v7308_v52, 1  ;;  %v7505_v26 = vadd.f32 %v7504_v29, %v7503_v49 }
 0x3f3   : > { %v7310_v35 = vadd.f32 %v7309_v18, %v7308_v52  ;;  %v7506_v61 = vrot.slane %v7505_v26, 1  ;;  %v17212_v52 = vld [vmem:[#allocation204_spill] sm:$0xff]  ;;  %v17213_v18 = vld [vmem:[#allocation207_spill] sm:$0xff] }
 0x3f5   : > { %v7507_v48 = vadd.f32 %v7506_v61, %v7505_v26  ;;  %v7508_v53 = vmul.f32 0.001953125, %v7310_v35  ;;  %v17214_v35 = vld [vmem:[#allocation209_spill] sm:$0xff] }
 0x3f7   : > { %v7509_v34 = vmul.f32 0.001953125, %v7507_v48  ;;  %v7510_v11 = vmul.f32 %v7508_v53, %v7508_v53  ;;  %v17215_v48 = vld [vmem:[#allocation206_spill] sm:$0xff] }
 0x3f9   : > { %v7511_v13 = vsub.f32 %v7509_v34, %v7510_v11  ;;  %v17216_v34 = vld [vmem:[#allocation208_spill] sm:$0xff] }
 0x3fb   : > { %v7512_v2 = vadd.f32 1e-05, %v7511_v13  ;;  %v17217_v13 = vld [vmem:[#allocation211_spill] sm:$0xff] }
 0x3fd   : > { %10449 = vrsqrt.f32 %v7512_v2 }
 0x407   : > { %v10450_v54 = vpop.eup %10449 }
 0x408   : > { %v7514_v19 = vmul.f32 %v10450_v54, %v1723_v30  ;;  %v17218_v30 = vld [vmem:[#allocation213_spill] sm:$0xff]  ;;  %v17219_v54 = vld [vmem:[#allocation210_spill] sm:$0xff] }
 0x40a   : > { %v14972_v12 = vmul.f32 %v7514_v19, %v7508_v53  ;;  %v14976_v60 = vrot.slane %v7514_v19, %v16379_v9  ;;  %v17232_v9 = vld [vmem:[#allocation239_spill] sm:$0xff] }
 0x40c   : > { %17205 = vst [vmem:[#allocation270_spill] sm:$0xff] %v14972_v12  ;;  %v14982_v15 = vmul.f32 %v14976_v60, %v14161_v63  ;;  %v14986_v21 = vmul.f32 %v14976_v60, %v14175_v36  ;;  %v14990_v51 = vmul.f32 %v14976_v60, %v14156_v24  ;;  %v14994_v50 = vmul.f32 %v14976_v60, %v14165_v56  ;;  %v17234_v12 = vld [vmem:[#allocation233_spill] sm:$0xff] }
 0x40d   : > { %v14998_v40 = vmul.f32 %v14976_v60, %v14200_v17  ;;  %v15002_v63 = vmul.f32 %v14976_v60, %v14217_v44  ;;  %v15006_v36 = vmul.f32 %v14976_v60, %v14193_v62  ;;  %v15010_v24 = vmul.f32 %v14976_v60, %v14206_v58 }
 0x40e   : > { %v15014_v56 = vmul.f32 %v14976_v60, %v14241_v37  ;;  %v15018_v17 = vmul.f32 %v14976_v60, %v14253_v0  ;;  %v15022_v44 = vmul.f32 %v14976_v60, %v14235_v41  ;;  %v15026_v62 = vmul.f32 %v14976_v60, %v14247_v59 }
 0x40f   : > { %v15030_v58 = vmul.f32 %v14976_v60, %v14284_v1  ;;  %v15034_v37 = vmul.f32 %v14976_v60, %v17206_v32  ;;  %v15038_v0 = vmul.f32 %v14976_v60, %v17207_v27  ;;  %v15042_v41 = vmul.f32 %v14976_v60, %v17208_v22  ;;  %v17220_v32 = vld [vmem:[#allocation212_spill] sm:$0xff]  ;;  %v17221_v22 = vld [vmem:[#allocation218_spill] sm:$0xff] }
 0x410   : > { %v15046_v59 = vmul.f32 %v14976_v60, %v17209_v20  ;;  %v15050_v1 = vmul.f32 %v14976_v60, %v17210_v55  ;;  %v15054_v49 = vmul.f32 %v14976_v60, %v17211_v8  ;;  %v15058_v29 = vmul.f32 %v14976_v60, %v17212_v52  ;;  %v17222_v55 = vld [vmem:[#allocation222_spill] sm:$0xff]  ;;  %v17223_v52 = vld [vmem:[#allocation219_spill] sm:$0xff] }
 0x411   : > { %v15062_v26 = vmul.f32 %v14976_v60, %v17213_v18  ;;  %v15066_v61 = vmul.f32 %v14976_v60, %v17214_v35  ;;  %v15070_v53 = vmul.f32 %v14976_v60, %v17215_v48  ;;  %v15074_v11 = vmul.f32 %v14976_v60, %v17216_v34  ;;  %v17224_v35 = vld [vmem:[#allocation216_spill] sm:$0xff]  ;;  %v17225_v34 = vld [vmem:[#allocation226_spill] sm:$0xff] }
 0x412   : > { %v15078_v2 = vmul.f32 %v14976_v60, %v17217_v13  ;;  %v15082_v16 = vmul.f32 %v14976_v60, %v17218_v30  ;;  %v15086_v19 = vmul.f32 %v14976_v60, %v17219_v54  ;;  %v15090_v27 = vmul.f32 %v14976_v60, %v17220_v32  ;;  %v17226_v30 = vld [vmem:[#allocation231_spill] sm:$0xff]  ;;  %v17227_v32 = vld [vmem:[#allocation224_spill] sm:$0xff] }
 0x413   : > { %v15094_v20 = vmul.f32 %v14976_v60, %v17221_v22  ;;  %v15098_v8 = vmul.f32 %v14976_v60, %v17222_v55  ;;  %v15102_v18 = vmul.f32 %v14976_v60, %v17223_v52  ;;  %v15106_v48 = vmul.f32 %v14976_v60, %v17224_v35  ;;  %v17228_v55 = vld [vmem:[#allocation228_spill] sm:$0xff] }
 0x414   : > { %v15110_v13 = vmul.f32 %v14976_v60, %v17225_v34  ;;  %v15114_v54 = vmul.f32 %v14976_v60, %v17226_v30  ;;  %v15118_v22 = vmul.f32 %v14976_v60, %v17227_v32  ;;  %v15122_v52 = vmul.f32 %v14976_v60, %v17228_v55 }
 0x415   : > { %v15126_v35 = vmul.f32 %v14976_v60, %v17230_v4  ;;  %v15130_v34 = vmul.f32 %v14976_v60, %v17232_v9  ;;  %v15134_v30 = vmul.f32 %v14976_v60, %v17234_v12  ;;  %v15138_v32 = vmul.f32 %v14976_v60, %v17235_v57 }
 0x416   : > { %17229 = vst [vmem:[#allocation253_spill] sm:$0xff] %v15122_v52  ;;  %v15142_v55 = vmul.f32 %v14976_v60, %v17237_v7  ;;  %v17238_v52 = vld [vmem:[#allocation243_spill] sm:$0xff]  ;;  %v15158_v57 = vmul.f32 %v14976_v60, %v14796_v38  ;;  %v15178_v38 = vmul.f32 %v14976_v60, %v14856_v14  ;;  %v15198_v14 = vmul.f32 %v14976_v60, %v14927_v45 }
 0x417   : > { %17231 = vst [vmem:[#allocation196_spill] sm:$0xff] %v15126_v35  ;;  %17233 = vst [vmem:[#allocation197_spill] sm:$0xff] %v15130_v34  ;;  %v15146_v4 = vmul.f32 %v14976_v60, %v17238_v52  ;;  %v17239_v35 = vld [vmem:[#allocation262_spill] sm:$0xff]  ;;  %v17240_v34 = vld [vmem:[#allocation264_spill] sm:$0xff]  ;;  %v15166_v52 = vmul.f32 %v14976_v60, %v14847_v47  ;;  %v15186_v47 = vmul.f32 %v14976_v60, %v14908_v23 }
 0x418   : > { %17236 = vst [vmem:[#allocation198_spill] sm:$0xff] %v15138_v32  ;;  %v15150_v9 = vmul.f32 %v14976_v60, %v17239_v35  ;;  %v15154_v12 = vmul.f32 %v14976_v60, %v17240_v34  ;;  %v17241_v32 = vld [vmem:[#allocation268_spill] sm:$0xff]  ;;  %v15170_v35 = vmul.f32 %v14976_v60, %v14868_v39  ;;  %v15174_v34 = vmul.f32 %v14976_v60, %v14837_v42 }
 0x419   : > { %v15162_v7 = vmul.f32 %v14976_v60, %v17241_v32  ;;  %v15182_v32 = vmul.f32 %v14976_v60, %v14895_v31  ;;  %17243 = vst [vmem:[#allocation220_spill] sm:$0xff] %v15186_v47  ;;  %v15190_v39 = vmul.f32 %v14976_v60, %v14889_v28  ;;  %v15194_v42 = vmul.f32 %v14976_v60, %v14906_v6  ;;  %v17249_v47 = vld [vmem:[#allocation266_spill] sm:$0xff] }
 0x41a   : > { %17246 = vst [vmem:[#allocation227_spill] sm:$0xff] %v15198_v14  ;;  %v15202_v31 = vmul.f32 %v14976_v60, %v14944_v25  ;;  %v15206_v23 = vmul.f32 %v14976_v60, %v14938_v46  ;;  %v7567_v28 = vmul.f32 %v14976_v60, %v17249_v47  ;;  %v7569_v6 = vmul.f32 %v14976_v60, %v14728_v10  ;;  %v17252_v47 = vld [vmem:[#allocation85_spill] sm:$0xff] }
 0x41b   : > { %17242 = vst [vmem:[#allocation217_spill] sm:$0xff] %v15182_v32  ;;  %17244 = vst [vmem:[#allocation223_spill] sm:$0xff] %v15190_v39  ;;  %v17250_v39 = vld [vmem:[#allocation245_spill] sm:$0xff]  ;;  %v15216_v45 = vmul.f32 %v14976_v60, %v14942_v5  ;;  %v7570_v25 = vmul.f32 %v14976_v60, %v14773_v43  ;;  %v7571_v46 = vmul.f32 %v14976_v60, %v14788_v33  ;;  %v17255_v43 = vld [vmem:[#allocation87_spill] sm:$0xff] }
 0x41c   : > { %17245 = vst [vmem:[#allocation225_spill] sm:$0xff] %v15194_v42  ;;  %17247 = vst [vmem:[#allocation229_spill] sm:$0xff] %v15202_v31  ;;  %v7568_v32 = vmul.f32 %v14976_v60, %v17250_v39  ;;  %v15226_v31 = vadd.f32 %v17252_v47, %v14982_v15  ;;  %v17253_v39 = vld [vmem:[#allocation195_spill] sm:$0xff]  ;;  %v17254_v5 = vld [vmem:[#allocation86_spill] sm:$0xff]  ;;  %v15238_v14 = vadd.f32 %v17255_v43, %v14994_v50 }
 0x41d   : > { %17248 = vst [vmem:[#allocation232_spill] sm:$0xff] %v15206_v23  ;;  %17251 = vst [vmem:[#allocation234_spill] sm:$0xff] %v15216_v45  ;;  %v7572_v23 = vmul.f32 %v14976_v60, %v14826_v3  ;;  %v15230_v10 = vadd.f32 %v17253_v39, %v14986_v21  ;;  %v15234_v45 = vadd.f32 %v17254_v5, %v14990_v51  ;;  %v17256_v33 = vld [vmem:[#allocation88_spill] sm:$0xff]  ;;  %v17257_v3 = vld [vmem:[#allocation194_spill] sm:$0xff] }
 0x41e   : > { %v15242_v42 = vadd.f32 %v17256_v33, %v14998_v40  ;;  %v15246_v60 = vadd.f32 %v17257_v3, %v15002_v63  ;;  %v17258_v15 = vld [vmem:[#allocation89_spill] sm:$0xff]  ;;  %v17259_v47 = vld [vmem:[#allocation193_spill] sm:$0xff]  ;;  %v17261_v5 = vld [vmem:[#allocation191_spill] sm:$0xff] }
 0x41f   : > { %v15250_v21 = vadd.f32 %v17258_v15, %v15006_v36  ;;  %v15254_v51 = vadd.f32 %v17259_v47, %v15010_v24  ;;  %v17260_v39 = vld [vmem:[#allocation192_spill] sm:$0xff]  ;;  %v15262_v40 = vadd.f32 %v17261_v5, %v15018_v17  ;;  %v17262_v43 = vld [vmem:[#allocation190_spill] sm:$0xff]  ;;  %v17263_v33 = vld [vmem:[#allocation189_spill] sm:$0xff] }
 0x420   : > { %v15258_v50 = vadd.f32 %v17260_v39, %v15014_v56  ;;  %v15266_v63 = vadd.f32 %v17262_v43, %v15022_v44  ;;  %v15270_v36 = vadd.f32 %v17263_v33, %v15026_v62  ;;  %v17265_v3 = vld [vmem:[#allocation188_spill] sm:$0xff]  ;;  %v17266_v15 = vld [vmem:[#allocation187_spill] sm:$0xff]  ;;  %v17267_v47 = vld [vmem:[#allocation186_spill] sm:$0xff] }
 0x421   : > { %v15274_v24 = vadd.f32 %v17265_v3, %v15030_v58  ;;  %v15278_v56 = vadd.f32 %v17266_v15, %v15034_v37  ;;  %v15282_v17 = vadd.f32 %v17267_v47, %v15038_v0  ;;  %v17268_v39 = vld [vmem:[#allocation185_spill] sm:$0xff]  ;;  %v17269_v5 = vld [vmem:[#allocation184_spill] sm:$0xff]  ;;  %v17270_v43 = vld [vmem:[#allocation183_spill] sm:$0xff] }
 0x422   : > { %17264 = vst [vmem:[#allocation85_spill] sm:$0xff] %v15270_v36  ;;  %v15286_v44 = vadd.f32 %v17268_v39, %v15042_v41  ;;  %v15290_v62 = vadd.f32 %v17269_v5, %v15046_v59  ;;  %v15294_v58 = vadd.f32 %v17270_v43, %v15050_v1  ;;  %v17271_v33 = vld [vmem:[#allocation182_spill] sm:$0xff]  ;;  %v17272_v3 = vld [vmem:[#allocation181_spill] sm:$0xff]  ;;  %v17273_v15 = vld [vmem:[#allocation180_spill] sm:$0xff] }
 0x423   : > { %v15298_v37 = vadd.f32 %v17271_v33, %v15054_v49  ;;  %v15302_v0 = vadd.f32 %v17272_v3, %v15058_v29  ;;  %v15306_v41 = vadd.f32 %v17273_v15, %v15062_v26  ;;  %v17274_v47 = vld [vmem:[#allocation179_spill] sm:$0xff]  ;;  %v17275_v39 = vld [vmem:[#allocation178_spill] sm:$0xff]  ;;  %v17276_v5 = vld [vmem:[#allocation177_spill] sm:$0xff] }
 0x424   : > { %v15310_v59 = vadd.f32 %v17274_v47, %v15066_v61  ;;  %v15314_v1 = vadd.f32 %v17275_v39, %v15070_v53  ;;  %v15318_v49 = vadd.f32 %v17276_v5, %v15074_v11  ;;  %v17277_v43 = vld [vmem:[#allocation176_spill] sm:$0xff]  ;;  %v17278_v33 = vld [vmem:[#allocation175_spill] sm:$0xff]  ;;  %v17279_v3 = vld [vmem:[#allocation174_spill] sm:$0xff] }
 0x425   : > { %v15322_v29 = vadd.f32 %v17277_v43, %v15078_v2  ;;  %v15326_v26 = vadd.f32 %v17278_v33, %v15082_v16  ;;  %v15330_v61 = vadd.f32 %v17279_v3, %v15086_v19  ;;  %v17280_v15 = vld [vmem:[#allocation173_spill] sm:$0xff]  ;;  %v17281_v47 = vld [vmem:[#allocation172_spill] sm:$0xff]  ;;  %v17282_v39 = vld [vmem:[#allocation171_spill] sm:$0xff] }
 0x426   : > { %v15334_v53 = vadd.f32 %v17280_v15, %v15090_v27  ;;  %v15338_v11 = vadd.f32 %v17281_v47, %v15094_v20  ;;  %v15342_v2 = vadd.f32 %v17282_v39, %v15098_v8  ;;  %v17283_v5 = vld [vmem:[#allocation170_spill] sm:$0xff]  ;;  %v17285_v43 = vld [vmem:[#allocation169_spill] sm:$0xff]  ;;  %v17287_v33 = vld [vmem:[#allocation168_spill] sm:$0xff] }
 0x427   : > { %v15346_v16 = vadd.f32 %v17283_v5, %v15102_v18  ;;  %v15350_v19 = vadd.f32 %v17285_v43, %v15106_v48  ;;  %v15354_v27 = vadd.f32 %v17287_v33, %v15110_v13  ;;  %v17288_v3 = vld [vmem:[#allocation167_spill] sm:$0xff]  ;;  %v17290_v15 = vld [vmem:[#allocation166_spill] sm:$0xff]  ;;  %v17292_v47 = vld [vmem:[#allocation253_spill] sm:$0xff] }
 0x428   : > { %v15358_v20 = vadd.f32 %v17288_v3, %v15114_v54  ;;  %v15362_v8 = vadd.f32 %v17290_v15, %v15118_v22  ;;  %v17293_v39 = vld [vmem:[#allocation165_spill] sm:$0xff]  ;;  %v17294_v5 = vld [vmem:[#allocation196_spill] sm:$0xff]  ;;  %v17299_v33 = vld [vmem:[#allocation162_spill] sm:$0xff] }
 0x429   : > { %17284 = vst [vmem:[#allocation86_spill] sm:$0xff] %v15346_v16  ;;  %17286 = vst [vmem:[#allocation87_spill] sm:$0xff] %v15350_v19  ;;  %v15366_v18 = vadd.f32 %v17293_v39, %v17292_v47  ;;  %v17295_v16 = vld [vmem:[#allocation164_spill] sm:$0xff]  ;;  %v17297_v43 = vld [vmem:[#allocation197_spill] sm:$0xff]  ;;  %v15378_v54 = vadd.f32 %v17299_v33, %v15134_v30 }
 0x42a   : > { %17289 = vst [vmem:[#allocation88_spill] sm:$0xff] %v15358_v20  ;;  %17291 = vst [vmem:[#allocation89_spill] sm:$0xff] %v15362_v8  ;;  %v15370_v48 = vadd.f32 %v17295_v16, %v17294_v5  ;;  %v17298_v19 = vld [vmem:[#allocation163_spill] sm:$0xff]  ;;  %v17301_v3 = vld [vmem:[#allocation198_spill] sm:$0xff] }
 0x42b   : > { %v15374_v13 = vadd.f32 %v17298_v19, %v17297_v43  ;;  %17300 = vst [vmem:[#allocation238_spill] sm:$0xff] %v15378_v54  ;;  %v17302_v20 = vld [vmem:[#allocation161_spill] sm:$0xff]  ;;  %v17303_v15 = vld [vmem:[#allocation160_spill] sm:$0xff]  ;;  %v17305_v39 = vld [vmem:[#allocation159_spill] sm:$0xff] }
 0x42c   : > { %17296 = vst [vmem:[#allocation236_spill] sm:$0xff] %v15370_v48  ;;  %v15382_v22 = vadd.f32 %v17302_v20, %v17301_v3  ;;  %v15386_v47 = vadd.f32 %v17303_v15, %v15142_v55  ;;  %v15390_v16 = vadd.f32 %v17305_v39, %v15146_v4  ;;  %v17307_v5 = vld [vmem:[#allocation158_spill] sm:$0xff]  ;;  %v17308_v43 = vld [vmem:[#allocation157_spill] sm:$0xff]  ;;  %v17310_v33 = vld [vmem:[#allocation156_spill] sm:$0xff] }
 0x42d   : > { %v15394_v19 = vadd.f32 %v17307_v5, %v15150_v9  ;;  %v15398_v30 = vadd.f32 %v17308_v43, %v15154_v12  ;;  %v15401_v54 = vadd.f32 %v17310_v33, %v7567_v28  ;;  %v17311_v20 = vld [vmem:[#allocation155_spill] sm:$0xff]  ;;  %v17312_v55 = vld [vmem:[#allocation154_spill] sm:$0xff]  ;;  %v17314_v39 = vld [vmem:[#allocation152_spill] sm:$0xff] }
 0x42e   : > { %17304 = vst [vmem:[#allocation240_spill] sm:$0xff] %v15386_v47  ;;  %17306 = vst [vmem:[#allocation242_spill] sm:$0xff] %v15390_v16  ;;  %v15404_v3 = vadd.f32 %v17311_v20, %v7568_v32  ;;  %v15407_v15 = vadd.f32 %v17312_v55, %v7569_v6  ;;  %v17313_v47 = vld [vmem:[#allocation153_spill] sm:$0xff]  ;;  %v15413_v16 = vadd.f32 %v17314_v39, %v7571_v46  ;;  %v17315_v9 = vld [vmem:[#allocation151_spill] sm:$0xff] }
 0x42f   : > { %17309 = vst [vmem:[#allocation244_spill] sm:$0xff] %v15398_v30  ;;  %v15410_v4 = vadd.f32 %v17313_v47, %v7570_v25  ;;  %v15416_v5 = vadd.f32 %v17315_v9, %v7572_v23  ;;  %v17316_v12 = vld [vmem:[#allocation150_spill] sm:$0xff]  ;;  %v17317_v28 = vld [vmem:[#allocation149_spill] sm:$0xff]  ;;  %v17318_v6 = vld [vmem:[#allocation148_spill] sm:$0xff] }
 0x430   : > { %v15420_v43 = vadd.f32 %v17316_v12, %v15158_v57  ;;  %v15424_v32 = vadd.f32 %v17317_v28, %v15162_v7  ;;  %v15428_v33 = vadd.f32 %v17318_v6, %v15166_v52  ;;  %v17320_v25 = vld [vmem:[#allocation147_spill] sm:$0xff]  ;;  %v17322_v46 = vld [vmem:[#allocation146_spill] sm:$0xff]  ;;  %v17324_v20 = vld [vmem:[#allocation145_spill] sm:$0xff] }
 0x431   : > { %v15432_v47 = vadd.f32 %v17320_v25, %v15170_v35  ;;  %v15436_v23 = vadd.f32 %v17322_v46, %v15174_v34  ;;  %v15440_v57 = vadd.f32 %v17324_v20, %v15178_v38  ;;  %v17326_v55 = vld [vmem:[#allocation217_spill] sm:$0xff]  ;;  %v17327_v39 = vld [vmem:[#allocation144_spill] sm:$0xff]  ;;  %v17330_v12 = vld [vmem:[#allocation143_spill] sm:$0xff] }
 0x432   : > { %17319 = vst [vmem:[#allocation246_spill] sm:$0xff] %v15428_v33  ;;  %v15444_v7 = vadd.f32 %v17327_v39, %v17326_v55  ;;  %v17329_v9 = vld [vmem:[#allocation220_spill] sm:$0xff]  ;;  %v17332_v28 = vld [vmem:[#allocation223_spill] sm:$0xff]  ;;  %v17333_v6 = vld [vmem:[#allocation142_spill] sm:$0xff] }
 0x433   : > { %17321 = vst [vmem:[#allocation250_spill] sm:$0xff] %v15432_v47  ;;  %17323 = vst [vmem:[#allocation249_spill] sm:$0xff] %v15436_v23  ;;  %v15448_v52 = vadd.f32 %v17330_v12, %v17329_v9  ;;  %v15452_v35 = vadd.f32 %v17333_v6, %v17332_v28  ;;  %v17335_v25 = vld [vmem:[#allocation225_spill] sm:$0xff]  ;;  %v17339_v38 = vld [vmem:[#allocation247_spill] sm:$0xff] }
 0x434   : > { %17325 = vst [vmem:[#allocation248_spill] sm:$0xff] %v15440_v57  ;;  %17328 = vst [vmem:[#allocation255_spill] sm:$0xff] %v15444_v7  ;;  %v17336_v47 = vld [vmem:[#allocation141_spill] sm:$0xff]  ;;  %v17340_v20 = vld [vmem:[#allocation270_spill] sm:$0xff] }
 0x435   : > { %17331 = vst [vmem:[#allocation256_spill] sm:$0xff] %v15448_v52  ;;  %17334 = vst [vmem:[#allocation257_spill] sm:$0xff] %v15452_v35  ;;  %v15456_v34 = vadd.f32 %v17336_v47, %v17335_v25  ;;  %v17337_v46 = vld [vmem:[#allocation14_spill] sm:$0xff]  ;;  %v17341_v57 = vsub.f32 %v17339_v38, %v17340_v20  ;;  %v17342_v55 = vld [vmem:[#allocation227_spill] sm:$0xff] }
 0x436   : > { %v17338_v23 = vsub.s32 0, %v17337_v46  ;;  %v17343_v39 = vld [vmem:[#allocation140_spill] sm:$0xff]  ;;  %v17345_v9 = vld [vmem:[#allocation229_spill] sm:$0xff]  ;;  %v17346_v12 = vld [vmem:[#allocation139_spill] sm:$0xff] }
 0x437   : > { %v15467_v7 = vadd.f32 %v17343_v39, %v17342_v55  ;;  %v15471_v52 = vadd.f32 %v17346_v12, %v17345_v9  ;;  %v17347_v28 = vld [vmem:[#allocation232_spill] sm:$0xff]  ;;  %v17348_v6 = vld [vmem:[#allocation138_spill] sm:$0xff]  ;;  %v17350_v25 = vld [vmem:[#allocation137_spill] sm:$0xff] }
 0x438   : > { %v15463_v33 = vrot.slane %v17341_v57, %v17338_v23  ;;  %v15475_v35 = vadd.f32 %v17348_v6, %v17347_v28  ;;  %v17349_v47 = vld [vmem:[#allocation234_spill] sm:$0xff] }
 0x439   : > { %17344 = vst [vmem:[#allocation203_spill] sm:$0xff] %v15467_v7  ;;  %v15479_v46 = vadd.f32 %v17350_v25, %v17349_v47 }
 0x43a   : > { %v15483_v23 = vadd.f32 %v15463_v33, %v15226_v31   ;;  %v15487_v57 = vadd.f32 %v15463_v33, %v15230_v10   ;;  %v15491_v38 = vadd.f32 %v15463_v33, %v15234_v45   ;;  %v15495_v20 = vadd.f32 %v15463_v33, %v15238_v14  }
 0x43b   : > { %v15499_v55 = vadd.f32 %v15463_v33, %v15242_v42   ;;  %v15503_v31 = vadd.f32 %v15463_v33, %v15246_v60   ;;  %v15507_v10 = vadd.f32 %v15463_v33, %v15250_v21   ;;  %v15515_v14 = vadd.f32 %v15463_v33, %v15258_v50  }
 0x43c   : > { %17351 = vst [vmem:[#allocation84_spill] sm:$0xff] %v15483_v23  ;;  %17352 = vst [vmem:[#allocation83_spill] sm:$0xff] %v15487_v57  ;;  %v15519_v42 = vadd.f32 %v15463_v33, %v15262_v40   ;;  %v15523_v45 = vadd.f32 %v15463_v33, %v15266_v63   ;;  %v17362_v60 = vmov %v15270_v36  ;;  %v15535_v23 = vadd.f32 %v15463_v33, %v15278_v56  }
 0x43d   : > { %17353 = vst [vmem:[#allocation82_spill] sm:$0xff] %v15491_v38  ;;  %17354 = vst [vmem:[#allocation81_spill] sm:$0xff] %v15495_v20  ;;  %v15527_v21 = vadd.f32 %v15463_v33, %v17362_v60   ;;  %v15543_v9 = vadd.f32 %v15463_v33, %v15286_v44   ;;  %v15547_v50 = vadd.f32 %v15463_v33, %v15290_v62  }
 0x43e   : > { %17355 = vst [vmem:[#allocation80_spill] sm:$0xff] %v15499_v55  ;;  %17356 = vst [vmem:[#allocation79_spill] sm:$0xff] %v15503_v31  ;;  %v15511_v31 = vadd.f32 %v15463_v33, %v15254_v51   ;;  %v15539_v51 = vadd.f32 %v15463_v33, %v15282_v17   ;;  %v15551_v40 = vadd.f32 %v15463_v33, %v15294_v58  }
 0x43f   : > { %17357 = vst [vmem:[#allocation78_spill] sm:$0xff] %v15507_v10  ;;  %17359 = vst [vmem:[#allocation76_spill] sm:$0xff] %v15515_v14  ;;  %v15555_v63 = vadd.f32 %v15463_v33, %v15298_v37   ;;  %v15559_v60 = vadd.f32 %v15463_v33, %v15302_v0   ;;  %v15567_v56 = vadd.f32 %v15463_v33, %v15310_v59   ;;  %v17384_v37 = vld [vmem:[#allocation87_spill] sm:$0xff]  ;;  %v17387_v59 = vld [vmem:[#allocation88_spill] sm:$0xff] }
 0x440   : > { %17358 = vst [vmem:[#allocation77_spill] sm:$0xff] %v15511_v31  ;;  %17360 = vst [vmem:[#allocation75_spill] sm:$0xff] %v15519_v42  ;;  %v15571_v17 = vadd.f32 %v15463_v33, %v15314_v1   ;;  %v15575_v44 = vadd.f32 %v15463_v33, %v15318_v49   ;;  %v15579_v62 = vadd.f32 %v15463_v33, %v15322_v29   ;;  %v17395_v29 = vld [vmem:[#allocation238_spill] sm:$0xff] }
 0x441   : > { %17361 = vst [vmem:[#allocation74_spill] sm:$0xff] %v15523_v45  ;;  %17363 = vst [vmem:[#allocation73_spill] sm:$0xff] %v15527_v21  ;;  %v15531_v21 = vadd.f32 %v15463_v33, %v15274_v24   ;;  %v15563_v24 = vadd.f32 %v15463_v33, %v15306_v41   ;;  %v15583_v39 = vadd.f32 %v15463_v33, %v15326_v26  }
 0x442   : > { %17365 = vst [vmem:[#allocation71_spill] sm:$0xff] %v15535_v23  ;;  %17366 = vst [vmem:[#allocation70_spill] sm:$0xff] %v15539_v51  ;;  %v15591_v58 = vadd.f32 %v15463_v33, %v15334_v53   ;;  %v15595_v1 = vadd.f32 %v15463_v33, %v15338_v11   ;;  %v15599_v41 = vadd.f32 %v15463_v33, %v15342_v2   ;;  %v17398_v11 = vld [vmem:[#allocation240_spill] sm:$0xff]  ;;  %v17400_v2 = vld [vmem:[#allocation242_spill] sm:$0xff] }
 0x443   : > { %17364 = vst [vmem:[#allocation72_spill] sm:$0xff] %v15531_v21  ;;  %17367 = vst [vmem:[#allocation69_spill] sm:$0xff] %v15543_v9  ;;  %v15607_v42 = vadd.f32 %v15463_v33, %v17384_v37   ;;  %v15611_v14 = vadd.f32 %v15463_v33, %v15354_v27   ;;  %v15615_v49 = vadd.f32 %v15463_v33, %v17387_v59  }
 0x444   : > { %17368 = vst [vmem:[#allocation68_spill] sm:$0xff] %v15547_v50  ;;  %17369 = vst [vmem:[#allocation64_spill] sm:$0xff] %v15551_v40  ;;  %v15631_v28 = vadd.f32 %v15463_v33, %v15374_v13   ;;  %v15639_v53 = vadd.f32 %v15463_v33, %v15382_v22   ;;  %v15643_v38 = vadd.f32 %v15463_v33, %v17398_v11   ;;  %v17413_v13 = vld [vmem:[#allocation246_spill] sm:$0xff]  ;;  %v17417_v22 = vld [vmem:[#allocation249_spill] sm:$0xff]  ;;  %v17460_v11 = vmov %v15571_v17 }
 0x445   : > { %17370 = vst [vmem:[#allocation63_spill] sm:$0xff] %v15555_v63  ;;  %17371 = vst [vmem:[#allocation58_spill] sm:$0xff] %v15559_v60  ;;  %v15587_v63 = vadd.f32 %v15463_v33, %v15330_v61   ;;  %v15635_v61 = vadd.f32 %v15463_v33, %v17395_v29   ;;  %v15647_v40 = vadd.f32 %v15463_v33, %v17400_v2  }
 0x446   : > { %17372 = vst [vmem:[#allocation57_spill] sm:$0xff] %v15563_v24  ;;  %17373 = vst [vmem:[#allocation56_spill] sm:$0xff] %v15567_v56  ;;  %v15659_v50 = vadd.f32 %v15463_v33, %v15401_v54   ;;  %v15667_v56 = vadd.f32 %v15463_v33, %v15407_v15   ;;  %v15675_v47 = vadd.f32 %v15463_v33, %v15413_v16   ;;  %v17415_v54 = vld [vmem:[#allocation250_spill] sm:$0xff]  ;;  %v17419_v16 = vld [vmem:[#allocation248_spill] sm:$0xff] }
 0x447   : > { %17374 = vst [vmem:[#allocation55_spill] sm:$0xff] %v15571_v17  ;;  %17375 = vst [vmem:[#allocation52_spill] sm:$0xff] %v15575_v44  ;;  %v15651_v44 = vadd.f32 %v15463_v33, %v15394_v19   ;;  %v15679_v6 = vadd.f32 %v15463_v33, %v15416_v5   ;;  %v15683_v59 = vadd.f32 %v15463_v33, %v15420_v43   ;;  %v17423_v15 = vld [vmem:[#allocation256_spill] sm:$0xff]  ;;  %v17425_v5 = vld [vmem:[#allocation257_spill] sm:$0xff] }
 0x448   : > { %17376 = vst [vmem:[#allocation51_spill] sm:$0xff] %v15579_v62  ;;  %17377 = vst [vmem:[#allocation48_spill] sm:$0xff] %v15583_v39  ;;  %v17382_v62 = vld [vmem:[#allocation86_spill] sm:$0xff]  ;;  %v15687_v12 = vadd.f32 %v15463_v33, %v15424_v32   ;;  %v15699_v10 = vadd.f32 %v15463_v33, %v17417_v22   ;;  %v15703_v19 = vadd.f32 %v15463_v33, %v17419_v16   ;;  %v17453_v16 = vmov %v15615_v49  ;;  %v17467_v17 = vld [vmem:[#allocation73_spill] sm:$0xff] }
 0x449   : > { %17378 = vst [vmem:[#allocation47_spill] sm:$0xff] %v15587_v63  ;;  %17379 = vst [vmem:[#allocation44_spill] sm:$0xff] %v15591_v58  ;;  %v15603_v0 = vadd.f32 %v15463_v33, %v17382_v62   ;;  %v15671_v58 = vadd.f32 %v15463_v33, %v15410_v4   ;;  %v15695_v4 = vadd.f32 %v15463_v33, %v17415_v54   ;;  %v17471_v57 = vld [vmem:[#allocation78_spill] sm:$0xff]  ;;  %v17473_v54 = vld [vmem:[#allocation79_spill] sm:$0xff] }
 0x44a   : > { %17380 = vst [vmem:[#allocation43_spill] sm:$0xff] %v15595_v1  ;;  %17381 = vst [vmem:[#allocation40_spill] sm:$0xff] %v15599_v41  ;;  %v17389_v1 = vmov %v15362_v8  ;;  %v15623_v41 = vadd.f32 %v15463_v33, %v15366_v18   ;;  %v15663_v18 = vadd.f32 %v15463_v33, %v15404_v3   ;;  %v17421_v3 = vld [vmem:[#allocation255_spill] sm:$0xff]  ;;  %v15711_v25 = vadd.f32 %v15463_v33, %v17423_v15   ;;  %v17468_v15 = vld [vmem:[#allocation74_spill] sm:$0xff] }
 0x44b   : > { %17383 = vst [vmem:[#allocation39_spill] sm:$0xff] %v15603_v0  ;;  %17385 = vst [vmem:[#allocation36_spill] sm:$0xff] %v15607_v42  ;;  %v15619_v20 = vadd.f32 %v15463_v33, %v17389_v1   ;;  %v17392_v0 = vmov %v15370_v48  ;;  %v15707_v37 = vadd.f32 %v15463_v33, %v17421_v3   ;;  %v15715_v51 = vadd.f32 %v15463_v33, %v17425_v5   ;;  %v17464_v43 = vld [vmem:[#allocation64_spill] sm:$0xff]  ;;  %v17469_v5 = vld [vmem:[#allocation75_spill] sm:$0xff] }
 0x44c   : > { %17386 = vst [vmem:[#allocation35_spill] sm:$0xff] %v15611_v14  ;;  %17388 = vst [vmem:[#allocation34_spill] sm:$0xff] %v15615_v49  ;;  %v15627_v26 = vadd.f32 %v15463_v33, %v17392_v0   ;;  %v15719_v3 = vadd.f32 %v15463_v33, %v15456_v34   ;;  %v15727_v55 = vadd.f32 %v15463_v33, %v15471_v52   ;;  %v17449_v34 = vmov %v15639_v53  ;;  %v17465_v29 = vld [vmem:[#allocation68_spill] sm:$0xff]  ;;  %v17494_v43 = vld [vmem:[#allocation74_spill] sm:$0xff] (%p15740_p5) }
 0x44d   : > { %17390 = vst [vmem:[#allocation33_spill] sm:$0xff] %v15619_v20  ;;  %17391 = vst [vmem:[#allocation32_spill] sm:$0xff] %v15623_v41  ;;  %v15731_v45 = vadd.f32 %v15463_v33, %v15475_v35   ;;  %v15735_v24 = vadd.f32 %v15463_v33, %v15479_v46   ;;  %v17452_v22 = vmov %v15623_v41  ;;  %v17461_v49 = vld [vmem:[#allocation56_spill] sm:$0xff]  ;;  %v17499_v34 = vld [vmem:[#allocation69_spill] sm:$0xff] (%p15740_p5) }
 0x44e   : > { %17393 = vst [vmem:[#allocation31_spill] sm:$0xff] %v15627_v26  ;;  %17394 = vst [vmem:[#allocation30_spill] sm:$0xff] %v15631_v28  ;;  %v17403_v26 = vmov %v15398_v30  ;;  %v17444_v48 = vmov %v15719_v3  ;;  %v17459_v35 = vld [vmem:[#allocation52_spill] sm:$0xff]  ;;  %v17503_v28 = vld [vmem:[#allocation58_spill] sm:$0xff] (%p15740_p5) }
 0x44f   : > { %17396 = vst [vmem:[#allocation29_spill] sm:$0xff] %v15635_v61  ;;  %17397 = vst [vmem:[#allocation28_spill] sm:$0xff] %v15639_v53  ;;  %v15655_v27 = vadd.f32 %v15463_v33, %v17403_v26   ;;  %v17435_v30 = vmov %v15731_v45  ;;  %v17439_v36 = vmov %v15735_v24  ;;  %v17458_v62 = vld [vmem:[#allocation51_spill] sm:$0xff]  ;;  %v17470_v53 = vld [vmem:[#allocation76_spill] sm:$0xff] }
 0x450   : > { %17399 = vst [vmem:[#allocation27_spill] sm:$0xff] %v15643_v38  ;;  %17401 = vst [vmem:[#allocation26_spill] sm:$0xff] %v15647_v40  ;;  %v17457_v2 = vld [vmem:[#allocation44_spill] sm:$0xff]  ;;  %v17498_v35 = vld [vmem:[#allocation70_spill] sm:$0xff] (%p15740_p5) }
 0x451   : > { %17402 = vst [vmem:[#allocation25_spill] sm:$0xff] %v15651_v44  ;;  %17404 = vst [vmem:[#allocation24_spill] sm:$0xff] %v15655_v27  ;;  %v17448_v46 = vmov %v15655_v27  ;;  %v17455_v41 = vld [vmem:[#allocation40_spill] sm:$0xff]  ;;  %v17456_v1 = vld [vmem:[#allocation43_spill] sm:$0xff] }
 0x452   : > { %17405 = vst [vmem:[#allocation23_spill] sm:$0xff] %v15659_v50  ;;  %17406 = vst [vmem:[#allocation22_spill] sm:$0xff] %v15663_v18  ;;  %v15691_v18 = vadd.f32 %v15463_v33, %v17413_v13   ;;  %v17454_v0 = vld [vmem:[#allocation39_spill] sm:$0xff]  ;;  %v17466_v27 = vld [vmem:[#allocation70_spill] sm:$0xff] }
 0x453   : > { %17407 = vst [vmem:[#allocation21_spill] sm:$0xff] %v15667_v56  ;;  %17408 = vst [vmem:[#allocation20_spill] sm:$0xff] %v15671_v58  ;;  %v17463_v13 = vld [vmem:[#allocation63_spill] sm:$0xff]  ;;  %v17490_v1 = vld [vmem:[#allocation78_spill] sm:$0xff] (%p15740_p5) }
 0x454   : > { %17409 = vst [vmem:[#allocation19_spill] sm:$0xff] %v15675_v47  ;;  %17410 = vst [vmem:[#allocation18_spill] sm:$0xff] %v15679_v6  ;;  %v17489_v0 = vld [vmem:[#allocation79_spill] sm:$0xff] (%p15740_p5)  ;;  %v17500_v39 = vld [vmem:[#allocation68_spill] sm:$0xff] (%p15740_p5) }
 0x455   : > { %17411 = vst [vmem:[#allocation17_spill] sm:$0xff] %v15683_v59  ;;  %17412 = vst [vmem:[#allocation16_spill] sm:$0xff] %v15687_v12  ;;  %v17451_v26 = vld [vmem:[#allocation31_spill] sm:$0xff]  ;;  %v17501_v9 = vld [vmem:[#allocation64_spill] sm:$0xff] (%p15740_p5) }
 0x456   : > { %17414 = vst [vmem:[#allocation15_spill] sm:$0xff] %v15691_v18  ;;  %17416 = vst [vmem:[#allocation13_spill] sm:$0xff] %v15695_v4  ;;  %v17429_v4 = vmov %v15467_v7  ;;  %v17433_v7 = vmov %v15727_v55  ;;  %v17450_v32 = vld [vmem:[#allocation29_spill] sm:$0xff]  ;;  %v17502_v12 = vld [vmem:[#allocation63_spill] sm:$0xff] (%p15740_p5) }
 0x457   : > { %17418 = vst [vmem:[#allocation12_spill] sm:$0xff] %v15699_v10  ;;  %17420 = vst [vmem:[#allocation11_spill] sm:$0xff] %v15703_v19  ;;  %v15723_v61 = vadd.f32 %v15463_v33, %v17429_v4   ;;  %v17462_v33 = vld [vmem:[#allocation57_spill] sm:$0xff]  ;;  %v17505_v47 = vld [vmem:[#allocation56_spill] sm:$0xff] (%p15740_p5) }
 0x458   : > { %17422 = vst [vmem:[#allocation10_spill] sm:$0xff] %v15707_v37  ;;  %17424 = vst [vmem:[#allocation9_spill] sm:$0xff] %v15711_v25  ;;  %1579 = sbr.rel (!%p15740_p5) target bundleno = 135 (0x87), region = 59  ;;  %v17491_v19 = vld [vmem:[#allocation77_spill] sm:$0xff] (%p15740_p5)  ;;  %v17496_v33 = vld [vmem:[#allocation72_spill] sm:$0xff] (%p15740_p5) }
 0x459   : > { %17426 = vst [vmem:[#allocation8_spill] sm:$0xff] %v15715_v51  ;;  %17427 = vst [vmem:[#allocation272_spill] sm:$0xff] %v15719_v3  ;;  %v17431_v8 = vmov %v15723_v61  ;;  %v17445_v3 = vmov %v17444_v48  ;;  %v17447_v52 = vld [vmem:[#allocation22_spill] sm:$0xff]  ;;  %v17485_v48 = vld [vmem:[#allocation83_spill] sm:$0xff] (%p15740_p5) }
 0x45a   : > { %17430 = vst [vmem:[#allocation273_spill] sm:$0xff] %v15723_v61  ;;  %17432 = vst [vmem:[#allocation274_spill] sm:$0xff] %v15727_v55  ;;  %v17442_v55 = vmov %v17433_v7  ;;  %v17443_v61 = vmov %v17431_v8  ;;  %v17481_v7 = vld [vmem:[#allocation84_spill] sm:$0xff]  ;;  %v17495_v32 = vld [vmem:[#allocation73_spill] sm:$0xff] (%p15740_p5) }
 0x45b   : > { %17434 = vst [vmem:[#allocation275_spill] sm:$0xff] %v15731_v45  ;;  %17436 = vst [vmem:[#allocation276_spill] sm:$0xff] %v15735_v24  ;;  %v17440_v24 = vmov %v17439_v36  ;;  %v17441_v45 = vmov %v17435_v30  ;;  %v17474_v36 = vld [vmem:[#allocation80_spill] sm:$0xff]  ;;  %v17478_v30 = vld [vmem:[#allocation82_spill] sm:$0xff] }
 0x45c   : > { %17472 = vst [vmem:[#allocation89_spill] sm:$0xff] %v17471_v57  ;;  %17475 = vst [vmem:[#allocation88_spill] sm:$0xff] %v17474_v36  ;;  %v17476_v36 = vld [vmem:[#allocation81_spill] sm:$0xff]  ;;  %v17480_v57 = vld [vmem:[#allocation83_spill] sm:$0xff] }
 0x45d   : > { %v17446_v4 = vld [vmem:[#allocation13_spill] sm:$0xff]  ;;  %17477 = vst [vmem:[#allocation87_spill] sm:$0xff] %v17476_v36  ;;  %17479 = vst [vmem:[#allocation86_spill] sm:$0xff] %v17478_v30  ;;  %v17484_v8 = vld [vmem:[#allocation84_spill] sm:$0xff] (%p15740_p5) }
 0x45e   : > { %17482 = vst [vmem:[#allocation85_spill] sm:$0xff] %v17481_v7  ;;  %7722 = vst.msk [vmem:[#allocation5] sm:$0xff] (%p15740_p5), %vm2265_vm3, %v17484_v8  ;;  %v17486_v36 = vld [vmem:[#allocation82_spill] sm:$0xff] (%p15740_p5)  ;;  %v17487_v30 = vld [vmem:[#allocation81_spill] sm:$0xff] (%p15740_p5) }
 0x45f   :  { %7723 = vst.msk [vmem:[#allocation5 + $0x8] sm:$0xff] %vm2265_vm3, %v17485_v48  ;;  %7724 = vst.msk [vmem:[#allocation5 + $0x10] sm:$0xff] %vm2265_vm3, %v17486_v36  ;;  %v17488_v7 = vld [vmem:[#allocation80_spill] sm:$0xff]  ;;  %v17493_v48 = vld [vmem:[#allocation75_spill] sm:$0xff] }
 0x460   :  { %7725 = vst.msk [vmem:[#allocation5 + $0x18] sm:$0xff] %vm2265_vm3, %v17487_v30  ;;  %7726 = vst.msk [vmem:[#allocation5 + $0x20] sm:$0xff] %vm2265_vm3, %v17488_v7  ;;  %v17492_v8 = vld [vmem:[#allocation76_spill] sm:$0xff]  ;;  %v17497_v52 = vld [vmem:[#allocation71_spill] sm:$0xff] }
 0x461   :  { %7727 = vst.msk [vmem:[#allocation5 + $0x28] sm:$0xff] %vm2265_vm3, %v17489_v0  ;;  %7728 = vst.msk [vmem:[#allocation5 + $0x30] sm:$0xff] %vm2265_vm3, %v17490_v1  ;;  %v17504_v6 = vld [vmem:[#allocation57_spill] sm:$0xff]  ;;  %v17506_v25 = vld [vmem:[#allocation55_spill] sm:$0xff] }
 0x462   :  { %7729 = vst.msk [vmem:[#allocation5 + $0x38] sm:$0xff] %vm2265_vm3, %v17491_v19  ;;  %7730 = vst.msk [vmem:[#allocation5 + $0x40] sm:$0xff] %vm2265_vm3, %v17492_v8  ;;  %v17507_v46 = vld [vmem:[#allocation52_spill] sm:$0xff]  ;;  %v17508_v23 = vld [vmem:[#allocation51_spill] sm:$0xff] }
 0x463   :  { %7731 = vst.msk [vmem:[#allocation5 + $0x48] sm:$0xff] %vm2265_vm3, %v17493_v48  ;;  %7732 = vst.msk [vmem:[#allocation5 + $0x50] sm:$0xff] %vm2265_vm3, %v17494_v43  ;;  %v17509_v38 = vld [vmem:[#allocation48_spill] sm:$0xff]  ;;  %v17510_v20 = vld [vmem:[#allocation47_spill] sm:$0xff] }
 0x464   :  { %7733 = vst.msk [vmem:[#allocation5 + $0x58] sm:$0xff] %vm2265_vm3, %v17495_v32  ;;  %7734 = vst.msk [vmem:[#allocation5 + $0x60] sm:$0xff] %vm2265_vm3, %v17496_v33  ;;  %v17511_v55 = vld [vmem:[#allocation44_spill] sm:$0xff]  ;;  %v17512_v31 = vld [vmem:[#allocation43_spill] sm:$0xff] }
 0x465   :  { %7735 = vst.msk [vmem:[#allocation5 + $0x68] sm:$0xff] %vm2265_vm3, %v17497_v52  ;;  %7736 = vst.msk [vmem:[#allocation5 + $0x70] sm:$0xff] %vm2265_vm3, %v17498_v35  ;;  %v17513_v10 = vld [vmem:[#allocation40_spill] sm:$0xff]  ;;  %v17514_v14 = vld [vmem:[#allocation39_spill] sm:$0xff] }
 0x466   :  { %7737 = vst.msk [vmem:[#allocation5 + $0x78] sm:$0xff] %vm2265_vm3, %v17499_v34  ;;  %7738 = vst.msk [vmem:[#allocation5 + $0x80] sm:$0xff] %vm2265_vm3, %v17500_v39  ;;  %v17515_v42 = vld [vmem:[#allocation36_spill] sm:$0xff]  ;;  %v17516_v45 = vld [vmem:[#allocation35_spill] sm:$0xff] }
 0x467   :  { %7739 = vst.msk [vmem:[#allocation5 + $0x88] sm:$0xff] %vm2265_vm3, %v17501_v9  ;;  %7740 = vst.msk [vmem:[#allocation5 + $0x90] sm:$0xff] %vm2265_vm3, %v17502_v12  ;;  %v17517_v60 = vld [vmem:[#allocation34_spill] sm:$0xff]  ;;  %v17518_v21 = vld [vmem:[#allocation33_spill] sm:$0xff] }
 0x468   :  { %7741 = vst.msk [vmem:[#allocation5 + $0x98] sm:$0xff] %vm2265_vm3, %v17503_v28  ;;  %7742 = vst.msk [vmem:[#allocation5 + $0xa0] sm:$0xff] %vm2265_vm3, %v17504_v6  ;;  %v17519_v51 = vld [vmem:[#allocation32_spill] sm:$0xff]  ;;  %v17520_v50 = vld [vmem:[#allocation31_spill] sm:$0xff] }
 0x469   :  { %7743 = vst.msk [vmem:[#allocation5 + $0xa8] sm:$0xff] %vm2265_vm3, %v17505_v47  ;;  %7744 = vst.msk [vmem:[#allocation5 + $0xb0] sm:$0xff] %vm2265_vm3, %v17506_v25  ;;  %v17521_v40 = vld [vmem:[#allocation30_spill] sm:$0xff]  ;;  %v17522_v63 = vld [vmem:[#allocation29_spill] sm:$0xff] }
 0x46a   :  { %7745 = vst.msk [vmem:[#allocation5 + $0xb8] sm:$0xff] %vm2265_vm3, %v17507_v46  ;;  %7746 = vst.msk [vmem:[#allocation5 + $0xc0] sm:$0xff] %vm2265_vm3, %v17508_v23  ;;  %v17523_v24 = vld [vmem:[#allocation28_spill] sm:$0xff]  ;;  %v17524_v56 = vld [vmem:[#allocation27_spill] sm:$0xff] }
 0x46b   :  { %7747 = vst.msk [vmem:[#allocation5 + $0xc8] sm:$0xff] %vm2265_vm3, %v17509_v38  ;;  %7748 = vst.msk [vmem:[#allocation5 + $0xd0] sm:$0xff] %vm2265_vm3, %v17510_v20  ;;  %v17525_v17 = vld [vmem:[#allocation26_spill] sm:$0xff]  ;;  %v17526_v44 = vld [vmem:[#allocation25_spill] sm:$0xff] }
 0x46c   :  { %7749 = vst.msk [vmem:[#allocation5 + $0xd8] sm:$0xff] %vm2265_vm3, %v17511_v55  ;;  %7750 = vst.msk [vmem:[#allocation5 + $0xe0] sm:$0xff] %vm2265_vm3, %v17512_v31  ;;  %v17527_v58 = vld [vmem:[#allocation24_spill] sm:$0xff]  ;;  %v17528_v62 = vld [vmem:[#allocation23_spill] sm:$0xff] }
 0x46d   :  { %7751 = vst.msk [vmem:[#allocation5 + $0xe8] sm:$0xff] %vm2265_vm3, %v17513_v10  ;;  %7752 = vst.msk [vmem:[#allocation5 + $0xf0] sm:$0xff] %vm2265_vm3, %v17514_v14  ;;  %v17529_v37 = vld [vmem:[#allocation22_spill] sm:$0xff]  ;;  %v17530_v59 = vld [vmem:[#allocation21_spill] sm:$0xff] }
 0x46e   :  { %7753 = vst.msk [vmem:[#allocation5 + $0xf8] sm:$0xff] %vm2265_vm3, %v17515_v42  ;;  %7754 = vst.msk [vmem:[#allocation5 + $0x100] sm:$0xff] %vm2265_vm3, %v17516_v45  ;;  %v17531_v49 = vld [vmem:[#allocation20_spill] sm:$0xff]  ;;  %v17532_v41 = vld [vmem:[#allocation19_spill] sm:$0xff] }
 0x46f   :  { %7755 = vst.msk [vmem:[#allocation5 + $0x108] sm:$0xff] %vm2265_vm3, %v17517_v60  ;;  %7756 = vst.msk [vmem:[#allocation5 + $0x110] sm:$0xff] %vm2265_vm3, %v17518_v21  ;;  %v17533_v29 = vld [vmem:[#allocation18_spill] sm:$0xff]  ;;  %v17534_v61 = vld [vmem:[#allocation17_spill] sm:$0xff] }
 0x470   :  { %7757 = vst.msk [vmem:[#allocation5 + $0x118] sm:$0xff] %vm2265_vm3, %v17519_v51  ;;  %7758 = vst.msk [vmem:[#allocation5 + $0x120] sm:$0xff] %vm2265_vm3, %v17520_v50  ;;  %v17535_v53 = vld [vmem:[#allocation16_spill] sm:$0xff]  ;;  %v17536_v11 = vld [vmem:[#allocation15_spill] sm:$0xff] }
 0x471   :  { %7759 = vst.msk [vmem:[#allocation5 + $0x128] sm:$0xff] %vm2265_vm3, %v17521_v40  ;;  %7760 = vst.msk [vmem:[#allocation5 + $0x130] sm:$0xff] %vm2265_vm3, %v17522_v63  ;;  %v17537_v2 = vld [vmem:[#allocation13_spill] sm:$0xff]  ;;  %v17538_v26 = vld [vmem:[#allocation12_spill] sm:$0xff] }
 0x472   :  { %7761 = vst.msk [vmem:[#allocation5 + $0x138] sm:$0xff] %vm2265_vm3, %v17523_v24  ;;  %7762 = vst.msk [vmem:[#allocation5 + $0x140] sm:$0xff] %vm2265_vm3, %v17524_v56  ;;  %v17539_v27 = vld [vmem:[#allocation11_spill] sm:$0xff]  ;;  %v17540_v18 = vld [vmem:[#allocation10_spill] sm:$0xff] }
 0x473   :  { %7763 = vst.msk [vmem:[#allocation5 + $0x148] sm:$0xff] %vm2265_vm3, %v17525_v17  ;;  %7764 = vst.msk [vmem:[#allocation5 + $0x150] sm:$0xff] %vm2265_vm3, %v17526_v44  ;;  %v17541_v13 = vld [vmem:[#allocation9_spill] sm:$0xff]  ;;  %v17542_v54 = vld [vmem:[#allocation8_spill] sm:$0xff] }
 0x474   :  { %7765 = vst.msk [vmem:[#allocation5 + $0x158] sm:$0xff] %vm2265_vm3, %v17527_v58  ;;  %7766 = vst.msk [vmem:[#allocation5 + $0x160] sm:$0xff] %vm2265_vm3, %v17528_v62  ;;  %v17543_v22 = vld [vmem:[#allocation272_spill] sm:$0xff]  ;;  %v17544_v16 = vld [vmem:[#allocation273_spill] sm:$0xff] }
 0x475   :  { %7767 = vst.msk [vmem:[#allocation5 + $0x168] sm:$0xff] %vm2265_vm3, %v17529_v37  ;;  %7768 = vst.msk [vmem:[#allocation5 + $0x170] sm:$0xff] %vm2265_vm3, %v17530_v59  ;;  %v17545_v3 = vld [vmem:[#allocation274_spill] sm:$0xff]  ;;  %v17546_v15 = vld [vmem:[#allocation275_spill] sm:$0xff] }
 0x476   :  { %7769 = vst.msk [vmem:[#allocation5 + $0x178] sm:$0xff] %vm2265_vm3, %v17531_v49  ;;  %7770 = vst.msk [vmem:[#allocation5 + $0x180] sm:$0xff] %vm2265_vm3, %v17532_v41  ;;  %v17547_v5 = vld [vmem:[#allocation276_spill] sm:$0xff] }
 0x477   :  { %7771 = vst.msk [vmem:[#allocation5 + $0x188] sm:$0xff] %vm2265_vm3, %v17533_v29  ;;  %7772 = vst.msk [vmem:[#allocation5 + $0x190] sm:$0xff] %vm2265_vm3, %v17534_v61 }
 0x478   :  { %7773 = vst.msk [vmem:[#allocation5 + $0x198] sm:$0xff] %vm2265_vm3, %v17535_v53  ;;  %7774 = vst.msk [vmem:[#allocation5 + $0x1a0] sm:$0xff] %vm2265_vm3, %v17536_v11 }
 0x479   :  { %7775 = vst.msk [vmem:[#allocation5 + $0x1a8] sm:$0xff] %vm2265_vm3, %v17537_v2  ;;  %7776 = vst.msk [vmem:[#allocation5 + $0x1b0] sm:$0xff] %vm2265_vm3, %v17538_v26 }
 0x47a   :  { %7777 = vst.msk [vmem:[#allocation5 + $0x1b8] sm:$0xff] %vm2265_vm3, %v17539_v27  ;;  %7778 = vst.msk [vmem:[#allocation5 + $0x1c0] sm:$0xff] %vm2265_vm3, %v17540_v18 }
 0x47b   :  { %7779 = vst.msk [vmem:[#allocation5 + $0x1c8] sm:$0xff] %vm2265_vm3, %v17541_v13  ;;  %7780 = vst.msk [vmem:[#allocation5 + $0x1d0] sm:$0xff] %vm2265_vm3, %v17542_v54 }
 0x47c   :  { %7781 = vst.msk [vmem:[#allocation5 + $0x1d8] sm:$0xff] %vm2265_vm3, %v17543_v22  ;;  %7782 = vst.msk [vmem:[#allocation5 + $0x1e0] sm:$0xff] %vm2265_vm3, %v17544_v16 }
 0x47d   :  { %7783 = vst.msk [vmem:[#allocation5 + $0x1e8] sm:$0xff] %vm2265_vm3, %v17545_v3  ;;  %7784 = vst.msk [vmem:[#allocation5 + $0x1f0] sm:$0xff] %vm2265_vm3, %v17546_v15 }
 0x47e   :  { %7785 = vst.msk [vmem:[#allocation5 + $0x1f8] sm:$0xff] %vm2265_vm3, %v17547_v5 }
 0x47f   :  { %10479 = shalt.err (!%p10476_p10)
}
 0x480   :  { %s10480_s21 = scalar_lea.hbm %s16088_s6, 8192 }
 0x481   :  { %p10481_p11 = scmp.ne.s32.totalorder %s16088_s6, %s10480_s21  ;;  %p10484_p12 = scmp.lt.u32.totalorder %s10480_s21, %s16088_s6 }
 0x483   :  { %p10486_p13 = pnand %p10484_p12, %p10481_p11 }
 0x485   :  { %10489 = shalt.err (!%p10486_p13)
}
 0x486   :  { %s11017_s26 = smov 128   ;;  %s11018_s27 = smov 8  }
 0x487   :  { %7797 = dma.vmem_to_hbm [thread:$0]  %s7792_s2, 8192, %s16088_s6, [#allocation3], %s11017_s26, %s11017_s26, %s11018_s27  }
 0x488   :  { %10752 = dma.done.wait [#allocation3], 8192  }
 0x489   :  { %10753 = vsyncadd [#allocation3], 4294959104 }
 0x48a   :  { %7801 = vsyncpa [#allocation3], 1 }
 0x48b   :  { %7802 = vsyncpa [#allocation4], 1 }

</bundles_post_ra>
